<compile_context>
chip_gen: v5e
topology: v5e:2x2
jax: 0.10.0
libtpu: 0.0.40
codegen_flags: <defaults>
</compile_context>

<pallas_src>
import functools
import math

import jax
import jax.numpy as jnp
from jax.experimental import pallas as pl
from jax.experimental.pallas import tpu as pltpu

BN_EPS = 1e-5
TM = 512  # target M-tile for the conv layers (review: 512-1024 ~85% roofline)


def _round_up(x, m):
    return ((x + m - 1) // m) * m


def _choose_tile(m, target=TM):
    """Largest-ish tile that (a) is a multiple of 8, (b) keeps grid >= 2 for
    v7x's two TensorCores, (c) avoids a mostly-padding final tile."""
    if m <= 8:
        return m
    n_tiles = max(2, pl.cdiv(m, target))
    tm = _round_up(pl.cdiv(m, n_tiles), 8)
    return min(tm, m)


# ---------------------------------------------------------------------------
# Pallas kernels
# ---------------------------------------------------------------------------
def _conv_pool_kernel(p00_ref, p01_ref, p10_ref, p11_ref, w_ref, b_ref, o_ref):
    """Fused conv(+folded BN) + ReLU + 2x2 max-pool for conv1/conv2.

    p??_ref: (tm, Kp) bf16 im2col patches, one per 2x2 pool offset (K zero-
             padded to a multiple of 128 -> unmasked lane tiles on the K axis).
    w_ref:   (Kp, Cout) bf16 BN-folded weight (VMEM-resident, constant map).
    b_ref:   (1, Cout)  f32 BN-folded bias.
    o_ref:   (tm, Cout) bf16 pooled activation.  Cout is 16/32 here, so the
             store is a masked (narrow-lane) vst -- accepted per review.
    """
    w = w_ref[...]

    def dot(p_ref):
        return jnp.dot(p_ref[...], w, preferred_element_type=jnp.float32)

    # max(relu(x_i + b)) == relu(max_i(x_i) + b): pool first, bias/ReLU once.
    m = jnp.maximum(jnp.maximum(dot(p00_ref), dot(p01_ref)),
                    jnp.maximum(dot(p10_ref), dot(p11_ref)))
    o_ref[...] = jnp.maximum(m + b_ref[...], 0.0).astype(o_ref.dtype)


def _conv3_fc_head_kernel(n_pos, p3_ref, w3_ref, b3_ref, w1_ref, b1_ref,
                          w2_ref, b2_ref, o_ref):
    """Fused conv3(+BN) + ReLU + pool + flatten + fc1 + ReLU + fc2 + log_softmax.

    p3_ref: (n_pos, 4, tn, K3p) bf16 conv3 patches, indexed by
            (pooled position, 2x2 pool offset, image, im2col column).
    w3_ref: (K3p, 64) bf16, b3_ref: (1, 64) f32      -- BN-folded conv3.
    w1_ref: (n_pos, 64, 256) bf16  -- fc1 weight split per pooled position
            (flatten folded into the weight; no in-kernel reshape needed).
    b1_ref: (1, 256) f32 (hidden zero-padded 250->256).
    w2_ref: (256, num_classes) bf16, b2_ref: (1, num_classes) f32.
    o_ref:  (tn, num_classes) f32 log-probabilities.
    """
    w3 = w3_ref[...]
    b3 = b3_ref[...]

    h = None  # (tn, 256) f32 fc1 pre-activation accumulator (lane-dense)
    for p in range(n_pos):
        m = None
        for o in range(4):  # 2x2 pool offsets
            d = jnp.dot(p3_ref[p, o, :, :], w3,
                        preferred_element_type=jnp.float32)
            m = d if m is None else jnp.maximum(m, d)
        a = jnp.maximum(m + b3, 0.0)                       # (tn, 64) f32
        c = jnp.dot(a.astype(jnp.bfloat16), w1_ref[p],
                    preferred_element_type=jnp.float32)    # (tn, 256) f32
        h = c if h is None else h + c

    h = jnp.maximum(h + b1_ref[...], 0.0)
    # TODO(synk): F.dropout(p=0.4) is identity in eval mode; training-mode
    # dropout would use pltpu.prng_seed / pltpu.prng_random_bits here.
    logits = jnp.dot(h.astype(jnp.bfloat16), w2_ref[...],
                     preferred_element_type=jnp.float32) + b2_ref[...]
    mx = jnp.max(logits, axis=-1, keepdims=True)
    shifted = logits - mx
    lse = jnp.log(jnp.sum(jnp.exp(shifted), axis=-1, keepdims=True))
    o_ref[...] = (shifted - lse).astype(o_ref.dtype)


# ---------------------------------------------------------------------------
# XLA-side patch extraction (cheap glue at these sizes)
# ---------------------------------------------------------------------------
def pooled_patches(x, k, pad, k_padded):
    """x: (N,H,W,C) bf16.  Returns 4 im2col matrices (one per 2x2 pool
    offset), each (N*Hp*Wp, k_padded) with column order (kh, kw, Cin) and
    zero-padded K, plus (N, Hp, Wp).  Floor-mode pooling."""
    if pad:
        x = jnp.pad(x, ((0, 0), (pad, pad), (pad, pad), (0, 0)))
    N, H, W, C = x.shape
    Ho, Wo = H - k + 1, W - k + 1
    Hp, Wp = Ho // 2, Wo // 2
    K = k * k * C
    mats = []
    for dh in range(2):
        for dw in range(2):
            cols = [x[:, dh + kh: dh + kh + 2 * Hp: 2,
                      dw + kw: dw + kw + 2 * Wp: 2, :]
                    for kh in range(k) for kw in range(k)]
            p = jnp.concatenate(cols, axis=-1).reshape(N * Hp * Wp, K)
            if k_padded > K:
                p = jnp.pad(p, ((0, 0), (0, k_padded - K)))
            mats.append(p)
    return mats, (N, Hp, Wp)


def conv3_fused_patches(x, k, pad, k_padded):
    """Patches for the fused conv3+fc kernel, laid out as
    (n_pos, 4, N, k_padded): (pooled position, pool offset, image, K)."""
    if pad:
        x = jnp.pad(x, ((0, 0), (pad, pad), (pad, pad), (0, 0)))
    N, H, W, C = x.shape
    Ho, Wo = H - k + 1, W - k + 1
    Hp, Wp = Ho // 2, Wo // 2
    K = k * k * C
    pos = []
    for ph in range(Hp):
        for pw in range(Wp):
            offs = []
            for dh in range(2):
                for dw in range(2):
                    h0, w0 = 2 * ph + dh, 2 * pw + dw
                    cols = [x[:, h0 + kh, w0 + kw, :]
                            for kh in range(k) for kw in range(k)]
                    patch = jnp.concatenate(cols, axis=-1)       # (N, K)
                    if k_padded > K:
                        patch = jnp.pad(patch, ((0, 0), (0, k_padded - K)))
                    offs.append(patch)
            pos.append(jnp.stack(offs, 0))                       # (4, N, Kp)
    return jnp.stack(pos, 0), (Hp, Wp)                           # (n_pos,4,N,Kp)


# ---------------------------------------------------------------------------
# Layer wrappers
# ---------------------------------------------------------------------------
def conv_bn_relu_pool(x, w_mat, b_row, *, k, pad):
    """One fused conv+BN+ReLU+pool layer.  x: NHWC bf16 -> NHWC bf16."""
    kp, cout = w_mat.shape
    mats, (N, Hp, Wp) = pooled_patches(x, k, pad, kp)
    M = N * Hp * Wp
    tm = _choose_tile(M)
    grid = (pl.cdiv(M, tm),)

    patch_spec = pl.BlockSpec((tm, kp), lambda i: (i, 0))
    out = pl.pallas_call(
        _conv_pool_kernel,
        out_shape=jax.ShapeDtypeStruct((M, cout), jnp.bfloat16),
        grid=grid,
        in_specs=[patch_spec, patch_spec, patch_spec, patch_spec,
                  pl.BlockSpec((kp, cout), lambda i: (0, 0)),   # resident weight
                  pl.BlockSpec((1, cout), lambda i: (0, 0))],   # resident bias
        out_specs=pl.BlockSpec((tm, cout), lambda i: (i, 0)),
        compiler_params=pltpu.CompilerParams(
            dimension_semantics=("parallel",)),
    )(*mats, w_mat, b_row)
    # (N*Hp*Wp, Cout) row-major == (N, Hp, Wp, Cout): free reshape.
    return out.reshape(N, Hp, Wp, cout)


def conv3_fc_head(x, conv3_params, fc_params, *, k, pad):
    """Fused conv3(+BN)+ReLU+pool + fc1+ReLU + fc2 + log_softmax."""
    w3, b3 = conv3_params
    w1, b1, w2, b2 = fc_params
    kp, c3 = w3.shape
    n_pos, _, hidp = w1.shape
    nc = w2.shape[1]

    p3, (Hp, Wp) = conv3_fused_patches(x, k, pad, kp)
    assert Hp * Wp == n_pos, "fc1 weight layout / conv3 pooled size mismatch"
    N = x.shape[0]
    tn = N if N <= 256 else 256
    grid = (pl.cdiv(N, tn),)

    kernel = functools.partial(_conv3_fc_head_kernel, n_pos)
    return pl.pallas_call(
        kernel,
        out_shape=jax.ShapeDtypeStruct((N, nc), jnp.float32),
        grid=grid,
        in_specs=[
            pl.BlockSpec((n_pos, 4, tn, kp), lambda i: (0, 0, i, 0)),
            pl.BlockSpec((kp, c3), lambda i: (0, 0)),
            pl.BlockSpec((1, c3), lambda i: (0, 0)),
            pl.BlockSpec((n_pos, c3, hidp), lambda i: (0, 0, 0)),
            pl.BlockSpec((1, hidp), lambda i: (0, 0)),
            pl.BlockSpec((hidp, nc), lambda i: (0, 0)),
            pl.BlockSpec((1, nc), lambda i: (0, 0)),
        ],
        out_specs=pl.BlockSpec((tn, nc), lambda i: (i, 0)),
        compiler_params=pltpu.CompilerParams(
            dimension_semantics=("parallel",)),
    )(p3, w3, b3, w1, b1, w2, b2)


# ---------------------------------------------------------------------------
# Parameters (PyTorch-style init) and inference-time preparation
# ---------------------------------------------------------------------------
def _module_feature_side(image_size):
    """Pooled conv3 spatial side, exactly as the nn.Module computes it."""
    fs = (image_size - 5 + 1) // 2
    fs = (fs - 3 + 1) // 2
    fs = (fs + 1 - 3 + 1) // 2
    return fs


def _actual_feature_side(image_size):
    """Pooled conv3 spatial side of the real pipeline (conv3 pad=1)."""
    s = (image_size - 5 + 1) // 2
    s = (s - 3 + 1) // 2
    s = (s + 2 - 3 + 1) // 2
    return s


def init_params(key, num_classes, image_size):
    """Deterministic PyTorch-default-style init (uniform +/- 1/sqrt(fan_in))."""
    keys = jax.random.split(key, 10)

    def uconv(kw, kb, cout, cin, ksz):
        bound = 1.0 / math.sqrt(cin * ksz * ksz)
        w = jax.random.uniform(kw, (cout, cin, ksz, ksz), jnp.float32, -bound, bound)
        b = jax.random.uniform(kb, (cout,), jnp.float32, -bound, bound)
        return w, b

    def ulin(kw, kb, fin, fout):
        bound = 1.0 / math.sqrt(fin)
        w = jax.random.uniform(kw, (fout, fin), jnp.float32, -bound, bound)
        b = jax.random.uniform(kb, (fout,), jnp.float32, -bound, bound)
        return w, b

    def bn(c):
        return (jnp.ones((c,), jnp.float32), jnp.zeros((c,), jnp.float32),
                jnp.zeros((c,), jnp.float32), jnp.ones((c,), jnp.float32))

    fs = _module_feature_side(image_size) ** 2
    return {
        "conv1": uconv(keys[0], keys[1], 16, 3, 5), "bn1": bn(16),
        "conv2": uconv(keys[2], keys[3], 32, 16, 3), "bn2": bn(32),
        "conv3": uconv(keys[4], keys[5], 64, 32, 3), "bn3": bn(64),
        "fc1": ulin(keys[6], keys[7], 64 * fs, 250),
        "fc2": ulin(keys[8], keys[9], 250, num_classes),
    }


def prepare_inference_params(params, image_size):
    """Fold BN into conv weights, zero-pad contraction dims to multiples of
    128, split fc1 per pooled spatial position (flatten folded into weight),
    cast matmul operands to bf16.  Done once, outside the forward path."""
    prepared = {}
    for name, bn_name in (("conv1", "bn1"), ("conv2", "bn2"), ("conv3", "bn3")):
        w, b = params[name]                          # (Cout, Cin, kh, kw)
        gamma, beta, mean, var = params[bn_name]
        scale = gamma * jax.lax.rsqrt(var + BN_EPS)
        w_eff = w * scale[:, None, None, None]
        b_eff = (b - mean) * scale + beta
        cout = w.shape[0]
        K = w.shape[1] * w.shape[2] * w.shape[3]
        kp = _round_up(K, 128)
        # im2col column order (kh, kw, Cin) -> weight transposed (2, 3, 1, 0).
        w_mat = jnp.transpose(w_eff, (2, 3, 1, 0)).reshape(K, cout)
        w_mat = jnp.pad(w_mat, ((0, kp - K), (0, 0)))          # zero K-pad
        prepared[name] = (w_mat.astype(jnp.bfloat16),
                          b_eff.astype(jnp.float32).reshape(1, cout))

    side_actual = _actual_feature_side(image_size)
    side_module = _module_feature_side(image_size)
    assert side_actual == side_module, (
        "module feature_size formula diverges from the real conv3(pad=1) "
        f"pipeline at image_size={image_size} ({side_module} vs {side_actual})")
    side = side_actual
    n_pos = side * side

    w1, b1 = params["fc1"]                           # (250, 64*n_pos)
    hidden = w1.shape[0]
    assert w1.shape[1] == 64 * n_pos
    hidp = _round_up(hidden, 128)                    # 250 -> 256
    # PyTorch flatten order is (c, h, w); split per (h, w) pooled position and
    # pre-transpose each block to (Cin=64, hidden) so the kernel needs no
    # flatten/reshape and no runtime transposes.
    w1r = w1.reshape(hidden, 64, side, side)
    blocks = []
    for ph in range(side):
        for pw in range(side):
            blk = jnp.transpose(w1r[:, :, ph, pw], (1, 0))     # (64, hidden)
            blocks.append(jnp.pad(blk, ((0, 0), (0, hidp - hidden))))
    w1_stacked = jnp.stack(blocks, 0).astype(jnp.bfloat16)     # (n_pos,64,256)
    b1p = jnp.pad(b1, (0, hidp - hidden)).astype(jnp.float32).reshape(1, hidp)

    w2, b2 = params["fc2"]                           # (nc, 250)
    # zero rows for the padded hidden units (relu(0)=0 anyway -> identical).
    w2p = jnp.pad(jnp.transpose(w2), ((0, hidp - hidden), (0, 0)))
    prepared["fc"] = (w1_stacked, b1p,
                      w2p.astype(jnp.bfloat16),
                      b2.astype(jnp.float32).reshape(1, -1))
    return prepared


# ---------------------------------------------------------------------------
# Forward pass
# ---------------------------------------------------------------------------
def simple_convnet_forward(prepared, x_nchw):
    # NCHW -> NHWC once; cast to bf16 (MXU input dtype) once.
    x = jnp.transpose(x_nchw, (0, 2, 3, 1)).astype(jnp.bfloat16)
    x = conv_bn_relu_pool(x, *prepared["conv1"], k=5, pad=0)
    x = conv_bn_relu_pool(x, *prepared["conv2"], k=3, pad=0)
    return conv3_fc_head(x, prepared["conv3"], prepared["fc"], k=3, pad=1)


if __name__ == "__main__":
    num_classes, image_size, batch = 10, 28, 2
    key = jax.random.PRNGKey(0)
    pkey, xkey = jax.random.split(key)

    params = init_params(pkey, num_classes, image_size)
    prepared = prepare_inference_params(params, image_size)
    x = jax.random.normal(xkey, (batch, 3, image_size, image_size), jnp.float32)

    out = jax.jit(simple_convnet_forward)(prepared, x)
    out = jax.block_until_ready(out)
    assert out.shape == (batch, num_classes)
    assert bool(jnp.all(jnp.isfinite(out)))
    # log_softmax rows must be valid log-probabilities.
    assert bool(jnp.allclose(jnp.sum(jnp.exp(out), axis=-1), 1.0, atol=1e-3))
    print("KERNEL_OK")
</pallas_src>

<mosaic_0001>
module attributes {stable_mosaic.version = 11 : i64} {
  func.func @_conv_pool_kernel(%arg0: i32, %arg1: memref<144x128xbf16, #tpu.memory_space<vmem>>, %arg2: memref<144x128xbf16, #tpu.memory_space<vmem>>, %arg3: memref<144x128xbf16, #tpu.memory_space<vmem>>, %arg4: memref<144x128xbf16, #tpu.memory_space<vmem>>, %arg5: memref<128x16xbf16, #tpu.memory_space<vmem>>, %arg6: memref<1x16xf32, #tpu.memory_space<vmem>>, %arg7: memref<144x16xbf16, #tpu.memory_space<vmem>>) attributes {dimension_semantics = [#tpu.dimension_semantics<parallel>], iteration_bounds = array<i64: 2>, scalar_prefetch = 0 : i64, scratch_operands = 0 : i64, tpu.core_type = #tpu.core_type<tc>, window_params = [{transform_indices = @transform_0, window_bounds = array<i64: 144, 128>}, {transform_indices = @transform_1, window_bounds = array<i64: 144, 128>}, {transform_indices = @transform_2, window_bounds = array<i64: 144, 128>}, {transform_indices = @transform_3, window_bounds = array<i64: 144, 128>}, {pipeline_mode = #tpu.pipeline_mode<synchronous>, transform_indices = @transform_4, window_bounds = array<i64: 128, 16>}, {pipeline_mode = #tpu.pipeline_mode<synchronous>, transform_indices = @transform_5, window_bounds = array<i64: 1, 16>}, {transform_indices = @transform_6, window_bounds = array<i64: 144, 16>}]} {
    %c0 = arith.constant 0 : index
    %c0_0 = arith.constant 0 : index
    %0 = vector.load %arg5[%c0, %c0_0] : memref<128x16xbf16, #tpu.memory_space<vmem>>, vector<128x16xbf16>
    %c0_1 = arith.constant 0 : index
    %c0_2 = arith.constant 0 : index
    %1 = vector.load %arg1[%c0_1, %c0_2] : memref<144x128xbf16, #tpu.memory_space<vmem>>, vector<144x128xbf16>
    %cst = arith.constant dense<0.000000e+00> : vector<144x16xf32>
    %2 = tpu.matmul %1, %0, %cst {dimension_numbers = #tpu.dot_dimension_numbers<[1], [0], [0], [1], [0, 0, 1, 1], [], []>} : vector<144x128xbf16>, vector<128x16xbf16>, vector<144x16xf32> -> vector<144x16xf32>
    %c0_3 = arith.constant 0 : index
    %c0_4 = arith.constant 0 : index
    %3 = vector.load %arg2[%c0_3, %c0_4] : memref<144x128xbf16, #tpu.memory_space<vmem>>, vector<144x128xbf16>
    %cst_5 = arith.constant dense<0.000000e+00> : vector<144x16xf32>
    %4 = tpu.matmul %3, %0, %cst_5 {dimension_numbers = #tpu.dot_dimension_numbers<[1], [0], [0], [1], [0, 0, 1, 1], [], []>} : vector<144x128xbf16>, vector<128x16xbf16>, vector<144x16xf32> -> vector<144x16xf32>
    %5 = arith.maximumf %2, %4 : vector<144x16xf32>
    %c0_6 = arith.constant 0 : index
    %c0_7 = arith.constant 0 : index
    %6 = vector.load %arg3[%c0_6, %c0_7] : memref<144x128xbf16, #tpu.memory_space<vmem>>, vector<144x128xbf16>
    %cst_8 = arith.constant dense<0.000000e+00> : vector<144x16xf32>
    %7 = tpu.matmul %6, %0, %cst_8 {dimension_numbers = #tpu.dot_dimension_numbers<[1], [0], [0], [1], [0, 0, 1, 1], [], []>} : vector<144x128xbf16>, vector<128x16xbf16>, vector<144x16xf32> -> vector<144x16xf32>
    %c0_9 = arith.constant 0 : index
    %c0_10 = arith.constant 0 : index
    %8 = vector.load %arg4[%c0_9, %c0_10] : memref<144x128xbf16, #tpu.memory_space<vmem>>, vector<144x128xbf16>
    %cst_11 = arith.constant dense<0.000000e+00> : vector<144x16xf32>
    %9 = tpu.matmul %8, %0, %cst_11 {dimension_numbers = #tpu.dot_dimension_numbers<[1], [0], [0], [1], [0, 0, 1, 1], [], []>} : vector<144x128xbf16>, vector<128x16xbf16>, vector<144x16xf32> -> vector<144x16xf32>
    %10 = arith.maximumf %7, %9 : vector<144x16xf32>
    %11 = arith.maximumf %5, %10 : vector<144x16xf32>
    %c0_12 = arith.constant 0 : index
    %c0_13 = arith.constant 0 : index
    %12 = vector.load %arg6[%c0_12, %c0_13] : memref<1x16xf32, #tpu.memory_space<vmem>>, vector<1x16xf32>
    %13 = vector.broadcast %12 : vector<1x16xf32> to vector<144x16xf32>
    %14 = arith.addf %11, %13 : vector<144x16xf32>
    %cst_14 = arith.constant 0.000000e+00 : f32
    %15 = vector.broadcast %cst_14 : f32 to vector<144x16xf32>
    %16 = arith.maximumf %14, %15 : vector<144x16xf32>
    %17 = arith.truncf %16 : vector<144x16xf32> to vector<144x16xbf16>
    %c0_15 = arith.constant 0 : index
    %c0_16 = arith.constant 0 : index
    %18 = vector.load %arg7[%c0_15, %c0_16] : memref<144x16xbf16, #tpu.memory_space<vmem>>, vector<144x16xbf16>
    tpu.vector_store %arg7[%c0_15, %c0_16], %17 {strides = array<i32>} : memref<144x16xbf16, #tpu.memory_space<vmem>>, vector<144x16xbf16>,
    return
  }
  func.func @transform_0(%arg0: i32) -> (i32, i32) {
    %c0_i32 = arith.constant 0 : i32
    %c0_i32_0 = arith.constant 0 : i32
    return %arg0, %c0_i32 : i32, i32
  }
  func.func @transform_1(%arg0: i32) -> (i32, i32) {
    %c0_i32 = arith.constant 0 : i32
    %c0_i32_0 = arith.constant 0 : i32
    return %arg0, %c0_i32 : i32, i32
  }
  func.func @transform_2(%arg0: i32) -> (i32, i32) {
    %c0_i32 = arith.constant 0 : i32
    %c0_i32_0 = arith.constant 0 : i32
    return %arg0, %c0_i32 : i32, i32
  }
  func.func @transform_3(%arg0: i32) -> (i32, i32) {
    %c0_i32 = arith.constant 0 : i32
    %c0_i32_0 = arith.constant 0 : i32
    return %arg0, %c0_i32 : i32, i32
  }
  func.func @transform_4(%arg0: i32) -> (i32, i32) {
    %c0_i32 = arith.constant 0 : i32
    %c0_i32_0 = arith.constant 0 : i32
    %c0_i32_1 = arith.constant 0 : i32
    return %c0_i32, %c0_i32_0 : i32, i32
  }
  func.func @transform_5(%arg0: i32) -> (i32, i32) {
    %c0_i32 = arith.constant 0 : i32
    %c0_i32_0 = arith.constant 0 : i32
    %c0_i32_1 = arith.constant 0 : i32
    return %c0_i32, %c0_i32_0 : i32, i32
  }
  func.func @transform_6(%arg0: i32) -> (i32, i32) {
    %c0_i32 = arith.constant 0 : i32
    %c0_i32_0 = arith.constant 0 : i32
    return %arg0, %c0_i32 : i32, i32
  }
}

module attributes {stable_mosaic.version = 11 : i64} {
  func.func @_conv_pool_kernel(%arg0: i32, %arg1: memref<32x256xbf16, #tpu.memory_space<vmem>>, %arg2: memref<32x256xbf16, #tpu.memory_space<vmem>>, %arg3: memref<32x256xbf16, #tpu.memory_space<vmem>>, %arg4: memref<32x256xbf16, #tpu.memory_space<vmem>>, %arg5: memref<256x32xbf16, #tpu.memory_space<vmem>>, %arg6: memref<1x32xf32, #tpu.memory_space<vmem>>, %arg7: memref<32x32xbf16, #tpu.memory_space<vmem>>) attributes {dimension_semantics = [#tpu.dimension_semantics<parallel>], iteration_bounds = array<i64: 2>, scalar_prefetch = 0 : i64, scratch_operands = 0 : i64, tpu.core_type = #tpu.core_type<tc>, window_params = [{transform_indices = @transform_0, window_bounds = array<i64: 32, 256>}, {transform_indices = @transform_1, window_bounds = array<i64: 32, 256>}, {transform_indices = @transform_2, window_bounds = array<i64: 32, 256>}, {transform_indices = @transform_3, window_bounds = array<i64: 32, 256>}, {pipeline_mode = #tpu.pipeline_mode<synchronous>, transform_indices = @transform_4, window_bounds = array<i64: 256, 32>}, {pipeline_mode = #tpu.pipeline_mode<synchronous>, transform_indices = @transform_5, window_bounds = array<i64: 1, 32>}, {transform_indices = @transform_6, window_bounds = array<i64: 32, 32>}]} {
    %c0 = arith.constant 0 : index
    %c0_0 = arith.constant 0 : index
    %0 = vector.load %arg5[%c0, %c0_0] : memref<256x32xbf16, #tpu.memory_space<vmem>>, vector<256x32xbf16>
    %c0_1 = arith.constant 0 : index
    %c0_2 = arith.constant 0 : index
    %1 = vector.load %arg1[%c0_1, %c0_2] : memref<32x256xbf16, #tpu.memory_space<vmem>>, vector<32x256xbf16>
    %cst = arith.constant dense<0.000000e+00> : vector<32x32xf32>
    %2 = tpu.matmul %1, %0, %cst {dimension_numbers = #tpu.dot_dimension_numbers<[1], [0], [0], [1], [0, 0, 1, 1], [], []>} : vector<32x256xbf16>, vector<256x32xbf16>, vector<32x32xf32> -> vector<32x32xf32>
    %c0_3 = arith.constant 0 : index
    %c0_4 = arith.constant 0 : index
    %3 = vector.load %arg2[%c0_3, %c0_4] : memref<32x256xbf16, #tpu.memory_space<vmem>>, vector<32x256xbf16>
    %cst_5 = arith.constant dense<0.000000e+00> : vector<32x32xf32>
    %4 = tpu.matmul %3, %0, %cst_5 {dimension_numbers = #tpu.dot_dimension_numbers<[1], [0], [0], [1], [0, 0, 1, 1], [], []>} : vector<32x256xbf16>, vector<256x32xbf16>, vector<32x32xf32> -> vector<32x32xf32>
    %5 = arith.maximumf %2, %4 : vector<32x32xf32>
    %c0_6 = arith.constant 0 : index
    %c0_7 = arith.constant 0 : index
    %6 = vector.load %arg3[%c0_6, %c0_7] : memref<32x256xbf16, #tpu.memory_space<vmem>>, vector<32x256xbf16>
    %cst_8 = arith.constant dense<0.000000e+00> : vector<32x32xf32>
    %7 = tpu.matmul %6, %0, %cst_8 {dimension_numbers = #tpu.dot_dimension_numbers<[1], [0], [0], [1], [0, 0, 1, 1], [], []>} : vector<32x256xbf16>, vector<256x32xbf16>, vector<32x32xf32> -> vector<32x32xf32>
    %c0_9 = arith.constant 0 : index
    %c0_10 = arith.constant 0 : index
    %8 = vector.load %arg4[%c0_9, %c0_10] : memref<32x256xbf16, #tpu.memory_space<vmem>>, vector<32x256xbf16>
    %cst_11 = arith.constant dense<0.000000e+00> : vector<32x32xf32>
    %9 = tpu.matmul %8, %0, %cst_11 {dimension_numbers = #tpu.dot_dimension_numbers<[1], [0], [0], [1], [0, 0, 1, 1], [], []>} : vector<32x256xbf16>, vector<256x32xbf16>, vector<32x32xf32> -> vector<32x32xf32>
    %10 = arith.maximumf %7, %9 : vector<32x32xf32>
    %11 = arith.maximumf %5, %10 : vector<32x32xf32>
    %c0_12 = arith.constant 0 : index
    %c0_13 = arith.constant 0 : index
    %12 = vector.load %arg6[%c0_12, %c0_13] : memref<1x32xf32, #tpu.memory_space<vmem>>, vector<1x32xf32>
    %13 = vector.broadcast %12 : vector<1x32xf32> to vector<32x32xf32>
    %14 = arith.addf %11, %13 : vector<32x32xf32>
    %cst_14 = arith.constant 0.000000e+00 : f32
    %15 = vector.broadcast %cst_14 : f32 to vector<32x32xf32>
    %16 = arith.maximumf %14, %15 : vector<32x32xf32>
    %17 = arith.truncf %16 : vector<32x32xf32> to vector<32x32xbf16>
    %c0_15 = arith.constant 0 : index
    %c0_16 = arith.constant 0 : index
    %18 = vector.load %arg7[%c0_15, %c0_16] : memref<32x32xbf16, #tpu.memory_space<vmem>>, vector<32x32xbf16>
    tpu.vector_store %arg7[%c0_15, %c0_16], %17 {strides = array<i32>} : memref<32x32xbf16, #tpu.memory_space<vmem>>, vector<32x32xbf16>,
    return
  }
  func.func @transform_0(%arg0: i32) -> (i32, i32) {
    %c0_i32 = arith.constant 0 : i32
    %c0_i32_0 = arith.constant 0 : i32
    return %arg0, %c0_i32 : i32, i32
  }
  func.func @transform_1(%arg0: i32) -> (i32, i32) {
    %c0_i32 = arith.constant 0 : i32
    %c0_i32_0 = arith.constant 0 : i32
    return %arg0, %c0_i32 : i32, i32
  }
  func.func @transform_2(%arg0: i32) -> (i32, i32) {
    %c0_i32 = arith.constant 0 : i32
    %c0_i32_0 = arith.constant 0 : i32
    return %arg0, %c0_i32 : i32, i32
  }
  func.func @transform_3(%arg0: i32) -> (i32, i32) {
    %c0_i32 = arith.constant 0 : i32
    %c0_i32_0 = arith.constant 0 : i32
    return %arg0, %c0_i32 : i32, i32
  }
  func.func @transform_4(%arg0: i32) -> (i32, i32) {
    %c0_i32 = arith.constant 0 : i32
    %c0_i32_0 = arith.constant 0 : i32
    %c0_i32_1 = arith.constant 0 : i32
    return %c0_i32, %c0_i32_0 : i32, i32
  }
  func.func @transform_5(%arg0: i32) -> (i32, i32) {
    %c0_i32 = arith.constant 0 : i32
    %c0_i32_0 = arith.constant 0 : i32
    %c0_i32_1 = arith.constant 0 : i32
    return %c0_i32, %c0_i32_0 : i32, i32
  }
  func.func @transform_6(%arg0: i32) -> (i32, i32) {
    %c0_i32 = arith.constant 0 : i32
    %c0_i32_0 = arith.constant 0 : i32
    return %arg0, %c0_i32 : i32, i32
  }
}

module attributes {stable_mosaic.version = 11 : i64} {
  func.func @_conv3_fc_head_kernel(%arg0: i32, %arg1: memref<4x4x2x384xbf16, #tpu.memory_space<vmem>>, %arg2: memref<384x64xbf16, #tpu.memory_space<vmem>>, %arg3: memref<1x64xf32, #tpu.memory_space<vmem>>, %arg4: memref<4x64x256xbf16, #tpu.memory_space<vmem>>, %arg5: memref<1x256xf32, #tpu.memory_space<vmem>>, %arg6: memref<256x10xbf16, #tpu.memory_space<vmem>>, %arg7: memref<1x10xf32, #tpu.memory_space<vmem>>, %arg8: memref<2x10xf32, #tpu.memory_space<vmem>>) attributes {dimension_semantics = [#tpu.dimension_semantics<parallel>], iteration_bounds = array<i64: 1>, scalar_prefetch = 0 : i64, scratch_operands = 0 : i64, tpu.core_type = #tpu.core_type<tc>, window_params = [{transform_indices = @transform_0, window_bounds = array<i64: 4, 4, 2, 384>}, {pipeline_mode = #tpu.pipeline_mode<synchronous>, transform_indices = @transform_1, window_bounds = array<i64: 384, 64>}, {pipeline_mode = #tpu.pipeline_mode<synchronous>, transform_indices = @transform_2, window_bounds = array<i64: 1, 64>}, {pipeline_mode = #tpu.pipeline_mode<synchronous>, transform_indices = @transform_3, window_bounds = array<i64: 4, 64, 256>}, {pipeline_mode = #tpu.pipeline_mode<synchronous>, transform_indices = @transform_4, window_bounds = array<i64: 1, 256>}, {pipeline_mode = #tpu.pipeline_mode<synchronous>, transform_indices = @transform_5, window_bounds = array<i64: 256, 10>}, {pipeline_mode = #tpu.pipeline_mode<synchronous>, transform_indices = @transform_6, window_bounds = array<i64: 1, 10>}, {transform_indices = @transform_7, window_bounds = array<i64: 2, 10>}]} {
    %c0 = arith.constant 0 : index
    %c0_0 = arith.constant 0 : index
    %0 = vector.load %arg2[%c0, %c0_0] : memref<384x64xbf16, #tpu.memory_space<vmem>>, vector<384x64xbf16>
    %c0_1 = arith.constant 0 : index
    %c0_2 = arith.constant 0 : index
    %1 = vector.load %arg3[%c0_1, %c0_2] : memref<1x64xf32, #tpu.memory_space<vmem>>, vector<1x64xf32>
    %c0_3 = arith.constant 0 : index
    %c0_4 = arith.constant 0 : index
    %c0_5 = arith.constant 0 : index
    %c0_6 = arith.constant 0 : index
    %2 = vector.load %arg1[%c0_3, %c0_4, %c0_5, %c0_6] : memref<4x4x2x384xbf16, #tpu.memory_space<vmem>>, vector<1x1x2x384xbf16>
    %3 = vector.shape_cast %2 : vector<1x1x2x384xbf16> to vector<2x384xbf16>
    %cst = arith.constant dense<0.000000e+00> : vector<2x64xf32>
    %4 = tpu.matmul %3, %0, %cst {dimension_numbers = #tpu.dot_dimension_numbers<[1], [0], [0], [1], [0, 0, 1, 1], [], []>} : vector<2x384xbf16>, vector<384x64xbf16>, vector<2x64xf32> -> vector<2x64xf32>
    %c0_7 = arith.constant 0 : index
    %c1 = arith.constant 1 : index
    %c0_8 = arith.constant 0 : index
    %c0_9 = arith.constant 0 : index
    %5 = vector.load %arg1[%c0_7, %c1, %c0_8, %c0_9] : memref<4x4x2x384xbf16, #tpu.memory_space<vmem>>, vector<1x1x2x384xbf16>
    %6 = vector.shape_cast %5 : vector<1x1x2x384xbf16> to vector<2x384xbf16>
    %cst_10 = arith.constant dense<0.000000e+00> : vector<2x64xf32>
    %7 = tpu.matmul %6, %0, %cst_10 {dimension_numbers = #tpu.dot_dimension_numbers<[1], [0], [0], [1], [0, 0, 1, 1], [], []>} : vector<2x384xbf16>, vector<384x64xbf16>, vector<2x64xf32> -> vector<2x64xf32>
    %8 = arith.maximumf %4, %7 : vector<2x64xf32>
    %c0_11 = arith.constant 0 : index
    %c2 = arith.constant 2 : index
    %c0_12 = arith.constant 0 : index
    %c0_13 = arith.constant 0 : index
    %9 = vector.load %arg1[%c0_11, %c2, %c0_12, %c0_13] : memref<4x4x2x384xbf16, #tpu.memory_space<vmem>>, vector<1x1x2x384xbf16>
    %10 = vector.shape_cast %9 : vector<1x1x2x384xbf16> to vector<2x384xbf16>
    %cst_14 = arith.constant dense<0.000000e+00> : vector<2x64xf32>
    %11 = tpu.matmul %10, %0, %cst_14 {dimension_numbers = #tpu.dot_dimension_numbers<[1], [0], [0], [1], [0, 0, 1, 1], [], []>} : vector<2x384xbf16>, vector<384x64xbf16>, vector<2x64xf32> -> vector<2x64xf32>
    %12 = arith.maximumf %8, %11 : vector<2x64xf32>
    %c0_15 = arith.constant 0 : index
    %c3 = arith.constant 3 : index
    %c0_16 = arith.constant 0 : index
    %c0_17 = arith.constant 0 : index
    %13 = vector.load %arg1[%c0_15, %c3, %c0_16, %c0_17] : memref<4x4x2x384xbf16, #tpu.memory_space<vmem>>, vector<1x1x2x384xbf16>
    %14 = vector.shape_cast %13 : vector<1x1x2x384xbf16> to vector<2x384xbf16>
    %cst_18 = arith.constant dense<0.000000e+00> : vector<2x64xf32>
    %15 = tpu.matmul %14, %0, %cst_18 {dimension_numbers = #tpu.dot_dimension_numbers<[1], [0], [0], [1], [0, 0, 1, 1], [], []>} : vector<2x384xbf16>, vector<384x64xbf16>, vector<2x64xf32> -> vector<2x64xf32>
    %16 = arith.maximumf %12, %15 : vector<2x64xf32>
    %17 = vector.broadcast %1 : vector<1x64xf32> to vector<2x64xf32>
    %18 = arith.addf %16, %17 : vector<2x64xf32>
    %cst_19 = arith.constant 0.000000e+00 : f32
    %19 = vector.broadcast %cst_19 : f32 to vector<2x64xf32>
    %20 = arith.maximumf %18, %19 : vector<2x64xf32>
    %21 = arith.truncf %20 : vector<2x64xf32> to vector<2x64xbf16>
    %c0_20 = arith.constant 0 : index
    %c0_21 = arith.constant 0 : index
    %c0_22 = arith.constant 0 : index
    %22 = vector.load %arg4[%c0_20, %c0_21, %c0_22] : memref<4x64x256xbf16, #tpu.memory_space<vmem>>, vector<1x64x256xbf16>
    %23 = vector.shape_cast %22 : vector<1x64x256xbf16> to vector<64x256xbf16>
    %cst_23 = arith.constant dense<0.000000e+00> : vector<2x256xf32>
    %24 = tpu.matmul %21, %23, %cst_23 {dimension_numbers = #tpu.dot_dimension_numbers<[1], [0], [0], [1], [0, 0, 1, 1], [], []>} : vector<2x64xbf16>, vector<64x256xbf16>, vector<2x256xf32> -> vector<2x256xf32>
    %c1_24 = arith.constant 1 : index
    %c0_25 = arith.constant 0 : index
    %c0_26 = arith.constant 0 : index
    %c0_27 = arith.constant 0 : index
    %25 = vector.load %arg1[%c1_24, %c0_25, %c0_26, %c0_27] : memref<4x4x2x384xbf16, #tpu.memory_space<vmem>>, vector<1x1x2x384xbf16>
    %26 = vector.shape_cast %25 : vector<1x1x2x384xbf16> to vector<2x384xbf16>
    %cst_28 = arith.constant dense<0.000000e+00> : vector<2x64xf32>
    %27 = tpu.matmul %26, %0, %cst_28 {dimension_numbers = #tpu.dot_dimension_numbers<[1], [0], [0], [1], [0, 0, 1, 1], [], []>} : vector<2x384xbf16>, vector<384x64xbf16>, vector<2x64xf32> -> vector<2x64xf32>
    %c1_29 = arith.constant 1 : index
    %c1_30 = arith.constant 1 : index
    %c0_31 = arith.constant 0 : index
    %c0_32 = arith.constant 0 : index
    %28 = vector.load %arg1[%c1_29, %c1_30, %c0_31, %c0_32] : memref<4x4x2x384xbf16, #tpu.memory_space<vmem>>, vector<1x1x2x384xbf16>
    %29 = vector.shape_cast %28 : vector<1x1x2x384xbf16> to vector<2x384xbf16>
    %cst_33 = arith.constant dense<0.000000e+00> : vector<2x64xf32>
    %30 = tpu.matmul %29, %0, %cst_33 {dimension_numbers = #tpu.dot_dimension_numbers<[1], [0], [0], [1], [0, 0, 1, 1], [], []>} : vector<2x384xbf16>, vector<384x64xbf16>, vector<2x64xf32> -> vector<2x64xf32>
    %31 = arith.maximumf %27, %30 : vector<2x64xf32>
    %c1_34 = arith.constant 1 : index
    %c2_35 = arith.constant 2 : index
    %c0_36 = arith.constant 0 : index
    %c0_37 = arith.constant 0 : index
    %32 = vector.load %arg1[%c1_34, %c2_35, %c0_36, %c0_37] : memref<4x4x2x384xbf16, #tpu.memory_space<vmem>>, vector<1x1x2x384xbf16>
    %33 = vector.shape_cast %32 : vector<1x1x2x384xbf16> to vector<2x384xbf16>
    %cst_38 = arith.constant dense<0.000000e+00> : vector<2x64xf32>
    %34 = tpu.matmul %33, %0, %cst_38 {dimension_numbers = #tpu.dot_dimension_numbers<[1], [0], [0], [1], [0, 0, 1, 1], [], []>} : vector<2x384xbf16>, vector<384x64xbf16>, vector<2x64xf32> -> vector<2x64xf32>
    %35 = arith.maximumf %31, %34 : vector<2x64xf32>
    %c1_39 = arith.constant 1 : index
    %c3_40 = arith.constant 3 : index
    %c0_41 = arith.constant 0 : index
    %c0_42 = arith.constant 0 : index
    %36 = vector.load %arg1[%c1_39, %c3_40, %c0_41, %c0_42] : memref<4x4x2x384xbf16, #tpu.memory_space<vmem>>, vector<1x1x2x384xbf16>
    %37 = vector.shape_cast %36 : vector<1x1x2x384xbf16> to vector<2x384xbf16>
    %cst_43 = arith.constant dense<0.000000e+00> : vector<2x64xf32>
    %38 = tpu.matmul %37, %0, %cst_43 {dimension_numbers = #tpu.dot_dimension_numbers<[1], [0], [0], [1], [0, 0, 1, 1], [], []>} : vector<2x384xbf16>, vector<384x64xbf16>, vector<2x64xf32> -> vector<2x64xf32>
    %39 = arith.maximumf %35, %38 : vector<2x64xf32>
    %40 = vector.broadcast %1 : vector<1x64xf32> to vector<2x64xf32>
    %41 = arith.addf %39, %40 : vector<2x64xf32>
    %cst_44 = arith.constant 0.000000e+00 : f32
    %42 = vector.broadcast %cst_44 : f32 to vector<2x64xf32>
    %43 = arith.maximumf %41, %42 : vector<2x64xf32>
    %44 = arith.truncf %43 : vector<2x64xf32> to vector<2x64xbf16>
    %c1_45 = arith.constant 1 : index
    %c0_46 = arith.constant 0 : index
    %c0_47 = arith.constant 0 : index
    %45 = vector.load %arg4[%c1_45, %c0_46, %c0_47] : memref<4x64x256xbf16, #tpu.memory_space<vmem>>, vector<1x64x256xbf16>
    %46 = vector.shape_cast %45 : vector<1x64x256xbf16> to vector<64x256xbf16>
    %cst_48 = arith.constant dense<0.000000e+00> : vector<2x256xf32>
    %47 = tpu.matmul %44, %46, %cst_48 {dimension_numbers = #tpu.dot_dimension_numbers<[1], [0], [0], [1], [0, 0, 1, 1], [], []>} : vector<2x64xbf16>, vector<64x256xbf16>, vector<2x256xf32> -> vector<2x256xf32>
    %48 = arith.addf %24, %47 : vector<2x256xf32>
    %c2_49 = arith.constant 2 : index
    %c0_50 = arith.constant 0 : index
    %c0_51 = arith.constant 0 : index
    %c0_52 = arith.constant 0 : index
    %49 = vector.load %arg1[%c2_49, %c0_50, %c0_51, %c0_52] : memref<4x4x2x384xbf16, #tpu.memory_space<vmem>>, vector<1x1x2x384xbf16>
    %50 = vector.shape_cast %49 : vector<1x1x2x384xbf16> to vector<2x384xbf16>
    %cst_53 = arith.constant dense<0.000000e+00> : vector<2x64xf32>
    %51 = tpu.matmul %50, %0, %cst_53 {dimension_numbers = #tpu.dot_dimension_numbers<[1], [0], [0], [1], [0, 0, 1, 1], [], []>} : vector<2x384xbf16>, vector<384x64xbf16>, vector<2x64xf32> -> vector<2x64xf32>
    %c2_54 = arith.constant 2 : index
    %c1_55 = arith.constant 1 : index
    %c0_56 = arith.constant 0 : index
    %c0_57 = arith.constant 0 : index
    %52 = vector.load %arg1[%c2_54, %c1_55, %c0_56, %c0_57] : memref<4x4x2x384xbf16, #tpu.memory_space<vmem>>, vector<1x1x2x384xbf16>
    %53 = vector.shape_cast %52 : vector<1x1x2x384xbf16> to vector<2x384xbf16>
    %cst_58 = arith.constant dense<0.000000e+00> : vector<2x64xf32>
    %54 = tpu.matmul %53, %0, %cst_58 {dimension_numbers = #tpu.dot_dimension_numbers<[1], [0], [0], [1], [0, 0, 1, 1], [], []>} : vector<2x384xbf16>, vector<384x64xbf16>, vector<2x64xf32> -> vector<2x64xf32>
    %55 = arith.maximumf %51, %54 : vector<2x64xf32>
    %c2_59 = arith.constant 2 : index
    %c2_60 = arith.constant 2 : index
    %c0_61 = arith.constant 0 : index
    %c0_62 = arith.constant 0 : index
    %56 = vector.load %arg1[%c2_59, %c2_60, %c0_61, %c0_62] : memref<4x4x2x384xbf16, #tpu.memory_space<vmem>>, vector<1x1x2x384xbf16>
    %57 = vector.shape_cast %56 : vector<1x1x2x384xbf16> to vector<2x384xbf16>
    %cst_63 = arith.constant dense<0.000000e+00> : vector<2x64xf32>
    %58 = tpu.matmul %57, %0, %cst_63 {dimension_numbers = #tpu.dot_dimension_numbers<[1], [0], [0], [1], [0, 0, 1, 1], [], []>} : vector<2x384xbf16>, vector<384x64xbf16>, vector<2x64xf32> -> vector<2x64xf32>
    %59 = arith.maximumf %55, %58 : vector<2x64xf32>
    %c2_64 = arith.constant 2 : index
    %c3_65 = arith.constant 3 : index
    %c0_66 = arith.constant 0 : index
    %c0_67 = arith.constant 0 : index
    %60 = vector.load %arg1[%c2_64, %c3_65, %c0_66, %c0_67] : memref<4x4x2x384xbf16, #tpu.memory_space<vmem>>, vector<1x1x2x384xbf16>
    %61 = vector.shape_cast %60 : vector<1x1x2x384xbf16> to vector<2x384xbf16>
    %cst_68 = arith.constant dense<0.000000e+00> : vector<2x64xf32>
    %62 = tpu.matmul %61, %0, %cst_68 {dimension_numbers = #tpu.dot_dimension_numbers<[1], [0], [0], [1], [0, 0, 1, 1], [], []>} : vector<2x384xbf16>, vector<384x64xbf16>, vector<2x64xf32> -> vector<2x64xf32>
    %63 = arith.maximumf %59, %62 : vector<2x64xf32>
    %64 = vector.broadcast %1 : vector<1x64xf32> to vector<2x64xf32>
    %65 = arith.addf %63, %64 : vector<2x64xf32>
    %cst_69 = arith.constant 0.000000e+00 : f32
    %66 = vector.broadcast %cst_69 : f32 to vector<2x64xf32>
    %67 = arith.maximumf %65, %66 : vector<2x64xf32>
    %68 = arith.truncf %67 : vector<2x64xf32> to vector<2x64xbf16>
    %c2_70 = arith.constant 2 : index
    %c0_71 = arith.constant 0 : index
    %c0_72 = arith.constant 0 : index
    %69 = vector.load %arg4[%c2_70, %c0_71, %c0_72] : memref<4x64x256xbf16, #tpu.memory_space<vmem>>, vector<1x64x256xbf16>
    %70 = vector.shape_cast %69 : vector<1x64x256xbf16> to vector<64x256xbf16>
    %cst_73 = arith.constant dense<0.000000e+00> : vector<2x256xf32>
    %71 = tpu.matmul %68, %70, %cst_73 {dimension_numbers = #tpu.dot_dimension_numbers<[1], [0], [0], [1], [0, 0, 1, 1], [], []>} : vector<2x64xbf16>, vector<64x256xbf16>, vector<2x256xf32> -> vector<2x256xf32>
    %72 = arith.addf %48, %71 : vector<2x256xf32>
    %c3_74 = arith.constant 3 : index
    %c0_75 = arith.constant 0 : index
    %c0_76 = arith.constant 0 : index
    %c0_77 = arith.constant 0 : index
    %73 = vector.load %arg1[%c3_74, %c0_75, %c0_76, %c0_77] : memref<4x4x2x384xbf16, #tpu.memory_space<vmem>>, vector<1x1x2x384xbf16>
    %74 = vector.shape_cast %73 : vector<1x1x2x384xbf16> to vector<2x384xbf16>
    %cst_78 = arith.constant dense<0.000000e+00> : vector<2x64xf32>
    %75 = tpu.matmul %74, %0, %cst_78 {dimension_numbers = #tpu.dot_dimension_numbers<[1], [0], [0], [1], [0, 0, 1, 1], [], []>} : vector<2x384xbf16>, vector<384x64xbf16>, vector<2x64xf32> -> vector<2x64xf32>
    %c3_79 = arith.constant 3 : index
    %c1_80 = arith.constant 1 : index
    %c0_81 = arith.constant 0 : index
    %c0_82 = arith.constant 0 : index
    %76 = vector.load %arg1[%c3_79, %c1_80, %c0_81, %c0_82] : memref<4x4x2x384xbf16, #tpu.memory_space<vmem>>, vector<1x1x2x384xbf16>
    %77 = vector.shape_cast %76 : vector<1x1x2x384xbf16> to vector<2x384xbf16>
    %cst_83 = arith.constant dense<0.000000e+00> : vector<2x64xf32>
    %78 = tpu.matmul %77, %0, %cst_83 {dimension_numbers = #tpu.dot_dimension_numbers<[1], [0], [0], [1], [0, 0, 1, 1], [], []>} : vector<2x384xbf16>, vector<384x64xbf16>, vector<2x64xf32> -> vector<2x64xf32>
    %79 = arith.maximumf %75, %78 : vector<2x64xf32>
    %c3_84 = arith.constant 3 : index
    %c2_85 = arith.constant 2 : index
    %c0_86 = arith.constant 0 : index
    %c0_87 = arith.constant 0 : index
    %80 = vector.load %arg1[%c3_84, %c2_85, %c0_86, %c0_87] : memref<4x4x2x384xbf16, #tpu.memory_space<vmem>>, vector<1x1x2x384xbf16>
    %81 = vector.shape_cast %80 : vector<1x1x2x384xbf16> to vector<2x384xbf16>
    %cst_88 = arith.constant dense<0.000000e+00> : vector<2x64xf32>
    %82 = tpu.matmul %81, %0, %cst_88 {dimension_numbers = #tpu.dot_dimension_numbers<[1], [0], [0], [1], [0, 0, 1, 1], [], []>} : vector<2x384xbf16>, vector<384x64xbf16>, vector<2x64xf32> -> vector<2x64xf32>
    %83 = arith.maximumf %79, %82 : vector<2x64xf32>
    %c3_89 = arith.constant 3 : index
    %c3_90 = arith.constant 3 : index
    %c0_91 = arith.constant 0 : index
    %c0_92 = arith.constant 0 : index
    %84 = vector.load %arg1[%c3_89, %c3_90, %c0_91, %c0_92] : memref<4x4x2x384xbf16, #tpu.memory_space<vmem>>, vector<1x1x2x384xbf16>
    %85 = vector.shape_cast %84 : vector<1x1x2x384xbf16> to vector<2x384xbf16>
    %cst_93 = arith.constant dense<0.000000e+00> : vector<2x64xf32>
    %86 = tpu.matmul %85, %0, %cst_93 {dimension_numbers = #tpu.dot_dimension_numbers<[1], [0], [0], [1], [0, 0, 1, 1], [], []>} : vector<2x384xbf16>, vector<384x64xbf16>, vector<2x64xf32> -> vector<2x64xf32>
    %87 = arith.maximumf %83, %86 : vector<2x64xf32>
    %88 = vector.broadcast %1 : vector<1x64xf32> to vector<2x64xf32>
    %89 = arith.addf %87, %88 : vector<2x64xf32>
    %cst_94 = arith.constant 0.000000e+00 : f32
    %90 = vector.broadcast %cst_94 : f32 to vector<2x64xf32>
    %91 = arith.maximumf %89, %90 : vector<2x64xf32>
    %92 = arith.truncf %91 : vector<2x64xf32> to vector<2x64xbf16>
    %c3_95 = arith.constant 3 : index
    %c0_96 = arith.constant 0 : index
    %c0_97 = arith.constant 0 : index
    %93 = vector.load %arg4[%c3_95, %c0_96, %c0_97] : memref<4x64x256xbf16, #tpu.memory_space<vmem>>, vector<1x64x256xbf16>
    %94 = vector.shape_cast %93 : vector<1x64x256xbf16> to vector<64x256xbf16>
    %cst_98 = arith.constant dense<0.000000e+00> : vector<2x256xf32>
    %95 = tpu.matmul %92, %94, %cst_98 {dimension_numbers = #tpu.dot_dimension_numbers<[1], [0], [0], [1], [0, 0, 1, 1], [], []>} : vector<2x64xbf16>, vector<64x256xbf16>, vector<2x256xf32> -> vector<2x256xf32>
    %96 = arith.addf %72, %95 : vector<2x256xf32>
    %c0_99 = arith.constant 0 : index
    %c0_100 = arith.constant 0 : index
    %97 = vector.load %arg5[%c0_99, %c0_100] : memref<1x256xf32, #tpu.memory_space<vmem>>, vector<1x256xf32>
    %98 = vector.broadcast %97 : vector<1x256xf32> to vector<2x256xf32>
    %99 = arith.addf %96, %98 : vector<2x256xf32>
    %cst_101 = arith.constant 0.000000e+00 : f32
    %100 = vector.broadcast %cst_101 : f32 to vector<2x256xf32>
    %101 = arith.maximumf %99, %100 : vector<2x256xf32>
    %102 = arith.truncf %101 : vector<2x256xf32> to vector<2x256xbf16>
    %c0_102 = arith.constant 0 : index
    %c0_103 = arith.constant 0 : index
    %103 = vector.load %arg6[%c0_102, %c0_103] : memref<256x10xbf16, #tpu.memory_space<vmem>>, vector<256x10xbf16>
    %cst_104 = arith.constant dense<0.000000e+00> : vector<2x10xf32>
    %104 = tpu.matmul %102, %103, %cst_104 {dimension_numbers = #tpu.dot_dimension_numbers<[1], [0], [0], [1], [0, 0, 1, 1], [], []>} : vector<2x256xbf16>, vector<256x10xbf16>, vector<2x10xf32> -> vector<2x10xf32>
    %c0_105 = arith.constant 0 : index
    %c0_106 = arith.constant 0 : index
    %105 = vector.load %arg7[%c0_105, %c0_106] : memref<1x10xf32, #tpu.memory_space<vmem>>, vector<1x10xf32>
    %106 = vector.broadcast %105 : vector<1x10xf32> to vector<2x10xf32>
    %107 = arith.addf %104, %106 : vector<2x10xf32>
    %cst_107 = arith.constant dense<0xFF800000> : vector<2xf32>
    %108 = vector.multi_reduction <maximumf>, %107, %cst_107 [1] : vector<2x10xf32> to vector<2xf32>
    %109 = vector.shape_cast %108 : vector<2xf32> to vector<2x1xf32>
    %110 = vector.broadcast %109 : vector<2x1xf32> to vector<2x10xf32>
    %111 = arith.subf %107, %110 : vector<2x10xf32>
    %112 = math.exp %111 : vector<2x10xf32>
    %cst_108 = arith.constant dense<0.000000e+00> : vector<2xf32>
    %113 = vector.multi_reduction <add>, %112, %cst_108 [1] : vector<2x10xf32> to vector<2xf32>
    %114 = vector.shape_cast %113 : vector<2xf32> to vector<2x1xf32>
    %115 = math.log %114 : vector<2x1xf32>
    %116 = vector.broadcast %115 : vector<2x1xf32> to vector<2x10xf32>
    %117 = arith.subf %111, %116 : vector<2x10xf32>
    %c0_109 = arith.constant 0 : index
    %c0_110 = arith.constant 0 : index
    %118 = vector.load %arg8[%c0_109, %c0_110] : memref<2x10xf32, #tpu.memory_space<vmem>>, vector<2x10xf32>
    tpu.vector_store %arg8[%c0_109, %c0_110], %117 {strides = array<i32>} : memref<2x10xf32, #tpu.memory_space<vmem>>, vector<2x10xf32>,
    return
  }
  func.func @transform_0(%arg0: i32) -> (i32, i32, i32, i32) {
    %c0_i32 = arith.constant 0 : i32
    %c0_i32_0 = arith.constant 0 : i32
    %c0_i32_1 = arith.constant 0 : i32
    %c0_i32_2 = arith.constant 0 : i32
    return %c0_i32, %c0_i32_0, %arg0, %c0_i32_1 : i32, i32, i32, i32
  }
  func.func @transform_1(%arg0: i32) -> (i32, i32) {
    %c0_i32 = arith.constant 0 : i32
    %c0_i32_0 = arith.constant 0 : i32
    %c0_i32_1 = arith.constant 0 : i32
    return %c0_i32, %c0_i32_0 : i32, i32
  }
  func.func @transform_2(%arg0: i32) -> (i32, i32) {
    %c0_i32 = arith.constant 0 : i32
    %c0_i32_0 = arith.constant 0 : i32
    %c0_i32_1 = arith.constant 0 : i32
    return %c0_i32, %c0_i32_0 : i32, i32
  }
  func.func @transform_3(%arg0: i32) -> (i32, i32, i32) {
    %c0_i32 = arith.constant 0 : i32
    %c0_i32_0 = arith.constant 0 : i32
    %c0_i32_1 = arith.constant 0 : i32
    %c0_i32_2 = arith.constant 0 : i32
    return %c0_i32, %c0_i32_0, %c0_i32_1 : i32, i32, i32
  }
  func.func @transform_4(%arg0: i32) -> (i32, i32) {
    %c0_i32 = arith.constant 0 : i32
    %c0_i32_0 = arith.constant 0 : i32
    %c0_i32_1 = arith.constant 0 : i32
    return %c0_i32, %c0_i32_0 : i32, i32
  }
  func.func @transform_5(%arg0: i32) -> (i32, i32) {
    %c0_i32 = arith.constant 0 : i32
    %c0_i32_0 = arith.constant 0 : i32
    %c0_i32_1 = arith.constant 0 : i32
    return %c0_i32, %c0_i32_0 : i32, i32
  }
  func.func @transform_6(%arg0: i32) -> (i32, i32) {
    %c0_i32 = arith.constant 0 : i32
    %c0_i32_0 = arith.constant 0 : i32
    %c0_i32_1 = arith.constant 0 : i32
    return %c0_i32, %c0_i32_0 : i32, i32
  }
  func.func @transform_7(%arg0: i32) -> (i32, i32) {
    %c0_i32 = arith.constant 0 : i32
    %c0_i32_0 = arith.constant 0 : i32
    return %arg0, %c0_i32 : i32, i32
  }
}

</mosaic_0001>

<bundles_post_ra>
// kernel: simple_convnet_forward.3
= control target key start
LH: loop header
LB: loop body
LE: loop exit
PB: predicated region body
PF: predicated region fallthrough
CT: control target
= control target key end

     0   :  { %s1396_s21 = smov 0   ;;  %s1558_s0 = inlined_call_operand.vmem [shape: bf16[288,128], index: 0, kind: input, shape index: {}]   ;;  %s1559_s1 = inlined_call_operand.vmem [shape: bf16[288,128], index: 1, kind: input, shape index: {}]   ;;  %s1560_s2 = inlined_call_operand.vmem [shape: bf16[288,128], index: 2, kind: input, shape index: {}]   ;;  %s1561_s3 = inlined_call_operand.vmem [shape: bf16[288,128], index: 3, kind: input, shape index: {}]   ;;  %s1562_s4 = inlined_call_operand.vmem [shape: bf16[128,16], index: 4, kind: input, shape index: {}]   ;;  %s1563_s5 = inlined_call_operand.vmem [shape: f32[1,16], index: 5, kind: input, shape index: {}]   ;;  %s1564_s6 = inlined_call_operand.vmem [shape: bf16[288,16], index: 6, kind: output, shape index: {}]  }
   0x1 LB: > { %s1112_s22 = sadd.s32 4294967295, %s1359_s21   ;;  %p1116_p0 = scmp.ge.s32.totalorder %s1359_s21, 1  ;;  %s1359_s21 = sphi %s1396_s21, %s16_s21  }
   0x2   : > { %p246_p1 = scmp.lt.s32.totalorder %s1359_s21, 3 }
   0x4   : > { %p247_p2 = pnand %p1116_p0, %p246_p1 }
   0x5   : > { %s291_s7 = smul.u32 (!%p247_p2), 18, %s1112_s22 }
   0x6   : > { %250 = sbr.rel (%p247_p2) target bundleno = 323 (0x143), region = 44 }
   0x7   : > { %p292_p3 = scmp.lt.s32.totalorder (!%p247_p2), %s291_s7, 35 }
   0xb   : > { %v1307_v0 = vld [vmem:[%s1562_s4 + $0x38] sm:$0xff]  ;;  %v1306_v1 = vld [vmem:[%s1562_s4 + $0x30] sm:$0xff]  ;;  %v1305_v2 = vld [vmem:[%s1562_s4 + $0x28] sm:$0xff]  ;;  %s1566_s7 = smov (!%p292_p3, %s291_s7), 35  ;;  %vm1001_vm0 = vcmask 125952  }
   0xc   : > { %457 = vmatpush.bf16.msra.mxu0 %v1307_v0  ;;  %583 = vmatpush.bf16.msra.mxu1 %v1307_v0  ;;  %v1304_v3 = vld [vmem:[%s1562_s4 + $0x20] sm:$0xff]  ;;  %v1303_v4 = vld [vmem:[%s1562_s4 + $0x18] sm:$0xff]  ;;  %v1302_v5 = vld [vmem:[%s1562_s4 + $0x10] sm:$0xff]  ;;  %s1425_s14 = sshll.u32 %s1566_s7, 2 }
   0xd   : > { %727 = vmatpush.bf16.msra.mxu2 %v1307_v0  ;;  %853 = vmatpush.bf16.msra.mxu3 %v1307_v0  ;;  %v1301_v6 = vld [vmem:[%s1562_s4 + $0x8] sm:$0xff]  ;;  %v1300_v7 = vld [vmem:[%s1562_s4] sm:$0xff]  ;;  %s1434_s19 = scalar_lea.vmem %s1558_s0, %s1425_s14  ;;  %s1440_s23 = scalar_lea.vmem %s1559_s1, %s1425_s14 }
   0xe   : > { %s1446_s26 = scalar_lea.vmem %s1560_s2, %s1425_s14  ;;  %s1452_s29 = scalar_lea.vmem %s1561_s3, %s1425_s14  ;;  %v1308_v8 = vld [vmem:[%s1434_s19] sm:$0xff]  ;;  %v1309_v12 = vld [vmem:[%s1434_s19 + $0x8] sm:$0xff]  ;;  %v1310_v16 = vld [vmem:[%s1434_s19 + $0x10] sm:$0xff] }
   0xf   : > { %v1317_v9 = vld [vmem:[%s1440_s23] sm:$0xff]  ;;  %v1318_v13 = vld [vmem:[%s1440_s23 + $0x8] sm:$0xff]  ;;  %v1319_v17 = vld [vmem:[%s1440_s23 + $0x10] sm:$0xff]  ;;  %s1500_s10 = scalar_lea.vmem %s1564_s6, %s1425_s14 }
  0x10   : > { %458 = vmatpush.bf16.msra.mxu0 %v1306_v1  ;;  %584 = vmatpush.bf16.msra.mxu1 %v1306_v1  ;;  %v1326_v10 = vld [vmem:[%s1446_s26] sm:$0xff]  ;;  %v1327_v14 = vld [vmem:[%s1446_s26 + $0x8] sm:$0xff]  ;;  %v1328_v18 = vld [vmem:[%s1446_s26 + $0x10] sm:$0xff] }
  0x11   : > { %728 = vmatpush.bf16.msra.mxu2 %v1306_v1  ;;  %854 = vmatpush.bf16.msra.mxu3 %v1306_v1  ;;  %v1335_v11 = vld [vmem:[%s1452_s29] sm:$0xff]  ;;  %v1336_v15 = vld [vmem:[%s1452_s29 + $0x8] sm:$0xff]  ;;  %v1337_v19 = vld [vmem:[%s1452_s29 + $0x10] sm:$0xff] }
  0x12   : > { %v1311_v20 = vld [vmem:[%s1434_s19 + $0x18] sm:$0xff]  ;;  %v1312_v24 = vld [vmem:[%s1434_s19 + $0x20] sm:$0xff]  ;;  %v1313_v28 = vld [vmem:[%s1434_s19 + $0x28] sm:$0xff] }
  0x13   : > { %v1320_v21 = vld [vmem:[%s1440_s23 + $0x18] sm:$0xff]  ;;  %v1321_v25 = vld [vmem:[%s1440_s23 + $0x20] sm:$0xff]  ;;  %v1322_v29 = vld [vmem:[%s1440_s23 + $0x28] sm:$0xff] }
  0x14   : > { %459 = vmatpush.bf16.msra.mxu0 %v1305_v2  ;;  %585 = vmatpush.bf16.msra.mxu1 %v1305_v2  ;;  %v1329_v22 = vld [vmem:[%s1446_s26 + $0x18] sm:$0xff]  ;;  %v1330_v26 = vld [vmem:[%s1446_s26 + $0x20] sm:$0xff]  ;;  %v1331_v30 = vld [vmem:[%s1446_s26 + $0x28] sm:$0xff] }
  0x15   : > { %729 = vmatpush.bf16.msra.mxu2 %v1305_v2  ;;  %855 = vmatpush.bf16.msra.mxu3 %v1305_v2  ;;  %v1338_v23 = vld [vmem:[%s1452_s29 + $0x18] sm:$0xff]  ;;  %v1339_v27 = vld [vmem:[%s1452_s29 + $0x20] sm:$0xff]  ;;  %v1340_v31 = vld [vmem:[%s1452_s29 + $0x28] sm:$0xff] }
  0x16   : > { %v1314_v32 = vld [vmem:[%s1434_s19 + $0x30] sm:$0xff]  ;;  %v1315_v36 = vld [vmem:[%s1434_s19 + $0x38] sm:$0xff]  ;;  %v1316_v40 = vld [vmem:[%s1434_s19 + $0x40] sm:$0xff] }
  0x17   : > { %v1323_v33 = vld [vmem:[%s1440_s23 + $0x30] sm:$0xff]  ;;  %v1324_v37 = vld [vmem:[%s1440_s23 + $0x38] sm:$0xff]  ;;  %v1325_v41 = vld [vmem:[%s1440_s23 + $0x40] sm:$0xff] }
  0x18   : > { %460 = vmatpush.bf16.msra.mxu0 %v1304_v3  ;;  %586 = vmatpush.bf16.msra.mxu1 %v1304_v3  ;;  %v1332_v34 = vld [vmem:[%s1446_s26 + $0x30] sm:$0xff]  ;;  %v1333_v38 = vld [vmem:[%s1446_s26 + $0x38] sm:$0xff]  ;;  %v1334_v44 = vld [vmem:[%s1446_s26 + $0x40] sm:$0xff] }
  0x19   : > { %730 = vmatpush.bf16.msra.mxu2 %v1304_v3  ;;  %856 = vmatpush.bf16.msra.mxu3 %v1304_v3  ;;  %v1341_v35 = vld [vmem:[%s1452_s29 + $0x30] sm:$0xff]  ;;  %v1342_v39 = vld [vmem:[%s1452_s29 + $0x38] sm:$0xff]  ;;  %v1343_v45 = vld [vmem:[%s1452_s29 + $0x40] sm:$0xff] }
  0x1a   : > { %v1493_v50 = vld [vmem:[%s1563_s5] ss:$0 sm:$0xff] }
  0x1c   : > { %461 = vmatpush.bf16.msra.mxu0 %v1303_v4  ;;  %587 = vmatpush.bf16.msra.mxu1 %v1303_v4 }
  0x1d   : > { %731 = vmatpush.bf16.msra.mxu2 %v1303_v4  ;;  %857 = vmatpush.bf16.msra.mxu3 %v1303_v4 }
  0x20   : > { %462 = vmatpush.bf16.msra.mxu0 %v1302_v5  ;;  %588 = vmatpush.bf16.msra.mxu1 %v1302_v5 }
  0x21   : > { %732 = vmatpush.bf16.msra.mxu2 %v1302_v5  ;;  %858 = vmatpush.bf16.msra.mxu3 %v1302_v5 }
  0x24   : > { %463 = vmatpush.bf16.msra.mxu0 %v1301_v6  ;;  %589 = vmatpush.bf16.msra.mxu1 %v1301_v6 }
  0x25   : > { %733 = vmatpush.bf16.msra.mxu2 %v1301_v6  ;;  %859 = vmatpush.bf16.msra.mxu3 %v1301_v6 }
  0x28   : > { %464 = vmatpush.bf16.msra.mxu0 %v1300_v7  ;;  %590 = vmatpush.bf16.msra.mxu1 %v1300_v7 }
  0x29   : > { %734 = vmatpush.bf16.msra.mxu2 %v1300_v7  ;;  %860 = vmatpush.bf16.msra.mxu3 %v1300_v7 }
  0x2b   : > { %465 = vmatmul.bf16.vlgmr.msra.gmra.mxu0 %v1308_v8  ;;  %591 = vmatmul.bf16.vlgmr.msra.gmra.mxu1 %v1317_v9 }
  0x2c   : > { %735 = vmatmul.bf16.vlgmr.msra.gmra.mxu2 %v1326_v10  ;;  %861 = vmatmul.bf16.vlgmr.msra.gmra.mxu3 %v1335_v11 }
  0x3b   : > { %470 = vmatmul.bf16.gmra.mxu0 %v1309_v12  ;;  %596 = vmatmul.bf16.gmra.mxu1 %v1318_v13 }
  0x3c   : > { %740 = vmatmul.bf16.gmra.mxu2 %v1327_v14  ;;  %866 = vmatmul.bf16.gmra.mxu3 %v1336_v15 }
  0x4b   : > { %475 = vmatmul.bf16.gmra.mxu0 %v1310_v16  ;;  %601 = vmatmul.bf16.gmra.mxu1 %v1319_v17 }
  0x4c   : > { %745 = vmatmul.bf16.gmra.mxu2 %v1328_v18  ;;  %871 = vmatmul.bf16.gmra.mxu3 %v1337_v19 }
  0x5b   : > { %480 = vmatmul.bf16.gmra.mxu0 %v1311_v20  ;;  %606 = vmatmul.bf16.gmra.mxu1 %v1320_v21 }
  0x5c   : > { %750 = vmatmul.bf16.gmra.mxu2 %v1329_v22  ;;  %876 = vmatmul.bf16.gmra.mxu3 %v1338_v23 }
  0x6b   : > { %485 = vmatmul.bf16.gmra.mxu0 %v1312_v24  ;;  %611 = vmatmul.bf16.gmra.mxu1 %v1321_v25 }
  0x6c   : > { %755 = vmatmul.bf16.gmra.mxu2 %v1330_v26  ;;  %881 = vmatmul.bf16.gmra.mxu3 %v1339_v27 }
  0x7b   : > { %490 = vmatmul.bf16.gmra.mxu0 %v1313_v28  ;;  %616 = vmatmul.bf16.gmra.mxu1 %v1322_v29 }
  0x7c   : > { %760 = vmatmul.bf16.gmra.mxu2 %v1331_v30  ;;  %886 = vmatmul.bf16.gmra.mxu3 %v1340_v31 }
  0x8b   : > { %495 = vmatmul.bf16.gmra.mxu0 %v1314_v32  ;;  %621 = vmatmul.bf16.gmra.mxu1 %v1323_v33 }
  0x8c   : > { %765 = vmatmul.bf16.gmra.mxu2 %v1332_v34  ;;  %891 = vmatmul.bf16.gmra.mxu3 %v1341_v35 }
  0x9b   : > { %500 = vmatmul.bf16.gmra.mxu0 %v1315_v36  ;;  %626 = vmatmul.bf16.gmra.mxu1 %v1324_v37 }
  0x9c   : > { %770 = vmatmul.bf16.gmra.mxu2 %v1333_v38  ;;  %896 = vmatmul.bf16.gmra.mxu3 %v1342_v39 }
  0xa8   : > { %v466_v42 = vpop.f32.mrf.mxu0  ;;  %v592_v43 = vpop.f32.mrf.mxu1 }
  0xa9   : > { %v637_v46 = vmax.f32 %v466_v42, %v592_v43 }
  0xab   : > { %505 = vmatmul.bf16.gmra.mxu0 %v1316_v40  ;;  %631 = vmatmul.bf16.gmra.mxu1 %v1325_v41 }
  0xac   : > { %775 = vmatmul.bf16.gmra.mxu2 %v1334_v44  ;;  %901 = vmatmul.bf16.gmra.mxu3 %v1343_v45 }
  0xaf   : > { %v736_v47 = vpop.f32.mrf.mxu2  ;;  %v862_v48 = vpop.f32.mrf.mxu3 }
  0xb0   : > { %v907_v49 = vmax.f32 %v736_v47, %v862_v48  ;;  %v468_v51 = vpop.f32.mrf.mxu0  ;;  %v594_v52 = vpop.f32.mrf.mxu1 }
  0xb1   : > { %v638_v59 = vmax.f32 %v468_v51, %v594_v52 }
  0xb2   : > { %v925_v53 = vmax.f32 %v637_v46, %v907_v49 }
  0xb4   : > { %v947_v54 = vadd.f32 %v1493_v50, %v925_v53 }
  0xb6   : > { %v965_v55 = vmax.f32 %v947_v54, 0.0 }
  0xb7   : > { %v738_v56 = vpop.f32.mrf.mxu2  ;;  %v864_v57 = vpop.f32.mrf.mxu3 }
  0xb8   : > { %v983_v58 = vpack.c.bf16 %v965_v55, %v965_v55  ;;  %v908_v60 = vmax.f32 %v738_v56, %v864_v57  ;;  %v471_v61 = vpop.f32.mrf.mxu0  ;;  %v597_v62 = vpop.f32.mrf.mxu1 }
  0xb9   : > { %v639_v2 = vmax.f32 %v471_v61, %v597_v62 }
  0xba   : > { %1002 = vst.msk [vmem:[%s1500_s10] sm:$0xf] %vm1001_vm0, %v983_v58  ;;  %v926_v63 = vmax.f32 %v638_v59, %v908_v60 }
  0xbc   : > { %v948_v0 = vadd.f32 %v1493_v50, %v926_v63 }
  0xbe   : > { %v966_v1 = vmax.f32 %v948_v0, 0.0 }
  0xbf   : > { %v741_v3 = vpop.f32.mrf.mxu2  ;;  %v867_v4 = vpop.f32.mrf.mxu3 }
  0xc0   : > { %v984_v5 = vpack.c.bf16 %v966_v1, %v966_v1  ;;  %v909_v6 = vmax.f32 %v741_v3, %v867_v4  ;;  %v473_v7 = vpop.f32.mrf.mxu0  ;;  %v599_v8 = vpop.f32.mrf.mxu1 }
  0xc1   : > { %v640_v15 = vmax.f32 %v473_v7, %v599_v8 }
  0xc2   : > { %1003 = vst.msk [vmem:[%s1500_s10 + $0x4] sm:$0xf] %vm1001_vm0, %v984_v5  ;;  %v927_v9 = vmax.f32 %v639_v2, %v909_v6 }
  0xc4   : > { %v949_v10 = vadd.f32 %v1493_v50, %v927_v9 }
  0xc6   : > { %v967_v11 = vmax.f32 %v949_v10, 0.0 }
  0xc7   : > { %v743_v12 = vpop.f32.mrf.mxu2  ;;  %v869_v13 = vpop.f32.mrf.mxu3 }
  0xc8   : > { %v985_v14 = vpack.c.bf16 %v967_v11, %v967_v11  ;;  %v910_v16 = vmax.f32 %v743_v12, %v869_v13  ;;  %v476_v17 = vpop.f32.mrf.mxu0  ;;  %v602_v18 = vpop.f32.mrf.mxu1 }
  0xc9   : > { %v641_v22 = vmax.f32 %v476_v17, %v602_v18 }
  0xca   : > { %1004 = vst.msk [vmem:[%s1500_s10 + $0x8] sm:$0xf] %vm1001_vm0, %v985_v14  ;;  %v928_v19 = vmax.f32 %v640_v15, %v910_v16 }
  0xcc   : > { %v950_v20 = vadd.f32 %v1493_v50, %v928_v19 }
  0xce   : > { %v968_v21 = vmax.f32 %v950_v20, 0.0 }
  0xcf   : > { %v746_v23 = vpop.f32.mrf.mxu2  ;;  %v872_v24 = vpop.f32.mrf.mxu3 }
  0xd0   : > { %v986_v25 = vpack.c.bf16 %v968_v21, %v968_v21  ;;  %v911_v26 = vmax.f32 %v746_v23, %v872_v24  ;;  %v478_v27 = vpop.f32.mrf.mxu0  ;;  %v604_v28 = vpop.f32.mrf.mxu1 }
  0xd1   : > { %v642_v35 = vmax.f32 %v478_v27, %v604_v28 }
  0xd2   : > { %1005 = vst.msk [vmem:[%s1500_s10 + $0xc] sm:$0xf] %vm1001_vm0, %v986_v25  ;;  %v929_v29 = vmax.f32 %v641_v22, %v911_v26 }
  0xd4   : > { %v951_v30 = vadd.f32 %v1493_v50, %v929_v29 }
  0xd6   : > { %v969_v31 = vmax.f32 %v951_v30, 0.0 }
  0xd7   : > { %v748_v32 = vpop.f32.mrf.mxu2  ;;  %v874_v33 = vpop.f32.mrf.mxu3 }
  0xd8   : > { %v987_v34 = vpack.c.bf16 %v969_v31, %v969_v31  ;;  %v912_v36 = vmax.f32 %v748_v32, %v874_v33  ;;  %v481_v37 = vpop.f32.mrf.mxu0  ;;  %v607_v38 = vpop.f32.mrf.mxu1 }
  0xd9   : > { %v643_v42 = vmax.f32 %v481_v37, %v607_v38 }
  0xda   : > { %1006 = vst.msk [vmem:[%s1500_s10 + $0x10] sm:$0xf] %vm1001_vm0, %v987_v34  ;;  %v930_v39 = vmax.f32 %v642_v35, %v912_v36 }
  0xdc   : > { %v952_v40 = vadd.f32 %v1493_v50, %v930_v39 }
  0xde   : > { %v970_v41 = vmax.f32 %v952_v40, 0.0 }
  0xdf   : > { %v751_v43 = vpop.f32.mrf.mxu2  ;;  %v877_v44 = vpop.f32.mrf.mxu3 }
  0xe0   : > { %v988_v45 = vpack.c.bf16 %v970_v41, %v970_v41  ;;  %v913_v46 = vmax.f32 %v751_v43, %v877_v44  ;;  %v483_v47 = vpop.f32.mrf.mxu0  ;;  %v609_v48 = vpop.f32.mrf.mxu1 }
  0xe1   : > { %v644_v56 = vmax.f32 %v483_v47, %v609_v48 }
  0xe2   : > { %1007 = vst.msk [vmem:[%s1500_s10 + $0x14] sm:$0xf] %vm1001_vm0, %v988_v45  ;;  %v931_v49 = vmax.f32 %v643_v42, %v913_v46 }
  0xe4   : > { %v953_v51 = vadd.f32 %v1493_v50, %v931_v49 }
  0xe6   : > { %v971_v52 = vmax.f32 %v953_v51, 0.0 }
  0xe7   : > { %v753_v53 = vpop.f32.mrf.mxu2  ;;  %v879_v54 = vpop.f32.mrf.mxu3 }
  0xe8   : > { %v989_v55 = vpack.c.bf16 %v971_v52, %v971_v52  ;;  %v914_v57 = vmax.f32 %v753_v53, %v879_v54  ;;  %v486_v58 = vpop.f32.mrf.mxu0  ;;  %v612_v59 = vpop.f32.mrf.mxu1 }
  0xe9   : > { %v645_v63 = vmax.f32 %v486_v58, %v612_v59 }
  0xea   : > { %1008 = vst.msk [vmem:[%s1500_s10 + $0x18] sm:$0xf] %vm1001_vm0, %v989_v55  ;;  %v932_v60 = vmax.f32 %v644_v56, %v914_v57 }
  0xec   : > { %v954_v61 = vadd.f32 %v1493_v50, %v932_v60 }
  0xee   : > { %v972_v62 = vmax.f32 %v954_v61, 0.0 }
  0xef   : > { %v756_v0 = vpop.f32.mrf.mxu2  ;;  %v882_v1 = vpop.f32.mrf.mxu3 }
  0xf0   : > { %v990_v2 = vpack.c.bf16 %v972_v62, %v972_v62  ;;  %v915_v3 = vmax.f32 %v756_v0, %v882_v1  ;;  %v488_v4 = vpop.f32.mrf.mxu0  ;;  %v614_v5 = vpop.f32.mrf.mxu1 }
  0xf1   : > { %v646_v12 = vmax.f32 %v488_v4, %v614_v5 }
  0xf2   : > { %1009 = vst.msk [vmem:[%s1500_s10 + $0x1c] sm:$0xf] %vm1001_vm0, %v990_v2  ;;  %v933_v6 = vmax.f32 %v645_v63, %v915_v3 }
  0xf4   : > { %v955_v7 = vadd.f32 %v1493_v50, %v933_v6 }
  0xf6   : > { %v973_v8 = vmax.f32 %v955_v7, 0.0 }
  0xf7   : > { %v758_v9 = vpop.f32.mrf.mxu2  ;;  %v884_v10 = vpop.f32.mrf.mxu3 }
  0xf8   : > { %v991_v11 = vpack.c.bf16 %v973_v8, %v973_v8  ;;  %v916_v13 = vmax.f32 %v758_v9, %v884_v10  ;;  %v491_v14 = vpop.f32.mrf.mxu0  ;;  %v617_v15 = vpop.f32.mrf.mxu1 }
  0xf9   : > { %v647_v19 = vmax.f32 %v491_v14, %v617_v15 }
  0xfa   : > { %1010 = vst.msk [vmem:[%s1500_s10 + $0x20] sm:$0xf] %vm1001_vm0, %v991_v11  ;;  %v934_v16 = vmax.f32 %v646_v12, %v916_v13 }
  0xfc   : > { %v956_v17 = vadd.f32 %v1493_v50, %v934_v16 }
  0xfe   : > { %v974_v18 = vmax.f32 %v956_v17, 0.0 }
  0xff   : > { %v761_v20 = vpop.f32.mrf.mxu2  ;;  %v887_v21 = vpop.f32.mrf.mxu3 }
 0x100   : > { %v992_v22 = vpack.c.bf16 %v974_v18, %v974_v18  ;;  %v917_v23 = vmax.f32 %v761_v20, %v887_v21  ;;  %v493_v24 = vpop.f32.mrf.mxu0  ;;  %v619_v25 = vpop.f32.mrf.mxu1 }
 0x101   : > { %v648_v32 = vmax.f32 %v493_v24, %v619_v25 }
 0x102   : > { %1011 = vst.msk [vmem:[%s1500_s10 + $0x24] sm:$0xf] %vm1001_vm0, %v992_v22  ;;  %v935_v26 = vmax.f32 %v647_v19, %v917_v23 }
 0x104   : > { %v957_v27 = vadd.f32 %v1493_v50, %v935_v26 }
 0x106   : > { %v975_v28 = vmax.f32 %v957_v27, 0.0 }
 0x107   : > { %v763_v29 = vpop.f32.mrf.mxu2  ;;  %v889_v30 = vpop.f32.mrf.mxu3 }
 0x108   : > { %v993_v31 = vpack.c.bf16 %v975_v28, %v975_v28  ;;  %v918_v33 = vmax.f32 %v763_v29, %v889_v30  ;;  %v496_v34 = vpop.f32.mrf.mxu0  ;;  %v622_v35 = vpop.f32.mrf.mxu1 }
 0x109   : > { %v649_v39 = vmax.f32 %v496_v34, %v622_v35 }
 0x10a   : > { %1012 = vst.msk [vmem:[%s1500_s10 + $0x28] sm:$0xf] %vm1001_vm0, %v993_v31  ;;  %v936_v36 = vmax.f32 %v648_v32, %v918_v33 }
 0x10c   : > { %v958_v37 = vadd.f32 %v1493_v50, %v936_v36 }
 0x10e   : > { %v976_v38 = vmax.f32 %v958_v37, 0.0 }
 0x10f   : > { %v766_v40 = vpop.f32.mrf.mxu2  ;;  %v892_v41 = vpop.f32.mrf.mxu3 }
 0x110   : > { %v994_v42 = vpack.c.bf16 %v976_v38, %v976_v38  ;;  %v919_v43 = vmax.f32 %v766_v40, %v892_v41  ;;  %v498_v44 = vpop.f32.mrf.mxu0  ;;  %v624_v45 = vpop.f32.mrf.mxu1 }
 0x111   : > { %v650_v53 = vmax.f32 %v498_v44, %v624_v45 }
 0x112   : > { %1013 = vst.msk [vmem:[%s1500_s10 + $0x2c] sm:$0xf] %vm1001_vm0, %v994_v42  ;;  %v937_v46 = vmax.f32 %v649_v39, %v919_v43 }
 0x114   : > { %v959_v47 = vadd.f32 %v1493_v50, %v937_v46 }
 0x116   : > { %v977_v48 = vmax.f32 %v959_v47, 0.0 }
 0x117   : > { %v768_v49 = vpop.f32.mrf.mxu2  ;;  %v894_v51 = vpop.f32.mrf.mxu3 }
 0x118   : > { %v995_v52 = vpack.c.bf16 %v977_v48, %v977_v48  ;;  %v920_v54 = vmax.f32 %v768_v49, %v894_v51  ;;  %v501_v55 = vpop.f32.mrf.mxu0  ;;  %v627_v56 = vpop.f32.mrf.mxu1 }
 0x119   : > { %v651_v60 = vmax.f32 %v501_v55, %v627_v56 }
 0x11a   : > { %1014 = vst.msk [vmem:[%s1500_s10 + $0x30] sm:$0xf] %vm1001_vm0, %v995_v52  ;;  %v938_v57 = vmax.f32 %v650_v53, %v920_v54 }
 0x11c   : > { %v960_v58 = vadd.f32 %v1493_v50, %v938_v57 }
 0x11e   : > { %v978_v59 = vmax.f32 %v960_v58, 0.0 }
 0x11f   : > { %v771_v61 = vpop.f32.mrf.mxu2  ;;  %v897_v62 = vpop.f32.mrf.mxu3 }
 0x120   : > { %v996_v63 = vpack.c.bf16 %v978_v59, %v978_v59  ;;  %v921_v0 = vmax.f32 %v771_v61, %v897_v62  ;;  %v503_v1 = vpop.f32.mrf.mxu0  ;;  %v629_v2 = vpop.f32.mrf.mxu1 }
 0x121   : > { %v652_v9 = vmax.f32 %v503_v1, %v629_v2 }
 0x122   : > { %1015 = vst.msk [vmem:[%s1500_s10 + $0x34] sm:$0xf] %vm1001_vm0, %v996_v63  ;;  %v939_v3 = vmax.f32 %v651_v60, %v921_v0 }
 0x124   : > { %v961_v4 = vadd.f32 %v1493_v50, %v939_v3 }
 0x126   : > { %v979_v5 = vmax.f32 %v961_v4, 0.0 }
 0x127   : > { %v773_v6 = vpop.f32.mrf.mxu2  ;;  %v899_v7 = vpop.f32.mrf.mxu3 }
 0x128   : > { %v997_v8 = vpack.c.bf16 %v979_v5, %v979_v5  ;;  %v922_v10 = vmax.f32 %v773_v6, %v899_v7  ;;  %v506_v12 = vpop.f32.mrf.mxu0  ;;  %v632_v13 = vpop.f32.mrf.mxu1 }
 0x129   : > { %v653_v16 = vmax.f32 %v506_v12, %v632_v13 }
 0x12a   : > { %1016 = vst.msk [vmem:[%s1500_s10 + $0x38] sm:$0xf] %vm1001_vm0, %v997_v8  ;;  %v940_v11 = vmax.f32 %v652_v9, %v922_v10 }
 0x12c   : > { %v962_v14 = vadd.f32 %v1493_v50, %v940_v11 }
 0x12e   : > { %v980_v15 = vmax.f32 %v962_v14, 0.0 }
 0x12f   : > { %v776_v17 = vpop.f32.mrf.mxu2  ;;  %v902_v18 = vpop.f32.mrf.mxu3 }
 0x130   : > { %v998_v19 = vpack.c.bf16 %v980_v15, %v980_v15  ;;  %v923_v20 = vmax.f32 %v776_v17, %v902_v18  ;;  %v508_v23 = vpop.f32.mrf.mxu0  ;;  %v634_v24 = vpop.f32.mrf.mxu1 }
 0x131   : > { %v654_v29 = vmax.f32 %v508_v23, %v634_v24 }
 0x132   : > { %1017 = vst.msk [vmem:[%s1500_s10 + $0x3c] sm:$0xf] %vm1001_vm0, %v998_v19  ;;  %v941_v21 = vmax.f32 %v653_v16, %v923_v20 }
 0x134   : > { %v963_v22 = vadd.f32 %v1493_v50, %v941_v21 }
 0x136   : > { %v981_v25 = vmax.f32 %v963_v22, 0.0 }
 0x137   : > { %v778_v26 = vpop.f32.mrf.mxu2  ;;  %v904_v27 = vpop.f32.mrf.mxu3 }
 0x138   : > { %v999_v28 = vpack.c.bf16 %v981_v25, %v981_v25  ;;  %v924_v30 = vmax.f32 %v778_v26, %v904_v27 }
 0x13a   : > { %1018 = vst.msk [vmem:[%s1500_s10 + $0x40] sm:$0xf] %vm1001_vm0, %v999_v28  ;;  %v942_v31 = vmax.f32 %v654_v29, %v924_v30 }
 0x13c   : > { %v964_v32 = vadd.f32 %v1493_v50, %v942_v31 }
 0x13e   : > { %v982_v33 = vmax.f32 %v964_v32, 0.0 }
 0x140   : > { %v1000_v34 = vpack.c.bf16 %v982_v33, %v982_v33 }
 0x142   : > { %1019 = vst.msk [vmem:[%s1500_s10 + $0x44] sm:$0xf] %vm1001_vm0, %v1000_v34 }
 0x143 PF: > { %s16_s21 = sadd.s32 1, %s1359_s21  }
 0x144   : > { %p13_p4 = scmp.ge.s32.totalorder %s16_s21, 4  }
 0x146   :  { %15 = sbr.rel (!%p13_p4) target bundleno = 1 (0x1), region = 83 }

// kernel: simple_convnet_forward.4
= control target key start
LH: loop header
LB: loop body
LE: loop exit
PB: predicated region body
PF: predicated region fallthrough
CT: control target
= control target key end

     0   :  { %s1517_s21 = smov 0   ;;  %s1519_s22 = smov 0   ;;  %s1803_s0 = inlined_call_operand.vmem [shape: bf16[50,256], index: 0, kind: input, shape index: {}]   ;;  %s1804_s1 = inlined_call_operand.vmem [shape: bf16[50,256], index: 1, kind: input, shape index: {}]   ;;  %s1805_s2 = inlined_call_operand.vmem [shape: bf16[50,256], index: 2, kind: input, shape index: {}]   ;;  %s1806_s3 = inlined_call_operand.vmem [shape: bf16[50,256], index: 3, kind: input, shape index: {}]   ;;  %s1807_s4 = inlined_call_operand.vmem [shape: bf16[256,32], index: 4, kind: input, shape index: {}]   ;;  %s1808_s5 = inlined_call_operand.vmem [shape: f32[1,32], index: 5, kind: input, shape index: {}]   ;;  %s1809_s6 = inlined_call_operand.vmem [shape: bf16[50,32], index: 6, kind: output, shape index: {}]  }
   0x1   :  { %s1521_s23 = smov 0  }
   0x2 LB: > { %s1530_s24 = sadd.s32 4294967295, %s1448_s23   ;;  %s1532_s25 = sadd.s32 1, %s1448_s23   ;;  %s1448_s23 = sphi %s1521_s23, %s1816_s23   ;;  %s1444_s22 = sphi %s1519_s22, %s1815_s22   ;;  %s1440_s21 = sphi %s1517_s21, %s1814_s21  }
   0x3   : > { %s166_s26 = ssub.s32 %s1448_s23, %s1532_s25  ;;  %s169_s27 = sadd.s32 1, %s1444_s22 }
   0x4   : > { %p167_p0 = scmp.eq.s32.totalorder %s166_s26, 0  ;;  %p179_p1 = scmp.ne.s32.totalorder %s1444_s22, %s1440_s21 }
   0x5   : > { %p180_p2 = scmp.eq.s32.totalorder %s1530_s24, 1  ;;  %p1107_p3 = scmp.ge.s32.totalorder %s1448_s23, 1 }
   0x6   : > { %s1540_s28 = scalar_select %p167_p0, %s1444_s22, %s169_s27  }
   0x7   : > { %p1542_p4 = por %p180_p2, %p179_p1  ;;  %p290_p5 = scmp.lt.s32.totalorder %s1448_s23, 3 }
   0x9   : > { %p291_p6 = pnand %p1107_p3, %p290_p5 }
   0xa   : > { %s1585_s18 = sshll.u32 (!%p291_p6), %s1530_s24, 2  ;;  %s355_s23 = sand.u32 (!%p291_p6), 1, %s1440_s21  }
   0xb   : > { %294 = sbr.rel (%p291_p6) target bundleno = 292 (0x124), region = 44  ;;  %p364_p7 = scmp.lt.s32.totalorder (!%p291_p6), %s1585_s18, 6 }
  0x10   : > { %v1549_v0 = vld [vmem:[%s1807_s4 + $0x38] sm:$0xff]  ;;  %v1561_v2 = vld [vmem:[%s1807_s4 + $0x30] sm:$0xff]  ;;  %v1575_v4 = vld [vmem:[%s1807_s4 + $0x28] sm:$0xff]  ;;  %s365_s9 = scalar_select %p364_p7, %s1585_s18, 6  ;;  %vm835_vm0 = vcmask 257024  }
  0x11   : > { %v1554_v1 = vld [vmem:[%s1807_s4 + $0x78] sm:$0xff]  ;;  %583 = vmatpush.bf16.msra.mxu0 %v1549_v0  ;;  %v1566_v3 = vld [vmem:[%s1807_s4 + $0x70] sm:$0xff]  ;;  %645 = vmatpush.bf16.msra.mxu2 %v1549_v0  ;;  %v1580_v5 = vld [vmem:[%s1807_s4 + $0x68] sm:$0xff]  ;;  %s848_s21 = ssub.s32 (%p1542_p4), 7, %s1585_s18  ;;  %s1302_s30 = sshll.u32 (%p1542_p4), %s1530_s24, 4 }
  0x12   : > { %602 = vmatpush.bf16.msra.mxu1 %v1554_v1  ;;  %664 = vmatpush.bf16.msra.mxu3 %v1554_v1  ;;  %v1592_v6 = vld [vmem:[%s1807_s4 + $0x20] sm:$0xff]  ;;  %v1607_v8 = vld [vmem:[%s1807_s4 + $0x18] sm:$0xff]  ;;  %v1622_v10 = vld [vmem:[%s1807_s4 + $0x10] sm:$0xff]  ;;  %s1631_s14 = sshll.u32 %s365_s9, 3  ;;  %p849_p8 = scmp.lt.s32.totalorder (%p1542_p4), %s848_s21, 4 }
  0x13   : > { %v1597_v7 = vld [vmem:[%s1807_s4 + $0x60] sm:$0xff]  ;;  %v1612_v9 = vld [vmem:[%s1807_s4 + $0x58] sm:$0xff]  ;;  %v1627_v11 = vld [vmem:[%s1807_s4 + $0x50] sm:$0xff]  ;;  %s1649_s26 = scalar_lea.vmem %s1803_s0, %s1631_s14  ;;  %s1657_s7 = scalar_lea.vmem %s1804_s1, %s1631_s14 }
  0x14   : > { %v1638_v12 = vld [vmem:[%s1807_s4 + $0x8] sm:$0xff]  ;;  %v1662_v14 = vld [vmem:[%s1807_s4] sm:$0xff]  ;;  %v1131_v28 = vld [vmem:[%s1649_s26 + $0x10] sm:$0xf]  ;;  %s402_s15 = scalar_lea.vmem %s1805_s2, %s1631_s14  ;;  %s419_s19 = scalar_lea.vmem %s1806_s3, %s1631_s14 }
  0x15   : > { %584 = vmatpush.bf16.msra.mxu0 %v1561_v2  ;;  %646 = vmatpush.bf16.msra.mxu2 %v1561_v2  ;;  %v1643_v13 = vld [vmem:[%s1807_s4 + $0x48] sm:$0xff]  ;;  %v1667_v15 = vld [vmem:[%s1807_s4 + $0x40] sm:$0xff]  ;;  %v1289_v29 = vld [vmem:[%s1649_s26 + $0x14] sm:$0xf0]  ;;  %s1754_s9 = scalar_lea.vmem (%p1542_p4), %s1809_s6, %s1302_s30  }
  0x16   : > { %603 = vmatpush.bf16.msra.mxu1 %v1566_v3  ;;  %665 = vmatpush.bf16.msra.mxu3 %v1566_v3  ;;  %v1123_v16 = vld [vmem:[%s1649_s26] sm:$0xf]  ;;  %v1287_v17 = vld [vmem:[%s1649_s26 + $0x4] sm:$0xf0]  ;;  %v1286_v18 = vld [vmem:[%s1649_s26 + $0x4] sm:$0xf]  ;;  %v1132_v36 = vor.u32 %v1289_v29, %v1131_v28 }
  0x17   : > { %v1125_v19 = vld [vmem:[%s1649_s26 + $0x8] sm:$0xf0]  ;;  %v1203_v20 = vld [vmem:[%s1657_s7] sm:$0xf]  ;;  %v1291_v21 = vld [vmem:[%s1657_s7 + $0x4] sm:$0xf0]  ;;  %v1124_v24 = vor.u32 %v1287_v17, %v1123_v16 }
  0x18   : > { %v1290_v22 = vld [vmem:[%s1657_s7 + $0x4] sm:$0xf]  ;;  %v1205_v23 = vld [vmem:[%s1657_s7 + $0x8] sm:$0xf0]  ;;  %v1128_v25 = vor.u32 %v1286_v18, %v1125_v19  ;;  %v1204_v26 = vor.u32 %v1291_v21, %v1203_v20  ;;  %v1288_v30 = vld [vmem:[%s1649_s26 + $0x14] sm:$0xf] }
  0x19   : > { %585 = vmatpush.bf16.msra.mxu0 %v1575_v4  ;;  %647 = vmatpush.bf16.msra.mxu2 %v1575_v4  ;;  %v1208_v27 = vor.u32 %v1290_v22, %v1205_v23  ;;  %v1133_v31 = vld [vmem:[%s1649_s26 + $0x18] sm:$0xf0]  ;;  %v1211_v32 = vld [vmem:[%s1657_s7 + $0x10] sm:$0xf]  ;;  %v1293_v33 = vld [vmem:[%s1657_s7 + $0x14] sm:$0xf0] }
  0x1a   : > { %604 = vmatpush.bf16.msra.mxu1 %v1580_v5  ;;  %666 = vmatpush.bf16.msra.mxu3 %v1580_v5  ;;  %v1292_v34 = vld [vmem:[%s1657_s7 + $0x14] sm:$0xf]  ;;  %v1213_v35 = vld [vmem:[%s1657_s7 + $0x18] sm:$0xf0]  ;;  %v1136_v37 = vor.u32 %v1288_v30, %v1133_v31  ;;  %v1212_v38 = vor.u32 %v1293_v33, %v1211_v32  ;;  %v1219_v40 = vld [vmem:[%s402_s15] sm:$0xf] }
  0x1b   : > { %v1216_v39 = vor.u32 %v1292_v34, %v1213_v35  ;;  %v1295_v41 = vld [vmem:[%s402_s15 + $0x4] sm:$0xf0]  ;;  %v1294_v42 = vld [vmem:[%s402_s15 + $0x4] sm:$0xf]  ;;  %v1221_v43 = vld [vmem:[%s402_s15 + $0x8] sm:$0xf0] }
  0x1c   : > { %v1235_v44 = vld [vmem:[%s419_s19] sm:$0xf]  ;;  %v1299_v45 = vld [vmem:[%s419_s19 + $0x4] sm:$0xf0]  ;;  %v1298_v46 = vld [vmem:[%s419_s19 + $0x4] sm:$0xf]  ;;  %v1220_v48 = vor.u32 %v1295_v41, %v1219_v40  ;;  %v1224_v49 = vor.u32 %v1294_v42, %v1221_v43 }
  0x1d   : > { %586 = vmatpush.bf16.msra.mxu0 %v1592_v6  ;;  %648 = vmatpush.bf16.msra.mxu2 %v1592_v6  ;;  %v1237_v47 = vld [vmem:[%s419_s19 + $0x8] sm:$0xf0]  ;;  %v1236_v50 = vor.u32 %v1299_v45, %v1235_v44  ;;  %v1227_v52 = vld [vmem:[%s402_s15 + $0x10] sm:$0xf]  ;;  %v1297_v53 = vld [vmem:[%s402_s15 + $0x14] sm:$0xf0] }
  0x1e   : > { %605 = vmatpush.bf16.msra.mxu1 %v1597_v7  ;;  %667 = vmatpush.bf16.msra.mxu3 %v1597_v7  ;;  %v1240_v51 = vor.u32 %v1298_v46, %v1237_v47  ;;  %v1296_v54 = vld [vmem:[%s402_s15 + $0x14] sm:$0xf]  ;;  %v1229_v55 = vld [vmem:[%s402_s15 + $0x18] sm:$0xf0]  ;;  %v1243_v56 = vld [vmem:[%s419_s19 + $0x10] sm:$0xf]  ;;  %v1228_v60 = vor.u32 %v1297_v53, %v1227_v52 }
  0x1f   : > { %v1301_v57 = vld [vmem:[%s419_s19 + $0x14] sm:$0xf0]  ;;  %v1300_v58 = vld [vmem:[%s419_s19 + $0x14] sm:$0xf]  ;;  %v1245_v59 = vld [vmem:[%s419_s19 + $0x18] sm:$0xf0]  ;;  %v1232_v61 = vor.u32 %v1296_v54, %v1229_v55 }
  0x20   : > { %v1244_v62 = vor.u32 %v1301_v57, %v1243_v56  ;;  %v1248_v63 = vor.u32 %v1300_v58, %v1245_v59  ;;  %v1393_v28 = vld [vmem:[%s1808_s5] ss:$0 sm:$0xff]  ;;  %s1108_s26 = sshll.u32 %s355_s23, 4 }
  0x21   : > { %587 = vmatpush.bf16.msra.mxu0 %v1607_v8  ;;  %649 = vmatpush.bf16.msra.mxu2 %v1607_v8  ;;  %s1737_s27 = scalar_lea.vmem [#allocation2], %s1108_s26  }
  0x22   : > { %606 = vmatpush.bf16.msra.mxu1 %v1612_v9  ;;  %668 = vmatpush.bf16.msra.mxu3 %v1612_v9 }
  0x25   : > { %588 = vmatpush.bf16.msra.mxu0 %v1622_v10  ;;  %650 = vmatpush.bf16.msra.mxu2 %v1622_v10 }
  0x26   : > { %607 = vmatpush.bf16.msra.mxu1 %v1627_v11  ;;  %669 = vmatpush.bf16.msra.mxu3 %v1627_v11 }
  0x29   : > { %589 = vmatpush.bf16.msra.mxu0 %v1638_v12  ;;  %651 = vmatpush.bf16.msra.mxu2 %v1638_v12 }
  0x2a   : > { %608 = vmatpush.bf16.msra.mxu1 %v1643_v13  ;;  %670 = vmatpush.bf16.msra.mxu3 %v1643_v13 }
  0x2d   : > { %590 = vmatpush.bf16.msra.mxu0 %v1662_v14  ;;  %652 = vmatpush.bf16.msra.mxu2 %v1662_v14 }
  0x2e   : > { %609 = vmatpush.bf16.msra.mxu1 %v1667_v15  ;;  %671 = vmatpush.bf16.msra.mxu3 %v1667_v15 }
  0x30   : > { %591 = vmatmul.bf16.vlgmr.msra.gmra.mxu0 %v1124_v24  ;;  %653 = vmatmul.bf16.vlgmr.msra.gmra.mxu2 %v1204_v26 }
  0x31   : > { %773 = vmatpush.bf16.msrb.mxu2 %v1549_v0  ;;  %610 = vmatmul.bf16.vlgmr.msra.gmra.mxu1 %v1128_v25 }
  0x32   : > { %792 = vmatpush.bf16.msrb.mxu3 %v1554_v1  ;;  %711 = vmatpush.bf16.msrb.mxu0 %v1549_v0 }
  0x33   : > { %672 = vmatmul.bf16.vlgmr.msra.gmra.mxu3 %v1208_v27  ;;  %730 = vmatpush.bf16.msrb.mxu1 %v1554_v1 }
  0x35   : > { %774 = vmatpush.bf16.msrb.mxu2 %v1561_v2 }
  0x36   : > { %793 = vmatpush.bf16.msrb.mxu3 %v1566_v3  ;;  %712 = vmatpush.bf16.msrb.mxu0 %v1561_v2 }
  0x37   : > { %731 = vmatpush.bf16.msrb.mxu1 %v1566_v3 }
  0x39   : > { %775 = vmatpush.bf16.msrb.mxu2 %v1575_v4 }
  0x3a   : > { %794 = vmatpush.bf16.msrb.mxu3 %v1580_v5  ;;  %713 = vmatpush.bf16.msrb.mxu0 %v1575_v4 }
  0x3b   : > { %732 = vmatpush.bf16.msrb.mxu1 %v1580_v5 }
  0x3d   : > { %776 = vmatpush.bf16.msrb.mxu2 %v1592_v6 }
  0x3e   : > { %795 = vmatpush.bf16.msrb.mxu3 %v1597_v7  ;;  %714 = vmatpush.bf16.msrb.mxu0 %v1592_v6 }
  0x3f   : > { %733 = vmatpush.bf16.msrb.mxu1 %v1597_v7 }
  0x40   : > { %596 = vmatmul.bf16.gmra.mxu0 %v1132_v36  ;;  %658 = vmatmul.bf16.gmra.mxu2 %v1212_v38 }
  0x41   : > { %777 = vmatpush.bf16.msrb.mxu2 %v1607_v8  ;;  %615 = vmatmul.bf16.gmra.mxu1 %v1136_v37 }
  0x42   : > { %796 = vmatpush.bf16.msrb.mxu3 %v1612_v9  ;;  %715 = vmatpush.bf16.msrb.mxu0 %v1607_v8 }
  0x43   : > { %677 = vmatmul.bf16.gmra.mxu3 %v1216_v39  ;;  %734 = vmatpush.bf16.msrb.mxu1 %v1612_v9 }
  0x45   : > { %778 = vmatpush.bf16.msrb.mxu2 %v1622_v10 }
  0x46   : > { %797 = vmatpush.bf16.msrb.mxu3 %v1627_v11  ;;  %716 = vmatpush.bf16.msrb.mxu0 %v1622_v10 }
  0x47   : > { %735 = vmatpush.bf16.msrb.mxu1 %v1627_v11 }
  0x49   : > { %779 = vmatpush.bf16.msrb.mxu2 %v1638_v12 }
  0x4a   : > { %798 = vmatpush.bf16.msrb.mxu3 %v1643_v13  ;;  %717 = vmatpush.bf16.msrb.mxu0 %v1638_v12 }
  0x4b   : > { %736 = vmatpush.bf16.msrb.mxu1 %v1643_v13 }
  0x4d   : > { %780 = vmatpush.bf16.msrb.mxu2 %v1662_v14 }
  0x4e   : > { %799 = vmatpush.bf16.msrb.mxu3 %v1667_v15  ;;  %718 = vmatpush.bf16.msrb.mxu0 %v1662_v14 }
  0x4f   : > { %737 = vmatpush.bf16.msrb.mxu1 %v1667_v15 }
  0x50   : > { %781 = vmatmul.bf16.vlgmr.msrb.gmra.mxu2 %v1236_v50 }
  0x51   : > { %719 = vmatmul.bf16.vlgmr.msrb.gmra.mxu0 %v1220_v48 }
  0x52   : > { %738 = vmatmul.bf16.vlgmr.msrb.gmra.mxu1 %v1224_v49 }
  0x53   : > { %800 = vmatmul.bf16.vlgmr.msrb.gmra.mxu3 %v1240_v51 }
  0x60   : > { %786 = vmatmul.bf16.gmra.mxu2 %v1244_v62 }
  0x61   : > { %724 = vmatmul.bf16.gmra.mxu0 %v1228_v60 }
  0x62   : > { %743 = vmatmul.bf16.gmra.mxu1 %v1232_v61 }
  0x63   : > { %805 = vmatmul.bf16.gmra.mxu3 %v1248_v63 }
  0xad   : > { %v592_v0 = vpop.f32.mrf.mxu0 }
  0xae   : > { %v611_v1 = vpop.f32.mrf.mxu1 }
  0xaf   : > { %v612_v18 = vadd.f32 %v611_v1, %v592_v0 }
  0xb3   : > { %v654_v2 = vpop.f32.mrf.mxu2 }
  0xb5   : > { %v594_v4 = vpop.f32.mrf.mxu0 }
  0xb6   : > { %v673_v3 = vpop.f32.mrf.mxu3  ;;  %v613_v5 = vpop.f32.mrf.mxu1 }
  0xb7   : > { %v674_v19 = vadd.f32 %v673_v3, %v654_v2  ;;  %v614_v34 = vadd.f32 %v613_v5, %v594_v4 }
  0xb9   : > { %v683_v26 = vmax.f32 %v612_v18, %v674_v19 }
  0xbb   : > { %v656_v6 = vpop.f32.mrf.mxu2 }
  0xbd   : > { %v597_v8 = vpop.f32.mrf.mxu0 }
  0xbe   : > { %v675_v7 = vpop.f32.mrf.mxu3  ;;  %v616_v9 = vpop.f32.mrf.mxu1 }
  0xbf   : > { %v676_v30 = vadd.f32 %v675_v7, %v656_v6  ;;  %v617_v44 = vadd.f32 %v616_v9, %v597_v8 }
  0xc1   : > { %v684_v38 = vmax.f32 %v614_v34, %v676_v30 }
  0xc3   : > { %v659_v10 = vpop.f32.mrf.mxu2 }
  0xc5   : > { %v599_v12 = vpop.f32.mrf.mxu0 }
  0xc6   : > { %v678_v11 = vpop.f32.mrf.mxu3  ;;  %v618_v13 = vpop.f32.mrf.mxu1 }
  0xc7   : > { %v679_v45 = vadd.f32 %v678_v11, %v659_v10  ;;  %v619_v62 = vadd.f32 %v618_v13, %v599_v12 }
  0xc9   : > { %v685_v52 = vmax.f32 %v617_v44, %v679_v45 }
  0xcb   : > { %v661_v14 = vpop.f32.mrf.mxu2 }
  0xce   : > { %v680_v15 = vpop.f32.mrf.mxu3  ;;  %v720_v16 = vpop.f32.mrf.mxu0 }
  0xcf   : > { %v739_v17 = vpop.f32.mrf.mxu1  ;;  %v681_v58 = vadd.f32 %v680_v15, %v661_v14 }
  0xd0   : > { %v740_v20 = vadd.f32 %v739_v17, %v720_v16 }
  0xd1   : > { %v686_v2 = vmax.f32 %v619_v62, %v681_v58 }
  0xd3   : > { %v782_v21 = vpop.f32.mrf.mxu2 }
  0xd6   : > { %v801_v22 = vpop.f32.mrf.mxu3  ;;  %v722_v24 = vpop.f32.mrf.mxu0 }
  0xd7   : > { %v802_v23 = vadd.f32 %v801_v22, %v782_v21  ;;  %v741_v25 = vpop.f32.mrf.mxu1 }
  0xd8   : > { %v742_v36 = vadd.f32 %v741_v25, %v722_v24 }
  0xd9   : > { %v811_v27 = vmax.f32 %v740_v20, %v802_v23 }
  0xdb   : > { %v815_v29 = vmax.f32 %v683_v26, %v811_v27  ;;  %v784_v32 = vpop.f32.mrf.mxu2 }
  0xdd   : > { %v823_v31 = vadd.f32 %v1393_v28, %v815_v29 }
  0xde   : > { %v803_v33 = vpop.f32.mrf.mxu3  ;;  %v725_v41 = vpop.f32.mrf.mxu0 }
  0xdf   : > { %v827_v35 = vmax.f32 %v823_v31, 0.0  ;;  %v804_v37 = vadd.f32 %v803_v33, %v784_v32  ;;  %v744_v42 = vpop.f32.mrf.mxu1 }
  0xe0   : > { %v745_v47 = vadd.f32 %v744_v42, %v725_v41 }
  0xe1   : > { %v831_v39 = vpack.c.bf16 %v827_v35, %v827_v35  ;;  %v812_v40 = vmax.f32 %v742_v36, %v804_v37 }
  0xe3   : > { %836 = vst.msk [vmem:[%s1737_s27] sm:$0xf] %vm835_vm0, %v831_v39  ;;  %v816_v43 = vmax.f32 %v684_v38, %v812_v40  ;;  %v787_v48 = vpop.f32.mrf.mxu2 }
  0xe5   : > { %v824_v46 = vadd.f32 %v1393_v28, %v816_v43 }
  0xe6   : > { %v806_v49 = vpop.f32.mrf.mxu3  ;;  %v727_v56 = vpop.f32.mrf.mxu0 }
  0xe7   : > { %v828_v50 = vmax.f32 %v824_v46, 0.0  ;;  %v807_v51 = vadd.f32 %v806_v49, %v787_v48  ;;  %v746_v57 = vpop.f32.mrf.mxu1 }
  0xe8   : > { %v747_v0 = vadd.f32 %v746_v57, %v727_v56 }
  0xe9   : > { %v832_v53 = vpack.c.bf16 %v828_v50, %v828_v50  ;;  %v813_v54 = vmax.f32 %v745_v47, %v807_v51 }
  0xeb   : > { %837 = vst.msk [vmem:[%s1737_s27 + $0x4] sm:$0xf] %vm835_vm0, %v832_v53  ;;  %v817_v55 = vmax.f32 %v685_v52, %v813_v54  ;;  %v789_v60 = vpop.f32.mrf.mxu2 }
  0xed   : > { %v825_v59 = vadd.f32 %v1393_v28, %v817_v55 }
  0xee   : > { %v808_v61 = vpop.f32.mrf.mxu3 }
  0xef   : > { %v829_v63 = vmax.f32 %v825_v59, 0.0  ;;  %v809_v1 = vadd.f32 %v808_v61, %v789_v60 }
  0xf1   : > { %v833_v3 = vpack.c.bf16 %v829_v63, %v829_v63  ;;  %v814_v4 = vmax.f32 %v747_v0, %v809_v1 }
  0xf3   : > { %838 = vst.msk [vmem:[%s1737_s27 + $0x8] sm:$0xf] %vm835_vm0, %v833_v3  ;;  %v818_v5 = vmax.f32 %v686_v2, %v814_v4 }
  0xf5   : > { %v826_v6 = vadd.f32 %v1393_v28, %v818_v5 }
  0xf7   : > { %v830_v7 = vmax.f32 %v826_v6, 0.0  ;;  %846 = sbr.rel (!%p1542_p4) target bundleno = 292 (0x124), region = 48 }
  0xf9   : > { %v834_v8 = vpack.c.bf16 %v830_v7, %v830_v7 }
  0xfb   : > { %839 = vst.msk [vmem:[%s1737_s27 + $0xc] sm:$0xf] %vm835_vm0, %v834_v8 }
  0xfc   : > { %s1818_s21 = smov (!%p849_p8, %s848_s21), 4 }
  0xfd   : > { %s1251_s10 = sshll.u32 %s1818_s21, 2 }
  0xfe   : > { %p1254_p9 = scmp.eq.s32.totalorder %s1251_s10, 0 }
  0xff   : > { %s1760_s11 = sshrl.u32 (!%p1254_p9), %s1818_s21, 2 }
 0x100   : > { %857 = sbr.rel (%p1254_p9) target bundleno = 292 (0x124), region = 52  ;;  %p1255_p10 = scmp.le.s32.totalorder (!%p1254_p9), %s1760_s11, 0 }
 0x105   : > { %1042 = sbr.rel (%p1255_p10) target bundleno = 275 (0x113), region = 133  ;;  %s1811_s24 = smov (!%p1255_p10), %s1754_s9 }
 0x106   : > { %s1812_s29 = smov (!%p1255_p10), %s1737_s27  ;;  %s1769_s18 = smov (!%p1255_p10), 0  }
 0x107   : > { %s1462_s12 = smov (!%p1255_p10), 0  }
 0x10a LB: >> { %v874_v9 = vld [vmem:[%s1456_s29] sm:$0xf]  ;;  %v876_v10 = vld [vmem:[%s1456_s29 + $0x4] sm:$0xf]  ;;  %v878_v11 = vld [vmem:[%s1456_s29 + $0x8] sm:$0xf]  ;;  %s1464_s12 = sphi %s1462_s12, %s868_s12   ;;  %s1460_s18 = sphi %s1769_s18, %s1813_s18   ;;  %s1456_s29 = sphi %s1812_s29, %s887_s29   ;;  %s1452_s24 = sphi %s1811_s24, %s888_s24  }
 0x10b   : >> { %875 = vst [vmem:[%s1452_s24] sm:$0xf] %v874_v9  ;;  %v880_v12 = vld [vmem:[%s1456_s29 + $0xc] sm:$0xf]  ;;  %s882_s13 = sadd.s32 1, %s1460_s18  ;;  %s868_s12 = sadd.s32 1, %s1464_s12  }
 0x10c   : >> { %877 = vst [vmem:[%s1452_s24 + $0x4] sm:$0xf] %v876_v10  ;;  %p883_p11 = scmp.ge.s32.totalorder %s882_s13, %s1760_s11  ;;  %p867_p12 = scmp.ge.s32.totalorder %s868_s12, %s1760_s11 }
 0x10d   : >> { %879 = vst [vmem:[%s1452_s24 + $0x8] sm:$0xf] %v878_v11 }
 0x10e   : >> { %881 = vst [vmem:[%s1452_s24 + $0xc] sm:$0xf] %v880_v12  ;;  %s1820_s13 = smov (%p883_p11, %s882_s13), 0  ;;  %870 = sbr.rel (!%p867_p12) target bundleno = 266 (0x10a), region = 139 }
 0x10f   : >> { %s1256_s15 = sshll.u32 %s1820_s13, 4  ;;  %s1813_s18 = smov %s1820_s13 }
 0x110   : >> { %s887_s29 = scalar_lea.vmem %s1737_s27, %s1256_s15 [#allocation2]   ;;  %s888_s24 = scalar_lea.vmem %s1754_s9, %s1256_s15  }
 0x113 PF: > { %s1785_s16 = sand.u32 3, %s1818_s21   ;;  %s1303_s17 = sshll.u32 %s1760_s11, 4 }
 0x114   : > { %s893_s19 = scalar_lea.vmem %s1737_s27, %s1303_s17 [#allocation2]   ;;  %s895_s14 = scalar_lea.vmem %s1754_s9, %s1303_s17  }
 0x115   : > { %p1261_p13 = scmp.le.s32.totalorder %s1785_s16, 0 }
 0x116   : > { %s1466_s20 = smov (!%p1261_p13), %s895_s14   ;;  %s1470_s23 = smov (!%p1261_p13), %s893_s19  }
 0x117   : > { %1056 = sbr.rel (%p1261_p13) target bundleno = 292 (0x124), region = 144  ;;  %s1474_s26 = smov (!%p1261_p13), 0  }
 0x118   : > { %s1478_s30 = smov (!%p1261_p13), 0  }
 0x11c LB: >> { %v905_v13 = vld [vmem:[%s1472_s23] sm:$0xf]  ;;  %s907_s21 = sadd.s32 1, %s1476_s26  ;;  %s899_s30 = sadd.s32 1, %s1480_s30   ;;  %s1480_s30 = sphi %s1478_s30, %s899_s30   ;;  %s1476_s26 = sphi %s1474_s26, %s1475_s26   ;;  %s1472_s23 = sphi %s1470_s23, %s912_s23   ;;  %s1468_s20 = sphi %s1466_s20, %s913_s20  }
 0x11d   : >> { %906 = vst [vmem:[%s1468_s20] sm:$0xf] %v905_v13  ;;  %p908_p0 = scmp.ge.s32.totalorder %s907_s21, %s1785_s16  ;;  %p898_p1 = scmp.ge.s32.totalorder %s899_s30, %s1785_s16 }
 0x11f   : >> { %s1822_s21 = smov (%p908_p0, %s907_s21), 0  ;;  %901 = sbr.rel (!%p898_p1) target bundleno = 284 (0x11c), region = 150 }
 0x120   : >> { %s1262_s27 = sshll.u32 %s1822_s21, 2  ;;  %s1475_s26 = smov %s1822_s21  }
 0x121   : >> { %s912_s23 = scalar_lea.vmem %s893_s19, %s1262_s27 [#allocation2]   ;;  %s913_s20 = scalar_lea.vmem %s895_s14, %s1262_s27  }
 0x124 PF: > { %p13_p2 = scmp.ge.s32.totalorder %s1532_s25, 4   ;;  %s1814_s21 = smov %s1444_s22 }
 0x125   : > { %s1815_s22 = smov %s1540_s28  ;;  %s1816_s23 = smov %s1532_s25 }
 0x126   :  { %15 = sbr.rel (!%p13_p2) target bundleno = 2 (0x2), region = 161 }

// kernel: simple_convnet_forward.5
= control target key start
LH: loop header
LB: loop body
LE: loop exit
PB: predicated region body
PF: predicated region fallthrough
CT: control target
= control target key end

     0   :  { %s3047_s0 = inlined_call_operand.vmem [shape: bf16[4,4,2,384], index: 0, kind: input, shape index: {}]   ;;  %s3048_s1 = inlined_call_operand.vmem [shape: bf16[384,64], index: 1, kind: input, shape index: {}]   ;;  %s3049_s2 = inlined_call_operand.vmem [shape: f32[1,64], index: 2, kind: input, shape index: {}]   ;;  %s3050_s3 = inlined_call_operand.vmem [shape: bf16[4,64,256], index: 3, kind: input, shape index: {}]   ;;  %s3051_s4 = inlined_call_operand.vmem [shape: f32[1,256], index: 4, kind: input, shape index: {}]   ;;  %s3052_s5 = inlined_call_operand.vmem [shape: bf16[256,10], index: 5, kind: input, shape index: {}]   ;;  %s3053_s6 = inlined_call_operand.vmem [shape: f32[1,10], index: 6, kind: input, shape index: {}]   ;;  %s3054_s7 = inlined_call_operand.hbm [shape: f32[2,10], index: 7, kind: output, shape index: {}]  }
   0x1   :  { %v2055_v0 = vld [vmem:[%s3048_s1 + $0x38] sm:$0xff]  ;;  %v2072_v3 = vld [vmem:[%s3048_s1 + $0x30] sm:$0xff]  ;;  %v2091_v6 = vld [vmem:[%s3048_s1 + $0x28] sm:$0xff] }
   0x2   :  { %v2060_v1 = vld [vmem:[%s3048_s1 + $0x78] sm:$0xff]  ;;  %230 = vmatpush.bf16.msra.mxu0 %v2055_v0  ;;  %v2077_v4 = vld [vmem:[%s3048_s1 + $0x70] sm:$0xff]  ;;  %279 = vmatpush.bf16.msra.mxu3 %v2055_v0  ;;  %v2096_v7 = vld [vmem:[%s3048_s1 + $0x68] sm:$0xff] }
   0x3   :  { %v2065_v2 = vld [vmem:[%s3048_s1 + $0xb8] sm:$0xff]  ;;  %243 = vmatpush.bf16.msra.mxu1 %v2060_v1  ;;  %v2084_v5 = vld [vmem:[%s3048_s1 + $0xb0] sm:$0xff]  ;;  %v2103_v8 = vld [vmem:[%s3048_s1 + $0xa8] sm:$0xff] }
   0x4   :  { %256 = vmatpush.bf16.msra.mxu2 %v2065_v2  ;;  %v77_v9 = vld [vmem:[%s3047_s0] sm:$0x7] }
   0x5   :  { %79 = vst [vmem:[#allocation1] ss:$9 sm:$0xff] %v77_v9 }
   0x6   :  { %231 = vmatpush.bf16.msra.mxu0 %v2072_v3  ;;  %280 = vmatpush.bf16.msra.mxu3 %v2072_v3 }
   0x7   :  { %244 = vmatpush.bf16.msra.mxu1 %v2077_v4 }
   0x8   :  { %257 = vmatpush.bf16.msra.mxu2 %v2084_v5 }
   0x9   :  { %12 = vsyncpa [#allocation3], 0  ;;  %v2113_v10 = vld [vmem:[%s3048_s1 + $0x20] sm:$0xff]  ;;  %v2132_v13 = vld [vmem:[%s3048_s1 + $0x18] sm:$0xff]  ;;  %vm684_vm0 = vcmask 523264   ;;  %vm1517_vm1 = vcmask 74752  }
   0xa   :  { %232 = vmatpush.bf16.msra.mxu0 %v2091_v6  ;;  %v2118_v11 = vld [vmem:[%s3048_s1 + $0x60] sm:$0xff]  ;;  %281 = vmatpush.bf16.msra.mxu3 %v2091_v6  ;;  %v2137_v14 = vld [vmem:[%s3048_s1 + $0x58] sm:$0xff]  ;;  %v2154_v20 = vld [vmem:[%s3048_s1 + $0x10] sm:$0xff]  ;;  %s1538_s26 = sshll.u32 %s3054_s7, 4  ;;  %s1539_s26 = int_to_ptr.hbm [resolvable:$true] %s1538_s26 }
   0xb   :  { %245 = vmatpush.bf16.msra.mxu1 %v2096_v7  ;;  %v2125_v12 = vld [vmem:[%s3048_s1 + $0xa0] sm:$0xff]  ;;  %v2144_v15 = vld [vmem:[%s3048_s1 + $0x98] sm:$0xff]  ;;  %v2159_v21 = vld [vmem:[%s3048_s1 + $0x50] sm:$0xff] }
   0xc   :  { %258 = vmatpush.bf16.msra.mxu2 %v2103_v8  ;;  %v1643_v16 = vld [vmem:[%s3047_s0 + $0x3] sm:$0x7]  ;;  %v81_v18 = vld [vmem:[#allocation1 + $0x9] sm:$0xff]  ;;  %v82_v19 = vld [vmem:[#allocation1 + $0x12] sm:$0xff] }
   0xd   :  { %v80_v17 = vld [vmem:[#allocation1] sm:$0xff]  ;;  %v2166_v22 = vld [vmem:[%s3048_s1 + $0x90] sm:$0xff]  ;;  %v2173_v23 = vld [vmem:[%s3048_s1 + $0x8] sm:$0xff] }
   0xe   :  { %233 = vmatpush.bf16.msra.mxu0 %v2113_v10  ;;  %282 = vmatpush.bf16.msra.mxu3 %v2113_v10  ;;  %272 = vst [vmem:[#allocation1] ss:$9 sm:$0xff] %v1643_v16  ;;  %v2178_v24 = vld [vmem:[%s3048_s1 + $0x48] sm:$0xff]  ;;  %v2192_v26 = vld [vmem:[%s3048_s1] sm:$0xff]  ;;  %v1648_v48 = vld [vmem:[%s3047_s0 + $0x12] sm:$0x7] }
   0xf   :  { %246 = vmatpush.bf16.msra.mxu1 %v2118_v11  ;;  %v2185_v25 = vld [vmem:[%s3048_s1 + $0x88] sm:$0xff]  ;;  %v2197_v27 = vld [vmem:[%s3048_s1 + $0x40] sm:$0xff]  ;;  %v1649_v52 = vld [vmem:[%s3047_s0 + $0x15] sm:$0x7] }
  0x10   :  { %259 = vmatpush.bf16.msra.mxu2 %v2125_v12  ;;  %v2204_v28 = vld [vmem:[%s3048_s1 + $0x80] sm:$0xff]  ;;  %v1645_v36 = vld [vmem:[%s3047_s0 + $0x9] sm:$0x7]  ;;  %v1646_v40 = vld [vmem:[%s3047_s0 + $0xc] sm:$0x7] }
  0x11   :  { %v1644_v32 = vld [vmem:[%s3047_s0 + $0x6] sm:$0x7]  ;;  %v1647_v44 = vld [vmem:[%s3047_s0 + $0xf] sm:$0x7] }
  0x12   :  { %234 = vmatpush.bf16.msra.mxu0 %v2132_v13  ;;  %283 = vmatpush.bf16.msra.mxu3 %v2132_v13 }
  0x13   :  { %247 = vmatpush.bf16.msra.mxu1 %v2137_v14 }
  0x14   :  { %260 = vmatpush.bf16.msra.mxu2 %v2144_v15 }
  0x15   :  { %v273_v29 = vld [vmem:[#allocation1] sm:$0xff]  ;;  %v275_v30 = vld [vmem:[#allocation1 + $0x12] sm:$0xff]  ;;  %v274_v31 = vld [vmem:[#allocation1 + $0x9] sm:$0xff] }
  0x16   :  { %235 = vmatpush.bf16.msra.mxu0 %v2154_v20  ;;  %284 = vmatpush.bf16.msra.mxu3 %v2154_v20  ;;  %322 = vst [vmem:[#allocation1] ss:$9 sm:$0xff] %v1644_v32 }
  0x17   :  { %248 = vmatpush.bf16.msra.mxu1 %v2159_v21 }
  0x18   :  { %261 = vmatpush.bf16.msra.mxu2 %v2166_v22 }
  0x1a   :  { %236 = vmatpush.bf16.msra.mxu0 %v2173_v23  ;;  %285 = vmatpush.bf16.msra.mxu3 %v2173_v23 }
  0x1b   :  { %249 = vmatpush.bf16.msra.mxu1 %v2178_v24 }
  0x1c   :  { %262 = vmatpush.bf16.msra.mxu2 %v2185_v25 }
  0x1d   :  { %v323_v33 = vld [vmem:[#allocation1] sm:$0xff]  ;;  %v324_v34 = vld [vmem:[#allocation1 + $0x9] sm:$0xff]  ;;  %v325_v35 = vld [vmem:[#allocation1 + $0x12] sm:$0xff] }
  0x1e   :  { %237 = vmatpush.bf16.msra.mxu0 %v2192_v26  ;;  %286 = vmatpush.bf16.msra.mxu3 %v2192_v26  ;;  %372 = vst [vmem:[#allocation1] ss:$9 sm:$0xff] %v1645_v36 }
  0x1f   :  { %250 = vmatpush.bf16.msra.mxu1 %v2197_v27 }
  0x20   :  { %263 = vmatpush.bf16.msra.mxu2 %v2204_v28 }
  0x21   :  { %238 = vmatmul.bf16.vlgmr.msra.gmra.mxu0 %v80_v17  ;;  %287 = vmatmul.bf16.vlgmr.msra.gmra.mxu3 %v273_v29 }
  0x22   :  { %292 = vmatpush.bf16.msrb.mxu0 %v2060_v1  ;;  %342 = vmatpush.bf16.msrb.mxu3 %v2060_v1 }
  0x23   :  { %305 = vmatpush.bf16.msrb.mxu1 %v2065_v2  ;;  %264 = vmatmul.bf16.vlgmr.msra.gmra.mxu2 %v82_v19 }
  0x24   :  { %329 = vmatpush.bf16.msrb.mxu2 %v2055_v0  ;;  %251 = vmatmul.bf16.vlgmr.msra.gmra.mxu1 %v81_v18 }
  0x25   :  { %v374_v37 = vld [vmem:[#allocation1 + $0x9] sm:$0xff]  ;;  %v375_v38 = vld [vmem:[#allocation1 + $0x12] sm:$0xff]  ;;  %v373_v39 = vld [vmem:[#allocation1] sm:$0xff] }
  0x26   :  { %293 = vmatpush.bf16.msrb.mxu0 %v2077_v4  ;;  %343 = vmatpush.bf16.msrb.mxu3 %v2077_v4  ;;  %436 = vst [vmem:[#allocation1] ss:$9 sm:$0xff] %v1646_v40 }
  0x27   :  { %306 = vmatpush.bf16.msrb.mxu1 %v2084_v5 }
  0x28   :  { %330 = vmatpush.bf16.msrb.mxu2 %v2072_v3 }
  0x2a   :  { %294 = vmatpush.bf16.msrb.mxu0 %v2096_v7  ;;  %344 = vmatpush.bf16.msrb.mxu3 %v2096_v7 }
  0x2b   :  { %307 = vmatpush.bf16.msrb.mxu1 %v2103_v8 }
  0x2c   :  { %331 = vmatpush.bf16.msrb.mxu2 %v2091_v6 }
  0x2d   :  { %v437_v41 = vld [vmem:[#allocation1] sm:$0xff]  ;;  %v438_v42 = vld [vmem:[#allocation1 + $0x9] sm:$0xff]  ;;  %v439_v43 = vld [vmem:[#allocation1 + $0x12] sm:$0xff] }
  0x2e   :  { %295 = vmatpush.bf16.msrb.mxu0 %v2118_v11  ;;  %345 = vmatpush.bf16.msrb.mxu3 %v2118_v11  ;;  %485 = vst [vmem:[#allocation1] ss:$9 sm:$0xff] %v1647_v44 }
  0x2f   :  { %308 = vmatpush.bf16.msrb.mxu1 %v2125_v12 }
  0x30   :  { %332 = vmatpush.bf16.msrb.mxu2 %v2113_v10 }
  0x32   :  { %296 = vmatpush.bf16.msrb.mxu0 %v2137_v14  ;;  %346 = vmatpush.bf16.msrb.mxu3 %v2137_v14 }
  0x33   :  { %309 = vmatpush.bf16.msrb.mxu1 %v2144_v15 }
  0x34   :  { %333 = vmatpush.bf16.msrb.mxu2 %v2132_v13 }
  0x35   :  { %v486_v45 = vld [vmem:[#allocation1] sm:$0xff]  ;;  %v487_v46 = vld [vmem:[#allocation1 + $0x9] sm:$0xff]  ;;  %v488_v47 = vld [vmem:[#allocation1 + $0x12] sm:$0xff] }
  0x36   :  { %297 = vmatpush.bf16.msrb.mxu0 %v2159_v21  ;;  %347 = vmatpush.bf16.msrb.mxu3 %v2159_v21  ;;  %535 = vst [vmem:[#allocation1] ss:$9 sm:$0xff] %v1648_v48 }
  0x37   :  { %310 = vmatpush.bf16.msrb.mxu1 %v2166_v22 }
  0x38   :  { %334 = vmatpush.bf16.msrb.mxu2 %v2154_v20 }
  0x3a   :  { %298 = vmatpush.bf16.msrb.mxu0 %v2178_v24  ;;  %348 = vmatpush.bf16.msrb.mxu3 %v2178_v24 }
  0x3b   :  { %311 = vmatpush.bf16.msrb.mxu1 %v2185_v25 }
  0x3c   :  { %335 = vmatpush.bf16.msrb.mxu2 %v2173_v23 }
  0x3d   :  { %v536_v49 = vld [vmem:[#allocation1] sm:$0xff]  ;;  %v537_v50 = vld [vmem:[#allocation1 + $0x9] sm:$0xff]  ;;  %v538_v51 = vld [vmem:[#allocation1 + $0x12] sm:$0xff] }
  0x3e   :  { %299 = vmatpush.bf16.msrb.mxu0 %v2197_v27  ;;  %349 = vmatpush.bf16.msrb.mxu3 %v2197_v27  ;;  %585 = vst [vmem:[#allocation1] ss:$9 sm:$0xff] %v1649_v52 }
  0x3f   :  { %312 = vmatpush.bf16.msrb.mxu1 %v2204_v28 }
  0x40   :  { %336 = vmatpush.bf16.msrb.mxu2 %v2192_v26 }
  0x41   :  { %300 = vmatmul.bf16.vlgmr.msrb.gmra.mxu0 %v274_v31  ;;  %350 = vmatmul.bf16.vlgmr.msrb.gmra.mxu3 %v324_v34 }
  0x42   :  { %355 = vmatpush.bf16.msra.mxu0 %v2065_v2  ;;  %405 = vmatpush.bf16.msra.mxu3 %v2065_v2 }
  0x43   :  { %379 = vmatpush.bf16.msra.mxu1 %v2055_v0  ;;  %337 = vmatmul.bf16.vlgmr.msrb.gmra.mxu2 %v323_v33 }
  0x44   :  { %392 = vmatpush.bf16.msra.mxu2 %v2060_v1  ;;  %313 = vmatmul.bf16.vlgmr.msrb.gmra.mxu1 %v275_v30 }
  0x45   :  { %v586_v63 = vld [vmem:[#allocation1] sm:$0xff]  ;;  %v587_v9 = vld [vmem:[#allocation1 + $0x9] sm:$0xff]  ;;  %v588_v16 = vld [vmem:[#allocation1 + $0x12] sm:$0xff] }
  0x46   :  { %356 = vmatpush.bf16.msra.mxu0 %v2084_v5  ;;  %406 = vmatpush.bf16.msra.mxu3 %v2084_v5 }
  0x47   :  { %380 = vmatpush.bf16.msra.mxu1 %v2072_v3 }
  0x48   :  { %393 = vmatpush.bf16.msra.mxu2 %v2077_v4 }
  0x4a   :  { %357 = vmatpush.bf16.msra.mxu0 %v2103_v8  ;;  %407 = vmatpush.bf16.msra.mxu3 %v2103_v8 }
  0x4b   :  { %381 = vmatpush.bf16.msra.mxu1 %v2091_v6 }
  0x4c   :  { %394 = vmatpush.bf16.msra.mxu2 %v2096_v7 }
  0x4e   :  { %358 = vmatpush.bf16.msra.mxu0 %v2125_v12  ;;  %408 = vmatpush.bf16.msra.mxu3 %v2125_v12 }
  0x4f   :  { %382 = vmatpush.bf16.msra.mxu1 %v2113_v10 }
  0x50   :  { %395 = vmatpush.bf16.msra.mxu2 %v2118_v11 }
  0x52   :  { %359 = vmatpush.bf16.msra.mxu0 %v2144_v15  ;;  %409 = vmatpush.bf16.msra.mxu3 %v2144_v15 }
  0x53   :  { %383 = vmatpush.bf16.msra.mxu1 %v2132_v13 }
  0x54   :  { %396 = vmatpush.bf16.msra.mxu2 %v2137_v14 }
  0x56   :  { %360 = vmatpush.bf16.msra.mxu0 %v2166_v22  ;;  %410 = vmatpush.bf16.msra.mxu3 %v2166_v22 }
  0x57   :  { %384 = vmatpush.bf16.msra.mxu1 %v2154_v20 }
  0x58   :  { %397 = vmatpush.bf16.msra.mxu2 %v2159_v21 }
  0x5a   :  { %361 = vmatpush.bf16.msra.mxu0 %v2185_v25  ;;  %411 = vmatpush.bf16.msra.mxu3 %v2185_v25 }
  0x5b   :  { %385 = vmatpush.bf16.msra.mxu1 %v2173_v23 }
  0x5c   :  { %398 = vmatpush.bf16.msra.mxu2 %v2178_v24 }
  0x5e   :  { %362 = vmatpush.bf16.msra.mxu0 %v2204_v28  ;;  %412 = vmatpush.bf16.msra.mxu3 %v2204_v28 }
  0x5f   :  { %386 = vmatpush.bf16.msra.mxu1 %v2192_v26 }
  0x60   :  { %399 = vmatpush.bf16.msra.mxu2 %v2197_v27 }
  0x61   :  { %363 = vmatmul.bf16.vlgmr.msra.gmra.mxu0 %v325_v35  ;;  %413 = vmatmul.bf16.vlgmr.msra.gmra.mxu3 %v375_v38 }
  0x62   :  { %443 = vmatpush.bf16.msrb.mxu0 %v2055_v0  ;;  %492 = vmatpush.bf16.msrb.mxu3 %v2055_v0 }
  0x63   :  { %456 = vmatpush.bf16.msrb.mxu1 %v2060_v1  ;;  %400 = vmatmul.bf16.vlgmr.msra.gmra.mxu2 %v374_v37 }
  0x64   :  { %469 = vmatpush.bf16.msrb.mxu2 %v2065_v2  ;;  %387 = vmatmul.bf16.vlgmr.msra.gmra.mxu1 %v373_v39 }
  0x66   :  { %444 = vmatpush.bf16.msrb.mxu0 %v2072_v3  ;;  %493 = vmatpush.bf16.msrb.mxu3 %v2072_v3 }
  0x67   :  { %457 = vmatpush.bf16.msrb.mxu1 %v2077_v4 }
  0x68   :  { %470 = vmatpush.bf16.msrb.mxu2 %v2084_v5 }
  0x6a   :  { %445 = vmatpush.bf16.msrb.mxu0 %v2091_v6  ;;  %494 = vmatpush.bf16.msrb.mxu3 %v2091_v6 }
  0x6b   :  { %458 = vmatpush.bf16.msrb.mxu1 %v2096_v7 }
  0x6c   :  { %471 = vmatpush.bf16.msrb.mxu2 %v2103_v8 }
  0x6e   :  { %446 = vmatpush.bf16.msrb.mxu0 %v2113_v10  ;;  %495 = vmatpush.bf16.msrb.mxu3 %v2113_v10 }
  0x6f   :  { %459 = vmatpush.bf16.msrb.mxu1 %v2118_v11 }
  0x70   :  { %472 = vmatpush.bf16.msrb.mxu2 %v2125_v12 }
  0x72   :  { %447 = vmatpush.bf16.msrb.mxu0 %v2132_v13  ;;  %496 = vmatpush.bf16.msrb.mxu3 %v2132_v13 }
  0x73   :  { %460 = vmatpush.bf16.msrb.mxu1 %v2137_v14 }
  0x74   :  { %473 = vmatpush.bf16.msrb.mxu2 %v2144_v15 }
  0x76   :  { %448 = vmatpush.bf16.msrb.mxu0 %v2154_v20  ;;  %497 = vmatpush.bf16.msrb.mxu3 %v2154_v20 }
  0x77   :  { %461 = vmatpush.bf16.msrb.mxu1 %v2159_v21 }
  0x78   :  { %474 = vmatpush.bf16.msrb.mxu2 %v2166_v22 }
  0x7a   :  { %449 = vmatpush.bf16.msrb.mxu0 %v2173_v23  ;;  %498 = vmatpush.bf16.msrb.mxu3 %v2173_v23 }
  0x7b   :  { %462 = vmatpush.bf16.msrb.mxu1 %v2178_v24 }
  0x7c   :  { %475 = vmatpush.bf16.msrb.mxu2 %v2185_v25 }
  0x7e   :  { %450 = vmatpush.bf16.msrb.mxu0 %v2192_v26  ;;  %499 = vmatpush.bf16.msrb.mxu3 %v2192_v26 }
  0x7f   :  { %463 = vmatpush.bf16.msrb.mxu1 %v2197_v27 }
  0x80   :  { %476 = vmatpush.bf16.msrb.mxu2 %v2204_v28 }
  0x81   :  { %451 = vmatmul.bf16.vlgmr.msrb.gmra.mxu0 %v437_v41  ;;  %500 = vmatmul.bf16.vlgmr.msrb.gmra.mxu3 %v486_v45 }
  0x82   :  { %505 = vmatpush.bf16.msra.mxu0 %v2060_v1  ;;  %555 = vmatpush.bf16.msra.mxu3 %v2060_v1 }
  0x83   :  { %518 = vmatpush.bf16.msra.mxu1 %v2065_v2  ;;  %477 = vmatmul.bf16.vlgmr.msrb.gmra.mxu2 %v439_v43 }
  0x84   :  { %542 = vmatpush.bf16.msra.mxu2 %v2055_v0  ;;  %464 = vmatmul.bf16.vlgmr.msrb.gmra.mxu1 %v438_v42 }
  0x86   :  { %506 = vmatpush.bf16.msra.mxu0 %v2077_v4  ;;  %556 = vmatpush.bf16.msra.mxu3 %v2077_v4 }
  0x87   :  { %519 = vmatpush.bf16.msra.mxu1 %v2084_v5 }
  0x88   :  { %543 = vmatpush.bf16.msra.mxu2 %v2072_v3 }
  0x8a   :  { %507 = vmatpush.bf16.msra.mxu0 %v2096_v7  ;;  %557 = vmatpush.bf16.msra.mxu3 %v2096_v7 }
  0x8b   :  { %520 = vmatpush.bf16.msra.mxu1 %v2103_v8 }
  0x8c   :  { %544 = vmatpush.bf16.msra.mxu2 %v2091_v6 }
  0x8e   :  { %508 = vmatpush.bf16.msra.mxu0 %v2118_v11  ;;  %558 = vmatpush.bf16.msra.mxu3 %v2118_v11 }
  0x8f   :  { %521 = vmatpush.bf16.msra.mxu1 %v2125_v12 }
  0x90   :  { %545 = vmatpush.bf16.msra.mxu2 %v2113_v10 }
  0x92   :  { %509 = vmatpush.bf16.msra.mxu0 %v2137_v14  ;;  %559 = vmatpush.bf16.msra.mxu3 %v2137_v14 }
  0x93   :  { %522 = vmatpush.bf16.msra.mxu1 %v2144_v15 }
  0x94   :  { %546 = vmatpush.bf16.msra.mxu2 %v2132_v13 }
  0x96   :  { %510 = vmatpush.bf16.msra.mxu0 %v2159_v21  ;;  %560 = vmatpush.bf16.msra.mxu3 %v2159_v21 }
  0x97   :  { %523 = vmatpush.bf16.msra.mxu1 %v2166_v22 }
  0x98   :  { %547 = vmatpush.bf16.msra.mxu2 %v2154_v20 }
  0x9a   :  { %511 = vmatpush.bf16.msra.mxu0 %v2178_v24  ;;  %561 = vmatpush.bf16.msra.mxu3 %v2178_v24 }
  0x9b   :  { %524 = vmatpush.bf16.msra.mxu1 %v2185_v25 }
  0x9c   :  { %548 = vmatpush.bf16.msra.mxu2 %v2173_v23 }
  0x9e   :  { %512 = vmatpush.bf16.msra.mxu0 %v2197_v27  ;;  %562 = vmatpush.bf16.msra.mxu3 %v2197_v27  ;;  %v239_v53 = vpop.f32.mrf.mxu0 }
  0x9f   :  { %525 = vmatpush.bf16.msra.mxu1 %v2204_v28 }
  0xa0   :  { %549 = vmatpush.bf16.msra.mxu2 %v2192_v26 }
  0xa1   :  { %513 = vmatmul.bf16.vlgmr.msra.gmra.mxu0 %v487_v46  ;;  %563 = vmatmul.bf16.vlgmr.msra.gmra.mxu3 %v537_v50  ;;  %v252_v54 = vpop.f32.mrf.mxu1 }
  0xa2   :  { %568 = vmatpush.bf16.msrb.mxu0 %v2065_v2  ;;  %618 = vmatpush.bf16.msrb.mxu3 %v2065_v2  ;;  %v253_v55 = vadd.f32 %v252_v54, %v239_v53 }
  0xa3   :  { %592 = vmatpush.bf16.msrb.mxu1 %v2055_v0  ;;  %550 = vmatmul.bf16.vlgmr.msra.gmra.mxu2 %v536_v49 }
  0xa4   :  { %605 = vmatpush.bf16.msrb.mxu2 %v2060_v1  ;;  %526 = vmatmul.bf16.vlgmr.msra.gmra.mxu1 %v488_v47  ;;  %v288_v57 = vpop.f32.mrf.mxu3 }
  0xa6   :  { %569 = vmatpush.bf16.msrb.mxu0 %v2084_v5  ;;  %619 = vmatpush.bf16.msrb.mxu3 %v2084_v5  ;;  %v265_v56 = vpop.f32.mrf.mxu2  ;;  %v241_v58 = vpop.f32.mrf.mxu0 }
  0xa7   :  { %593 = vmatpush.bf16.msrb.mxu1 %v2072_v3  ;;  %v2372_v60 = vadd.f32 %v265_v56, %v253_v55  ;;  %v1921_v58 = vld [vmem:[%s3050_s3 + $0x74] sm:$0xf0] }
  0xa8   :  { %606 = vmatpush.bf16.msrb.mxu2 %v2077_v4 }
  0xa9   :  { %v254_v59 = vpop.f32.mrf.mxu1 }
  0xaa   :  { %570 = vmatpush.bf16.msrb.mxu0 %v2103_v8  ;;  %620 = vmatpush.bf16.msrb.mxu3 %v2103_v8  ;;  %v1920_v59 = vld [vmem:[%s3050_s3 + $0x74] sm:$0xf] }
  0xab   :  { %594 = vmatpush.bf16.msrb.mxu1 %v2091_v6 }
  0xac   :  { %607 = vmatpush.bf16.msrb.mxu2 %v2096_v7  ;;  %v290_v62 = vpop.f32.mrf.mxu3 }
  0xad   :  { %v1676_v62 = vld [vmem:[%s3050_s3 + $0x60] sm:$0xf] }
  0xae   :  { %571 = vmatpush.bf16.msrb.mxu0 %v2125_v12  ;;  %621 = vmatpush.bf16.msrb.mxu3 %v2125_v12  ;;  %v267_v61 = vpop.f32.mrf.mxu2 }
  0xaf   :  { %595 = vmatpush.bf16.msrb.mxu1 %v2113_v10  ;;  %v1686_v61 = vld [vmem:[%s3050_s3 + $0x78] sm:$0xf0] }
  0xb0   :  { %608 = vmatpush.bf16.msrb.mxu2 %v2118_v11 }
  0xb2   :  { %572 = vmatpush.bf16.msrb.mxu0 %v2144_v15  ;;  %622 = vmatpush.bf16.msrb.mxu3 %v2144_v15 }
  0xb3   :  { %596 = vmatpush.bf16.msrb.mxu1 %v2132_v13 }
  0xb4   :  { %609 = vmatpush.bf16.msrb.mxu2 %v2137_v14 }
  0xb6   :  { %573 = vmatpush.bf16.msrb.mxu0 %v2166_v22  ;;  %623 = vmatpush.bf16.msrb.mxu3 %v2166_v22 }
  0xb7   :  { %597 = vmatpush.bf16.msrb.mxu1 %v2154_v20 }
  0xb8   :  { %610 = vmatpush.bf16.msrb.mxu2 %v2159_v21 }
  0xba   :  { %574 = vmatpush.bf16.msrb.mxu0 %v2185_v25  ;;  %624 = vmatpush.bf16.msrb.mxu3 %v2185_v25 }
  0xbb   :  { %598 = vmatpush.bf16.msrb.mxu1 %v2173_v23 }
  0xbc   :  { %611 = vmatpush.bf16.msrb.mxu2 %v2178_v24 }
  0xbe   :  { %575 = vmatpush.bf16.msrb.mxu0 %v2204_v28  ;;  %625 = vmatpush.bf16.msrb.mxu3 %v2204_v28  ;;  %v301_v17 = vpop.f32.mrf.mxu0 }
  0xbf   :  { %599 = vmatpush.bf16.msrb.mxu1 %v2192_v26  ;;  %v302_v19 = vadd.f32 %v301_v17, %v288_v57  ;;  %v1684_v57 = vld [vmem:[%s3050_s3 + $0x70] sm:$0xf]  ;;  %v1689_v17 = vor.u32 %v1920_v59, %v1686_v61  ;;  %v1911_v59 = vld [vmem:[%s3050_s3 + $0x24] sm:$0xf0] }
  0xc0   :  { %612 = vmatpush.bf16.msrb.mxu2 %v2197_v27 }
  0xc1   :  { %576 = vmatmul.bf16.vlgmr.msrb.gmra.mxu0 %v538_v51  ;;  %626 = vmatmul.bf16.vlgmr.msrb.gmra.mxu3 %v588_v16  ;;  %v314_v18 = vpop.f32.mrf.mxu1 }
  0xc2   :  { %793 = vmatpush.bf16.msra.mxu0 %v2055_v0  ;;  %600 = vmatmul.bf16.vlgmr.msrb.gmra.mxu1 %v586_v63  ;;  %v315_v29 = vadd.f32 %v314_v18, %v302_v19  ;;  %v1919_v63 = vld [vmem:[%s3050_s3 + $0x64] sm:$0xf0]  ;;  %v1918_v18 = vld [vmem:[%s3050_s3 + $0x64] sm:$0xf]  ;;  %v1678_v19 = vld [vmem:[%s3050_s3 + $0x68] sm:$0xf0] }
  0xc3   :  { %806 = vmatpush.bf16.msra.mxu1 %v2060_v1  ;;  %613 = vmatmul.bf16.vlgmr.msrb.gmra.mxu2 %v587_v9 }
  0xc4   :  { %v318_v30 = vmax.f32 %v2372_v60, %v315_v29  ;;  %v351_v32 = vpop.f32.mrf.mxu3  ;;  %v1685_v60 = vor.u32 %v1921_v58, %v1684_v57  ;;  %v1677_v29 = vor.u32 %v1919_v63, %v1676_v62  ;;  %705 = vmatpush.bf16.msra.mxu3 %v1689_v17  ;;  %v1710_v58 = vld [vmem:[%s3050_s3 + $0x20] sm:$0xf]  ;;  %v1712_v62 = vld [vmem:[%s3050_s3 + $0x28] sm:$0xf0] }
  0xc5   :  { %v1711_v61 = vor.u32 %v1911_v59, %v1710_v58 }
  0xc6   :  { %794 = vmatpush.bf16.msra.mxu0 %v2072_v3  ;;  %v338_v31 = vpop.f32.mrf.mxu2  ;;  %v303_v33 = vpop.f32.mrf.mxu0  ;;  %692 = vmatpush.bf16.msra.mxu2 %v1685_v60  ;;  %v1910_v60 = vld [vmem:[%s3050_s3 + $0x24] sm:$0xf] }
  0xc7   :  { %807 = vmatpush.bf16.msra.mxu1 %v2077_v4  ;;  %v352_v34 = vadd.f32 %v351_v32, %v338_v31  ;;  %v1668_v31 = vld [vmem:[%s3050_s3 + $0x50] sm:$0xf]  ;;  %v1917_v32 = vld [vmem:[%s3050_s3 + $0x54] sm:$0xf0]  ;;  %v1916_v33 = vld [vmem:[%s3050_s3 + $0x54] sm:$0xf] }
  0xc9   :  { %v316_v35 = vpop.f32.mrf.mxu1 }
  0xca   :  { %795 = vmatpush.bf16.msra.mxu0 %v2091_v6  ;;  %693 = vmatpush.bf16.msra.mxu2 %v1677_v29  ;;  %v1670_v35 = vld [vmem:[%s3050_s3 + $0x58] sm:$0xf0]  ;;  %v1909_v29 = vld [vmem:[%s3050_s3 + $0x14] sm:$0xf0] }
  0xcb   :  { %808 = vmatpush.bf16.msra.mxu1 %v2096_v7 }
  0xcc   :  { %v353_v37 = vpop.f32.mrf.mxu3 }
  0xce   :  { %796 = vmatpush.bf16.msra.mxu0 %v2113_v10  ;;  %v340_v36 = vpop.f32.mrf.mxu2 }
  0xcf   :  { %809 = vmatpush.bf16.msra.mxu1 %v2118_v11  ;;  %v1673_v36 = vor.u32 %v1916_v33, %v1670_v35  ;;  %v1907_v35 = vld [vmem:[%s3050_s3 + $0x4] sm:$0xf0] }
  0xd2   :  { %797 = vmatpush.bf16.msra.mxu0 %v2132_v13 }
  0xd3   :  { %810 = vmatpush.bf16.msra.mxu1 %v2137_v14 }
  0xd6   :  { %798 = vmatpush.bf16.msra.mxu0 %v2154_v20 }
  0xd7   :  { %811 = vmatpush.bf16.msra.mxu1 %v2159_v21 }
  0xda   :  { %799 = vmatpush.bf16.msra.mxu0 %v2173_v23 }
  0xdb   :  { %812 = vmatpush.bf16.msra.mxu1 %v2178_v24 }
  0xde   :  { %800 = vmatpush.bf16.msra.mxu0 %v2192_v26  ;;  %v364_v38 = vpop.f32.mrf.mxu0 }
  0xdf   :  { %813 = vmatpush.bf16.msra.mxu1 %v2197_v27  ;;  %v365_v39 = vadd.f32 %v364_v38, %v352_v34  ;;  %v1669_v34 = vor.u32 %v1917_v32, %v1668_v31  ;;  %v1704_v32 = vld [vmem:[%s3050_s3 + $0x18] sm:$0xf0] }
  0xe1   :  { %v388_v40 = vpop.f32.mrf.mxu1  ;;  %v2413_v41 = vmax.f32 %v318_v30, %v365_v39  ;;  %v1681_v30 = vor.u32 %v1918_v18, %v1678_v19  ;;  %694 = vmatpush.bf16.msra.mxu2 %v1669_v34  ;;  %v1660_v39 = vld [vmem:[%s3050_s3 + $0x40] sm:$0xf]  ;;  %v1702_v19 = vld [vmem:[%s3050_s3 + $0x10] sm:$0xf] }
  0xe2   :  { %855 = vmatpush.bf16.msrb.mxu0 %v2060_v1  ;;  %v1703_v31 = vor.u32 %v1909_v29, %v1702_v19  ;;  %v1694_v34 = vld [vmem:[%s3050_s3] sm:$0xf] }
  0xe3   :  { %868 = vmatpush.bf16.msrb.mxu1 %v2065_v2  ;;  %706 = vmatpush.bf16.msra.mxu3 %v1681_v30  ;;  %v1908_v30 = vld [vmem:[%s3050_s3 + $0x14] sm:$0xf] }
  0xe4   :  { %v414_v44 = vpop.f32.mrf.mxu3  ;;  %v1707_v33 = vor.u32 %v1908_v30, %v1704_v32  ;;  %v1727_v32 = vld [vmem:[%s3047_s0 + $0x1b] sm:$0x7] }
  0xe6   :  { %856 = vmatpush.bf16.msrb.mxu0 %v2077_v4  ;;  %v401_v42 = vpop.f32.mrf.mxu2  ;;  %v366_v45 = vpop.f32.mrf.mxu0 }
  0xe7   :  { %869 = vmatpush.bf16.msrb.mxu1 %v2084_v5  ;;  %v402_v43 = vadd.f32 %v401_v42, %v388_v40  ;;  %707 = vmatpush.bf16.msra.mxu3 %v1673_v36  ;;  %v1915_v40 = vld [vmem:[%s3050_s3 + $0x44] sm:$0xf0]  ;;  %v1914_v42 = vld [vmem:[%s3050_s3 + $0x44] sm:$0xf]  ;;  %v1718_v45 = vld [vmem:[%s3050_s3 + $0x30] sm:$0xf] }
  0xe8   :  { %v1906_v36 = vld [vmem:[%s3050_s3 + $0x4] sm:$0xf] }
  0xe9   :  { %v2419_v46 = vadd.f32 %v414_v44, %v402_v43  ;;  %v390_v47 = vpop.f32.mrf.mxu1  ;;  %v1661_v43 = vor.u32 %v1915_v40, %v1660_v39  ;;  %v1662_v44 = vld [vmem:[%s3050_s3 + $0x48] sm:$0xf0]  ;;  %v1695_v39 = vor.u32 %v1907_v35, %v1694_v34 }
  0xea   :  { %857 = vmatpush.bf16.msrb.mxu0 %v2096_v7  ;;  %v1913_v47 = vld [vmem:[%s3050_s3 + $0x34] sm:$0xf0]  ;;  %v1696_v40 = vld [vmem:[%s3050_s3 + $0x8] sm:$0xf0] }
  0xeb   :  { %870 = vmatpush.bf16.msrb.mxu1 %v2103_v8  ;;  %v418_v48 = vmax.f32 %v2413_v41, %v2419_v46  ;;  %695 = vmatpush.bf16.msra.mxu2 %v1661_v43 }
  0xec   :  { %v416_v50 = vpop.f32.mrf.mxu3 }
  0xed   :  { %v1719_v50 = vor.u32 %v1913_v47, %v1718_v45 }
  0xee   :  { %858 = vmatpush.bf16.msrb.mxu0 %v2118_v11  ;;  %v403_v49 = vpop.f32.mrf.mxu2 }
  0xef   :  { %871 = vmatpush.bf16.msrb.mxu1 %v2125_v12  ;;  %v1665_v49 = vor.u32 %v1914_v42, %v1662_v44  ;;  %761 = vmatpush.bf16.msrb.mxu2 %v1719_v50  ;;  %v1699_v44 = vor.u32 %v1906_v36, %v1696_v40  ;;  %v2675_v36 = vld [vmem:[%s3048_s1 + $0x38] sm:$0xff]  ;;  %v2734_v40 = vld [vmem:[%s3048_s1] sm:$0xff] }
  0xf1   :  { %708 = vmatpush.bf16.msra.mxu3 %v1665_v49 }
  0xf2   :  { %859 = vmatpush.bf16.msrb.mxu0 %v2137_v14 }
  0xf3   :  { %872 = vmatpush.bf16.msrb.mxu1 %v2144_v15  ;;  %762 = vmatpush.bf16.msrb.mxu2 %v1711_v61 }
  0xf6   :  { %860 = vmatpush.bf16.msrb.mxu0 %v2159_v21 }
  0xf7   :  { %873 = vmatpush.bf16.msrb.mxu1 %v2166_v22  ;;  %763 = vmatpush.bf16.msrb.mxu2 %v1703_v31 }
  0xfa   :  { %861 = vmatpush.bf16.msrb.mxu0 %v2178_v24 }
  0xfb   :  { %874 = vmatpush.bf16.msrb.mxu1 %v2185_v25  ;;  %764 = vmatpush.bf16.msrb.mxu2 %v1695_v39  ;;  %v2728_v39 = vld [vmem:[%s3048_s1 + $0x48] sm:$0xff] }
  0xfe   :  { %862 = vmatpush.bf16.msrb.mxu0 %v2197_v27  ;;  %v2429_v51 = vpop.f32.mrf.mxu0 }
  0xff   :  { %875 = vmatpush.bf16.msrb.mxu1 %v2204_v28 }
 0x101   :  { %v2431_v52 = vpop.f32.mrf.mxu1 }
 0x102   :  { %v466_v45 = vadd.f32 %v2431_v52, %v2429_v51  ;;  %v2540_v51 = vld [vmem:[%s3049_s2] ss:$0 sm:$0xff] }
 0x104   :  { %v2435_v54 = vpop.f32.mrf.mxu3 }
 0x106   :  { %v2433_v53 = vpop.f32.mrf.mxu2  ;;  %v454_v55 = vpop.f32.mrf.mxu0 }
 0x107   :  { %v1912_v55 = vld [vmem:[%s3050_s3 + $0x34] sm:$0xf] }
 0x109   :  { %v467_v56 = vpop.f32.mrf.mxu1 }
 0x10a   :  { %v1720_v56 = vld [vmem:[%s3050_s3 + $0x38] sm:$0xf0] }
 0x10b   :  { %v1723_v57 = vor.u32 %v1912_v55, %v1720_v56  ;;  %v479_v55 = vadd.f32 %v2433_v53, %v466_v45 }
 0x10c   :  { %v503_v16 = vpop.f32.mrf.mxu3 }
 0x10d   :  { %774 = vmatpush.bf16.msrb.mxu3 %v1723_v57  ;;  %v1715_v16 = vor.u32 %v1910_v60, %v1712_v62 }
 0x10e   :  { %v480_v9 = vpop.f32.mrf.mxu2 }
 0x111   :  { %775 = vmatpush.bf16.msrb.mxu3 %v1715_v16 }
 0x115   :  { %776 = vmatpush.bf16.msrb.mxu3 %v1707_v33  ;;  %v422_v33 = vadd.f32 %v2540_v51, %v418_v48 }
 0x117   :  { %v423_v34 = vmax.f32 %v422_v33, 0.0  ;;  %v1756_v33 = vld [vmem:[%s3050_s3 + $0xa0] sm:$0xf] }
 0x119   :  { %777 = vmatpush.bf16.msrb.mxu3 %v1699_v44  ;;  %v424_v41 = vpack.c.bf16 %v423_v34, %v423_v34  ;;  %v1927_v34 = vld [vmem:[%s3050_s3 + $0xa4] sm:$0xf0] }
 0x11e   :  { %v514_v37 = vpop.f32.mrf.mxu0 }
 0x11f   :  { %v515_v47 = vadd.f32 %v514_v37, %v2435_v54 }
 0x121   :  { %v527_v38 = vpop.f32.mrf.mxu1 }
 0x122   :  { %v528_v56 = vadd.f32 %v527_v38, %v515_v47 }
 0x124   :  { %v564_v9 = vpop.f32.mrf.mxu3  ;;  %v531_v61 = vmax.f32 %v479_v55, %v528_v56  ;;  %v2762_v55 = vld [vmem:[%s3048_s1 + $0x90] sm:$0xff] }
 0x126   :  { %v551_v63 = vpop.f32.mrf.mxu2  ;;  %v516_v17 = vpop.f32.mrf.mxu0 }
 0x127   :  { %v565_v57 = vadd.f32 %v564_v9, %v551_v63  ;;  %v1726_v63 = vld [vmem:[%s3047_s0 + $0x18] sm:$0x7] }
 0x128   :  { %786 = vst [vmem:[#allocation1] ss:$9 sm:$0xff] %v1726_v63  ;;  %v1764_v63 = vld [vmem:[%s3050_s3 + $0xb0] sm:$0xf] }
 0x129   :  { %v529_v18 = vpop.f32.mrf.mxu1 }
 0x12c   :  { %v566_v43 = vpop.f32.mrf.mxu3 }
 0x12e   :  { %v553_v42 = vpop.f32.mrf.mxu2 }
 0x12f   :  { %v787_v29 = vld [vmem:[#allocation1] sm:$0xff]  ;;  %v788_v30 = vld [vmem:[#allocation1 + $0x9] sm:$0xff]  ;;  %v789_v31 = vld [vmem:[#allocation1 + $0x12] sm:$0xff] }
 0x130   :  { %801 = vmatmul.bf16.vlgmr.msra.gmra.mxu0 %v787_v29  ;;  %835 = vst [vmem:[#allocation1] ss:$9 sm:$0xff] %v1727_v32  ;;  %814 = vmatmul.bf16.vlgmr.msra.gmra.mxu1 %v788_v30  ;;  %v2740_v42 = vld [vmem:[%s3048_s1 + $0x40] sm:$0xff]  ;;  %v1928_v29 = vld [vmem:[%s3050_s3 + $0xb4] sm:$0xf] }
 0x131   :  { %918 = vmatpush.bf16.msra.mxu0 %v2065_v2  ;;  %942 = vmatpush.bf16.msra.mxu1 %v2055_v0 }
 0x135   :  { %919 = vmatpush.bf16.msra.mxu0 %v2084_v5  ;;  %943 = vmatpush.bf16.msra.mxu1 %v2072_v3 }
 0x137   :  { %v836_v46 = vld [vmem:[#allocation1] sm:$0xff] }
 0x139   :  { %920 = vmatpush.bf16.msra.mxu0 %v2103_v8  ;;  %944 = vmatpush.bf16.msra.mxu1 %v2091_v6 }
 0x13d   :  { %921 = vmatpush.bf16.msra.mxu0 %v2125_v12  ;;  %945 = vmatpush.bf16.msra.mxu1 %v2113_v10 }
 0x13e   :  { %v577_v49 = vpop.f32.mrf.mxu0 }
 0x13f   :  { %v601_v50 = vpop.f32.mrf.mxu1  ;;  %v578_v58 = vadd.f32 %v577_v49, %v565_v57 }
 0x141   :  { %v581_v18 = vmax.f32 %v531_v61, %v578_v58  ;;  %922 = vmatpush.bf16.msra.mxu0 %v2144_v15  ;;  %946 = vmatpush.bf16.msra.mxu1 %v2132_v13  ;;  %v2776_v61 = vld [vmem:[%s3048_s1 + $0x80] sm:$0xff] }
 0x144   :  { %v627_v60 = vpop.f32.mrf.mxu3 }
 0x145   :  { %923 = vmatpush.bf16.msra.mxu0 %v2166_v22  ;;  %947 = vmatpush.bf16.msra.mxu1 %v2154_v20 }
 0x146   :  { %v614_v59 = vpop.f32.mrf.mxu2  ;;  %v579_v16 = vpop.f32.mrf.mxu0 }
 0x147   :  { %v615_v62 = vadd.f32 %v614_v59, %v601_v50  ;;  %v603_v17 = vpop.f32.mrf.mxu1  ;;  %v2755_v50 = vld [vmem:[%s3048_s1 + $0x98] sm:$0xff] }
 0x149   :  { %v628_v19 = vadd.f32 %v627_v60, %v615_v62  ;;  %924 = vmatpush.bf16.msra.mxu0 %v2185_v25  ;;  %948 = vmatpush.bf16.msra.mxu1 %v2173_v23  ;;  %v2769_v60 = vld [vmem:[%s3048_s1 + $0x88] sm:$0xff] }
 0x14b   :  { %v631_v52 = vmax.f32 %v581_v18, %v628_v19 }
 0x14c   :  { %v629_v37 = vpop.f32.mrf.mxu3 }
 0x14d   :  { %v632_v54 = vadd.f32 %v2540_v51, %v631_v52  ;;  %925 = vmatpush.bf16.msra.mxu0 %v2204_v28  ;;  %949 = vmatpush.bf16.msra.mxu1 %v2192_v26 }
 0x14e   :  { %v616_v53 = vpop.f32.mrf.mxu2 }
 0x14f   :  { %v633_v38 = vmax.f32 %v632_v54, 0.0 }
 0x151   :  { %v634_v9 = vpack.c.bf16 %v633_v38, %v633_v38 }
 0x153   :  { %1690 = vmatmul.msk.bf16.vlgmr.msra.gmra.mxu2 %vm684_vm0, %v634_v9  ;;  %1691 = vmatmul.msk.bf16.vlgmr.msra.gmra.mxu3 %vm684_vm0, %v634_v9  ;;  %v1929_v9 = vld [vmem:[%s3050_s3 + $0xb4] sm:$0xf0] }
 0x154   :  { %819 = vmatpush.bf16.msra.mxu2 %v2065_v2  ;;  %842 = vmatpush.bf16.msra.mxu3 %v2055_v0  ;;  %v838_v2 = vld [vmem:[#allocation1 + $0x12] sm:$0xff]  ;;  %v1765_v30 = vor.u32 %v1929_v9, %v1764_v63 }
 0x155   :  { %876 = vmatmul.bf16.vlgmr.msrb.gmra.mxu1 %v838_v2  ;;  %v1757_v2 = vor.u32 %v1927_v34, %v1756_v33  ;;  %v1773_v34 = vld [vmem:[%s3047_s0 + $0x27] sm:$0x7] }
 0x158   :  { %820 = vmatpush.bf16.msra.mxu2 %v2084_v5  ;;  %843 = vmatpush.bf16.msra.mxu3 %v2072_v3  ;;  %v837_v5 = vld [vmem:[#allocation1 + $0x9] sm:$0xff] }
 0x159   :  { %863 = vmatmul.bf16.vlgmr.msrb.gmra.mxu0 %v837_v5  ;;  %v1758_v5 = vld [vmem:[%s3050_s3 + $0xa8] sm:$0xf0] }
 0x15a   :  { %1041 = vmatpush.bf16.msrb.mxu0 %v1765_v30 }
 0x15c   :  { %821 = vmatpush.bf16.msra.mxu2 %v2103_v8  ;;  %844 = vmatpush.bf16.msra.mxu3 %v2091_v6  ;;  %v1728_v8 = vld [vmem:[%s3047_s0 + $0x1e] sm:$0x7] }
 0x15d   :  { %885 = vst [vmem:[#allocation1] ss:$9 sm:$0xff] %v1728_v8 }
 0x15e   :  { %1042 = vmatpush.bf16.msrb.mxu0 %v1757_v2 }
 0x160   :  { %822 = vmatpush.bf16.msra.mxu2 %v2125_v12  ;;  %845 = vmatpush.bf16.msra.mxu3 %v2113_v10 }
 0x163   :  { %1724 = vmatmul.msk.bf16.vlgmr.msrb.gmra.mxu2 %vm684_vm0, %v424_v41  ;;  %1725 = vmatmul.msk.bf16.vlgmr.msrb.gmra.mxu3 %vm684_vm0, %v424_v41  ;;  %v1926_v41 = vld [vmem:[%s3050_s3 + $0xa4] sm:$0xf] }
 0x164   :  { %823 = vmatpush.bf16.msra.mxu2 %v2144_v15  ;;  %846 = vmatpush.bf16.msra.mxu3 %v2132_v13  ;;  %v888_v12 = vld [vmem:[#allocation1 + $0x12] sm:$0xff] }
 0x168   :  { %824 = vmatpush.bf16.msra.mxu2 %v2166_v22  ;;  %847 = vmatpush.bf16.msra.mxu3 %v2154_v20 }
 0x169   :  { %926 = vmatmul.bf16.vlgmr.msra.gmra.mxu0 %v888_v12  ;;  %v1761_v12 = vor.u32 %v1926_v41, %v1758_v5 }
 0x16c   :  { %825 = vmatpush.bf16.msra.mxu2 %v2185_v25  ;;  %848 = vmatpush.bf16.msra.mxu3 %v2173_v23 }
 0x170   :  { %826 = vmatpush.bf16.msra.mxu2 %v2204_v28  ;;  %849 = vmatpush.bf16.msra.mxu3 %v2192_v26 }
 0x173   :  { %827 = vmatmul.bf16.vlgmr.msra.gmra.mxu2 %v789_v31  ;;  %850 = vmatmul.bf16.vlgmr.msra.gmra.mxu3 %v836_v46  ;;  %v1766_v31 = vld [vmem:[%s3050_s3 + $0xb8] sm:$0xf0] }
 0x174   :  { %892 = vmatpush.bf16.msrb.mxu2 %v2055_v0  ;;  %905 = vmatpush.bf16.msrb.mxu3 %v2060_v1  ;;  %v886_v0 = vld [vmem:[#allocation1] sm:$0xff]  ;;  %v887_v1 = vld [vmem:[#allocation1 + $0x9] sm:$0xff]  ;;  %v1769_v32 = vor.u32 %v1928_v29, %v1766_v31 }
 0x176   :  { %1054 = vmatpush.bf16.msrb.mxu1 %v1769_v32 }
 0x178   :  { %893 = vmatpush.bf16.msrb.mxu2 %v2072_v3  ;;  %906 = vmatpush.bf16.msrb.mxu3 %v2077_v4  ;;  %v1729_v3 = vld [vmem:[%s3047_s0 + $0x21] sm:$0x7] }
 0x179   :  { %935 = vst [vmem:[#allocation1] ss:$9 sm:$0xff] %v1729_v3 }
 0x17a   :  { %1055 = vmatpush.bf16.msrb.mxu1 %v1761_v12 }
 0x17c   :  { %894 = vmatpush.bf16.msrb.mxu2 %v2091_v6  ;;  %907 = vmatpush.bf16.msrb.mxu3 %v2096_v7  ;;  %v2614_v6 = vld [vmem:[%s3048_s1 + $0x78] sm:$0xff] }
 0x17d   :  { %v2620_v7 = vld [vmem:[%s3048_s1 + $0xb8] sm:$0xff] }
 0x180   :  { %895 = vmatpush.bf16.msrb.mxu2 %v2113_v10  ;;  %908 = vmatpush.bf16.msrb.mxu3 %v2118_v11  ;;  %v936_v4 = vld [vmem:[#allocation1] sm:$0xff]  ;;  %v2626_v10 = vld [vmem:[%s3048_s1 + $0x70] sm:$0xff] }
 0x181   :  { %950 = vmatmul.bf16.vlgmr.msra.gmra.mxu1 %v936_v4  ;;  %v2632_v11 = vld [vmem:[%s3048_s1 + $0xb0] sm:$0xff] }
 0x182   :  { %v937_v48 = vld [vmem:[#allocation1 + $0x9] sm:$0xff]  ;;  %v938_v35 = vld [vmem:[#allocation1 + $0x12] sm:$0xff] }
 0x183   :  { %v1748_v4 = vld [vmem:[%s3050_s3 + $0x90] sm:$0xf] }
 0x184   :  { %896 = vmatpush.bf16.msrb.mxu2 %v2132_v13  ;;  %909 = vmatpush.bf16.msrb.mxu3 %v2137_v14  ;;  %v2638_v13 = vld [vmem:[%s3048_s1 + $0x68] sm:$0xff] }
 0x185   :  { %v2644_v14 = vld [vmem:[%s3048_s1 + $0xa8] sm:$0xff] }
 0x188   :  { %897 = vmatpush.bf16.msrb.mxu2 %v2154_v20  ;;  %910 = vmatpush.bf16.msrb.mxu3 %v2159_v21  ;;  %v2650_v20 = vld [vmem:[%s3048_s1 + $0x60] sm:$0xff] }
 0x18c   :  { %898 = vmatpush.bf16.msrb.mxu2 %v2173_v23  ;;  %911 = vmatpush.bf16.msrb.mxu3 %v2178_v24  ;;  %v2656_v23 = vld [vmem:[%s3048_s1 + $0xa0] sm:$0xff] }
 0x190   :  { %899 = vmatpush.bf16.msrb.mxu2 %v2192_v26  ;;  %912 = vmatpush.bf16.msrb.mxu3 %v2197_v27  ;;  %v2662_v26 = vld [vmem:[%s3048_s1 + $0x58] sm:$0xff] }
 0x193   :  { %900 = vmatmul.bf16.vlgmr.msrb.gmra.mxu2 %v886_v0  ;;  %913 = vmatmul.bf16.vlgmr.msrb.gmra.mxu3 %v887_v1 }
 0x194   :  { %955 = vmatpush.bf16.msra.mxu2 %v2614_v6  ;;  %968 = vmatpush.bf16.msra.mxu3 %v2620_v7 }
 0x198   :  { %956 = vmatpush.bf16.msra.mxu2 %v2626_v10  ;;  %969 = vmatpush.bf16.msra.mxu3 %v2632_v11 }
 0x19c   :  { %957 = vmatpush.bf16.msra.mxu2 %v2638_v13  ;;  %970 = vmatpush.bf16.msra.mxu3 %v2644_v14 }
 0x1a0   :  { %958 = vmatpush.bf16.msra.mxu2 %v2650_v20  ;;  %971 = vmatpush.bf16.msra.mxu3 %v2656_v23 }
 0x1a4   :  { %959 = vmatpush.bf16.msra.mxu2 %v2662_v26  ;;  %972 = vmatpush.bf16.msra.mxu3 %v2144_v15  ;;  %v2682_v15 = vld [vmem:[%s3048_s1 + $0x30] sm:$0xff] }
 0x1a8   :  { %960 = vmatpush.bf16.msra.mxu2 %v2159_v21  ;;  %973 = vmatpush.bf16.msra.mxu3 %v2166_v22  ;;  %v2689_v21 = vld [vmem:[%s3048_s1 + $0x28] sm:$0xff]  ;;  %v2696_v22 = vld [vmem:[%s3048_s1 + $0x20] sm:$0xff] }
 0x1ac   :  { %961 = vmatpush.bf16.msra.mxu2 %v2178_v24  ;;  %974 = vmatpush.bf16.msra.mxu3 %v2185_v25  ;;  %v2703_v24 = vld [vmem:[%s3048_s1 + $0x18] sm:$0xff]  ;;  %v2710_v25 = vld [vmem:[%s3048_s1 + $0x10] sm:$0xff] }
 0x1ad   :  { %v802_v45 = vpop.f32.mrf.mxu0  ;;  %v815_v47 = vpop.f32.mrf.mxu1 }
 0x1ae   :  { %v816_v49 = vadd.f32 %v815_v47, %v802_v45  ;;  %v1750_v45 = vld [vmem:[%s3050_s3 + $0x98] sm:$0xf0]  ;;  %v1740_v47 = vld [vmem:[%s3050_s3 + $0x80] sm:$0xf] }
 0x1b0   :  { %962 = vmatpush.bf16.msra.mxu2 %v2197_v27  ;;  %975 = vmatpush.bf16.msra.mxu3 %v2204_v28  ;;  %v2716_v27 = vld [vmem:[%s3048_s1 + $0x50] sm:$0xff]  ;;  %v2722_v28 = vld [vmem:[%s3048_s1 + $0x8] sm:$0xff] }
 0x1b3   :  { %963 = vmatmul.bf16.vlgmr.msra.gmra.mxu2 %v937_v48  ;;  %976 = vmatmul.bf16.vlgmr.msra.gmra.mxu3 %v938_v35  ;;  %v1925_v48 = vld [vmem:[%s3050_s3 + $0x94] sm:$0xf0]  ;;  %v1924_v35 = vld [vmem:[%s3050_s3 + $0x94] sm:$0xf] }
 0x1b4   :  { %1075 = vmatpush.bf16.msrb.mxu2 %v2675_v36  ;;  %1088 = vmatpush.bf16.msrb.mxu3 %v2614_v6 }
 0x1b5   :  { %v804_v58 = vpop.f32.mrf.mxu0  ;;  %v817_v59 = vpop.f32.mrf.mxu1 }
 0x1b6   :  { %v1742_v58 = vld [vmem:[%s3050_s3 + $0x88] sm:$0xf0] }
 0x1b8   :  { %1076 = vmatpush.bf16.msrb.mxu2 %v2682_v15  ;;  %1089 = vmatpush.bf16.msrb.mxu3 %v2626_v10 }
 0x1bc   :  { %1077 = vmatpush.bf16.msrb.mxu2 %v2689_v21  ;;  %1090 = vmatpush.bf16.msrb.mxu3 %v2638_v13 }
 0x1c0   :  { %1078 = vmatpush.bf16.msrb.mxu2 %v2696_v22  ;;  %1091 = vmatpush.bf16.msrb.mxu3 %v2650_v20 }
 0x1c4   :  { %1079 = vmatpush.bf16.msrb.mxu2 %v2703_v24  ;;  %1092 = vmatpush.bf16.msrb.mxu3 %v2662_v26 }
 0x1c8   :  { %1080 = vmatpush.bf16.msrb.mxu2 %v2710_v25  ;;  %1093 = vmatpush.bf16.msrb.mxu3 %v2716_v27 }
 0x1cc   :  { %1081 = vmatpush.bf16.msrb.mxu2 %v2722_v28  ;;  %1094 = vmatpush.bf16.msrb.mxu3 %v2728_v39 }
 0x1d0   :  { %1082 = vmatpush.bf16.msrb.mxu2 %v2734_v40  ;;  %1095 = vmatpush.bf16.msrb.mxu3 %v2740_v42 }
 0x1d2   :  { %v877_v52 = vpop.f32.mrf.mxu1 }
 0x1d4   :  { %1137 = vmatpush.bf16.msra.mxu2 %v2614_v6  ;;  %1150 = vmatpush.bf16.msra.mxu3 %v2620_v7 }
 0x1d6   :  { %v697_v43 = vpop.f32.mrf.mxu2  ;;  %v710_v44 = vpop.f32.mrf.mxu3 }
 0x1d7   :  { %v864_v19 = vpop.f32.mrf.mxu0 }
 0x1d8   :  { %1138 = vmatpush.bf16.msra.mxu2 %v2626_v10  ;;  %1151 = vmatpush.bf16.msra.mxu3 %v2632_v11 }
 0x1da   :  { %v879_v38 = vpop.f32.mrf.mxu1 }
 0x1db   :  { %v1772_v38 = vld [vmem:[%s3047_s0 + $0x24] sm:$0x7] }
 0x1dc   :  { %1139 = vmatpush.bf16.msra.mxu2 %v2638_v13  ;;  %1152 = vmatpush.bf16.msra.mxu3 %v2644_v14  ;;  %1068 = vst [vmem:[#allocation1] ss:$9 sm:$0xff] %v1772_v38 }
 0x1de   :  { %v699_v56 = vpop.f32.mrf.mxu2  ;;  %v712_v57 = vpop.f32.mrf.mxu3 }
 0x1df   :  { %v866_v37 = vpop.f32.mrf.mxu0  ;;  %v1753_v56 = vor.u32 %v1924_v35, %v1750_v45  ;;  %v1922_v57 = vld [vmem:[%s3050_s3 + $0x84] sm:$0xf] }
 0x1e0   :  { %1140 = vmatpush.bf16.msra.mxu2 %v2650_v20  ;;  %1153 = vmatpush.bf16.msra.mxu3 %v2656_v23 }
 0x1e1   :  { %1056 = vmatpush.bf16.msrb.mxu1 %v1753_v56 }
 0x1e3   :  { %v1069_v29 = vld [vmem:[#allocation1] sm:$0xff]  ;;  %v1071_v32 = vld [vmem:[#allocation1 + $0x12] sm:$0xff]  ;;  %v1070_v33 = vld [vmem:[#allocation1 + $0x9] sm:$0xff] }
 0x1e4   :  { %1141 = vmatpush.bf16.msra.mxu2 %v2662_v26  ;;  %1154 = vmatpush.bf16.msra.mxu3 %v2755_v50  ;;  %1117 = vst [vmem:[#allocation1] ss:$9 sm:$0xff] %v1773_v34 }
 0x1e5   :  { %1083 = vmatmul.bf16.vlgmr.msrb.gmra.mxu2 %v1069_v29  ;;  %1096 = vmatmul.bf16.vlgmr.msrb.gmra.mxu3 %v1070_v33  ;;  %v1935_v29 = vld [vmem:[%s3050_s3 + $0xe4] sm:$0xf0]  ;;  %v1804_v33 = vld [vmem:[%s3050_s3 + $0xe8] sm:$0xf0] }
 0x1e6   :  { %v766_v62 = vpop.f32.mrf.mxu2  ;;  %v779_v16 = vpop.f32.mrf.mxu3 }
 0x1e7   :  { %v2779_v17 = vadd.f32 %v766_v62, %v697_v43  ;;  %v2781_v18 = vadd.f32 %v779_v16, %v710_v44  ;;  %v2809_v3 = vpop.f32.mrf.mxu0  ;;  %v1749_v44 = vor.u32 %v1925_v48, %v1748_v4  ;;  %v1745_v16 = vor.u32 %v1922_v57, %v1742_v58  ;;  %v1774_v48 = vld [vmem:[%s3047_s0 + $0x2a] sm:$0x7] }
 0x1e8   :  { %1142 = vmatpush.bf16.msra.mxu2 %v2716_v27  ;;  %1155 = vmatpush.bf16.msra.mxu3 %v2762_v55 }
 0x1e9   :  { %1043 = vmatpush.bf16.msrb.mxu0 %v1749_v44  ;;  %1057 = vmatpush.bf16.msrb.mxu1 %v1745_v16 }
 0x1eb   :  { %v1119_v41 = vld [vmem:[#allocation1 + $0x9] sm:$0xff]  ;;  %v1120_v4 = vld [vmem:[#allocation1 + $0x12] sm:$0xff] }
 0x1ec   :  { %1143 = vmatpush.bf16.msra.mxu2 %v2728_v39  ;;  %1156 = vmatpush.bf16.msra.mxu3 %v2769_v60 }
 0x1ed   :  { %1124 = vmatpush.bf16.msra.mxu1 %v2675_v36 }
 0x1ee   :  { %v768_v54 = vpop.f32.mrf.mxu2  ;;  %v781_v53 = vpop.f32.mrf.mxu3 }
 0x1ef   :  { %v929_v54 = vpop.f32.mrf.mxu0 }
 0x1f0   :  { %1144 = vmatpush.bf16.msra.mxu2 %v2740_v42  ;;  %1157 = vmatpush.bf16.msra.mxu3 %v2776_v61 }
 0x1f1   :  { %1125 = vmatpush.bf16.msra.mxu1 %v2682_v15 }
 0x1f4   :  { %1200 = vmatpush.bf16.msrb.mxu2 %v2620_v7  ;;  %1224 = vmatpush.bf16.msrb.mxu3 %v2675_v36 }
 0x1f5   :  { %1126 = vmatpush.bf16.msra.mxu1 %v2689_v21  ;;  %1145 = vmatmul.bf16.vlgmr.msra.gmra.mxu2 %v1119_v41 }
 0x1f6   :  { %v828_v46 = vpop.f32.mrf.mxu2  ;;  %v851_v8 = vpop.f32.mrf.mxu3  ;;  %1158 = vmatmul.bf16.vlgmr.msra.gmra.mxu3 %v1120_v4 }
 0x1f7   :  { %v2807_v0 = vadd.f32 %v828_v46, %v816_v49  ;;  %v865_v1 = vadd.f32 %v864_v19, %v851_v8  ;;  %v1923_v49 = vld [vmem:[%s3050_s3 + $0x84] sm:$0xf0] }
 0x1f8   :  { %v1741_v62 = vor.u32 %v1923_v49, %v1740_v47  ;;  %1201 = vmatpush.bf16.msrb.mxu2 %v2632_v11  ;;  %1225 = vmatpush.bf16.msrb.mxu3 %v2682_v15 }
 0x1f9   :  { %v2820_v43 = vadd.f32 %v877_v52, %v865_v1  ;;  %1127 = vmatpush.bf16.msra.mxu1 %v2696_v22  ;;  %v1118_v1 = vld [vmem:[#allocation1] sm:$0xff] }
 0x1fa   :  { %1044 = vmatpush.bf16.msrb.mxu0 %v1741_v62  ;;  %1167 = vst [vmem:[#allocation1] ss:$9 sm:$0xff] %v1774_v48  ;;  %v1786_v48 = vld [vmem:[%s3050_s3 + $0xc0] sm:$0xf] }
 0x1fb   :  { %v881_v59 = vmax.f32 %v2807_v0, %v2820_v43 }
 0x1fc   :  { %1202 = vmatpush.bf16.msrb.mxu2 %v2644_v14  ;;  %1226 = vmatpush.bf16.msrb.mxu3 %v2689_v21 }
 0x1fd   :  { %1128 = vmatpush.bf16.msra.mxu1 %v2703_v24 }
 0x1fe   :  { %v830_v19 = vpop.f32.mrf.mxu2  ;;  %v853_v52 = vpop.f32.mrf.mxu3  ;;  %1101 = vmatpush.bf16.msra.mxu0 %v2620_v7 }
 0x1ff   :  { %v951_v53 = vpop.f32.mrf.mxu1 }
 0x200   :  { %1203 = vmatpush.bf16.msrb.mxu2 %v2656_v23  ;;  %1227 = vmatpush.bf16.msrb.mxu3 %v2696_v22 }
 0x201   :  { %1129 = vmatpush.bf16.msra.mxu1 %v2710_v25  ;;  %v1170_v57 = vld [vmem:[#allocation1 + $0x12] sm:$0xff]  ;;  %v1168_v0 = vld [vmem:[#allocation1] sm:$0xff]  ;;  %v1169_v43 = vld [vmem:[#allocation1 + $0x9] sm:$0xff] }
 0x202   :  { %1102 = vmatpush.bf16.msra.mxu0 %v2632_v11 }
 0x204   :  { %1204 = vmatpush.bf16.msrb.mxu2 %v2755_v50  ;;  %1228 = vmatpush.bf16.msrb.mxu3 %v2703_v24 }
 0x205   :  { %1130 = vmatpush.bf16.msra.mxu1 %v2722_v28 }
 0x206   :  { %1103 = vmatpush.bf16.msra.mxu0 %v2644_v14 }
 0x207   :  { %v953_v37 = vpop.f32.mrf.mxu1 }
 0x208   :  { %1205 = vmatpush.bf16.msrb.mxu2 %v2762_v55  ;;  %1229 = vmatpush.bf16.msrb.mxu3 %v2710_v25 }
 0x209   :  { %1131 = vmatpush.bf16.msra.mxu1 %v2734_v40 }
 0x20a   :  { %1104 = vmatpush.bf16.msra.mxu0 %v2656_v23 }
 0x20c   :  { %1206 = vmatpush.bf16.msrb.mxu2 %v2769_v60  ;;  %1230 = vmatpush.bf16.msrb.mxu3 %v2722_v28 }
 0x20e   :  { %1105 = vmatpush.bf16.msra.mxu0 %v2755_v50 }
 0x210   :  { %1207 = vmatpush.bf16.msrb.mxu2 %v2776_v61  ;;  %1231 = vmatpush.bf16.msrb.mxu3 %v2734_v40 }
 0x212   :  { %1106 = vmatpush.bf16.msra.mxu0 %v2762_v55 }
 0x213   :  { %1208 = vmatmul.bf16.vlgmr.msrb.gmra.mxu2 %v1170_v57  ;;  %v1945_v57 = vld [vmem:[%s3052_s5 + $0x38] sm:$0xff] }
 0x216   :  { %v901_v63 = vpop.f32.mrf.mxu2  ;;  %v914_v9 = vpop.f32.mrf.mxu3  ;;  %1107 = vmatpush.bf16.msra.mxu0 %v2769_v60 }
 0x217   :  { %v915_v2 = vadd.f32 %v914_v9, %v901_v63  ;;  %v1802_v9 = vld [vmem:[%s3050_s3 + $0xe0] sm:$0xf] }
 0x219   :  { %v928_v5 = vadd.f32 %v2809_v3, %v915_v2 }
 0x21a   :  { %1108 = vmatpush.bf16.msra.mxu0 %v2776_v61 }
 0x21b   :  { %v931_v35 = vmax.f32 %v881_v59, %v928_v5  ;;  %v1775_v59 = vld [vmem:[%s3047_s0 + $0x2d] sm:$0x7]  ;;  %v1794_v5 = vld [vmem:[%s3050_s3 + $0xd0] sm:$0xf] }
 0x21c   :  { %1217 = vst [vmem:[#allocation1] ss:$9 sm:$0xff] %v1775_v59  ;;  %v1943_v59 = vld [vmem:[%s3052_s5 + $0x28] sm:$0xff] }
 0x21e   :  { %v903_v30 = vpop.f32.mrf.mxu2  ;;  %v916_v31 = vpop.f32.mrf.mxu3 }
 0x21f   :  { %v1934_v30 = vld [vmem:[%s3050_s3 + $0xe4] sm:$0xf] }
 0x220   :  { %v1807_v34 = vor.u32 %v1934_v30, %v1804_v33  ;;  %v1956_v33 = vld [vmem:[%s3053_s6] ss:$0 sm:$0xff]  ;;  %s2011_s6 = smov [#allocation2]  }
 0x221   :  { %s1536_s24 = sshll.u32 %s2011_s6, 4  ;;  %s1537_s24 = int_to_ptr.vmem [resolvable:$true] %s1536_s24 }
 0x236   :  { %v964_v46 = vpop.f32.mrf.mxu2  ;;  %v977_v8 = vpop.f32.mrf.mxu3 }
 0x237   :  { %v965_v12 = vadd.f32 %v964_v46, %v951_v53  ;;  %v1933_v46 = vld [vmem:[%s3050_s3 + $0xd4] sm:$0xf0] }
 0x239   :  { %v978_v3 = vadd.f32 %v977_v8, %v965_v12  ;;  %v1932_v8 = vld [vmem:[%s3050_s3 + $0xd4] sm:$0xf]  ;;  %v1795_v12 = vor.u32 %v1933_v46, %v1794_v5 }
 0x23b   :  { %v981_v44 = vmax.f32 %v931_v35, %v978_v3  ;;  %v1931_v35 = vld [vmem:[%s3050_s3 + $0xc4] sm:$0xf0]  ;;  %v1930_v3 = vld [vmem:[%s3050_s3 + $0xc4] sm:$0xf] }
 0x23d   :  { %v982_v45 = vadd.f32 %v2540_v51, %v981_v44  ;;  %v1787_v44 = vor.u32 %v1931_v35, %v1786_v48 }
 0x23e   :  { %v966_v47 = vpop.f32.mrf.mxu2  ;;  %v979_v49 = vpop.f32.mrf.mxu3 }
 0x23f   :  { %v983_v56 = vmax.f32 %v982_v45, 0.0  ;;  %v1788_v45 = vld [vmem:[%s3050_s3 + $0xc8] sm:$0xf0] }
 0x240   :  { %v1791_v47 = vor.u32 %v1930_v3, %v1788_v45 }
 0x241   :  { %v984_v58 = vpack.c.bf16 %v983_v56, %v983_v56 }
 0x243   :  { %1770 = vmatmul.msk.bf16.vlgmr.msrb.gmra.mxu0 %vm684_vm0, %v984_v58  ;;  %1771 = vmatmul.msk.bf16.vlgmr.msrb.gmra.mxu1 %vm684_vm0, %v984_v58  ;;  %v1953_v58 = vld [vmem:[%s3052_s5 + $0x78] sm:$0xff] }
 0x244   :  { %1174 = vmatpush.bf16.msrb.mxu0 %v2675_v36  ;;  %1187 = vmatpush.bf16.msrb.mxu1 %v2614_v6  ;;  %v1218_v36 = vld [vmem:[#allocation1] sm:$0xff] }
 0x245   :  { %1232 = vmatmul.bf16.vlgmr.msrb.gmra.mxu3 %v1218_v36  ;;  %v1951_v36 = vld [vmem:[%s3052_s5 + $0x68] sm:$0xff] }
 0x248   :  { %1175 = vmatpush.bf16.msrb.mxu0 %v2682_v15  ;;  %1188 = vmatpush.bf16.msrb.mxu1 %v2626_v10 }
 0x24c   :  { %1176 = vmatpush.bf16.msrb.mxu0 %v2689_v21  ;;  %1189 = vmatpush.bf16.msrb.mxu1 %v2638_v13 }
 0x250   :  { %1177 = vmatpush.bf16.msrb.mxu0 %v2696_v22  ;;  %1190 = vmatpush.bf16.msrb.mxu1 %v2650_v20 }
 0x253   :  { %1109 = vmatmul.bf16.vlgmr.msra.gmra.mxu0 %v1071_v32  ;;  %1132 = vmatmul.bf16.vlgmr.msra.gmra.mxu1 %v1118_v1  ;;  %v1803_v32 = vor.u32 %v1935_v29, %v1802_v9  ;;  %v1796_v1 = vld [vmem:[%s3050_s3 + $0xd8] sm:$0xf0] }
 0x254   :  { %1178 = vmatpush.bf16.msrb.mxu0 %v2703_v24  ;;  %1191 = vmatpush.bf16.msrb.mxu1 %v2662_v26  ;;  %v1799_v4 = vor.u32 %v1932_v8, %v1796_v1 }
 0x258   :  { %1179 = vmatpush.bf16.msrb.mxu0 %v2710_v25  ;;  %1192 = vmatpush.bf16.msrb.mxu1 %v2716_v27 }
 0x25c   :  { %1180 = vmatpush.bf16.msrb.mxu0 %v2722_v28  ;;  %1193 = vmatpush.bf16.msrb.mxu1 %v2728_v39 }
 0x260   :  { %1181 = vmatpush.bf16.msrb.mxu0 %v2734_v40  ;;  %1194 = vmatpush.bf16.msrb.mxu1 %v2740_v42 }
 0x263   :  { %1182 = vmatmul.bf16.vlgmr.msrb.gmra.mxu0 %v1168_v0  ;;  %1195 = vmatmul.bf16.vlgmr.msrb.gmra.mxu1 %v1169_v43  ;;  %v1944_v0 = vld [vmem:[%s3052_s5 + $0x30] sm:$0xff] }
 0x264   :  { %1237 = vmatpush.bf16.msra.mxu0 %v2614_v6  ;;  %1250 = vmatpush.bf16.msra.mxu1 %v2620_v7  ;;  %v1219_v6 = vld [vmem:[#allocation1 + $0x9] sm:$0xff]  ;;  %v1220_v7 = vld [vmem:[#allocation1 + $0x12] sm:$0xff] }
 0x265   :  { %v1952_v43 = vld [vmem:[%s3052_s5 + $0x70] sm:$0xff] }
 0x268   :  { %1238 = vmatpush.bf16.msra.mxu0 %v2626_v10  ;;  %1251 = vmatpush.bf16.msra.mxu1 %v2632_v11  ;;  %v1084_v10 = vpop.f32.mrf.mxu2 }
 0x26c   :  { %1239 = vmatpush.bf16.msra.mxu0 %v2638_v13  ;;  %1252 = vmatpush.bf16.msra.mxu1 %v2644_v14  ;;  %v1097_v13 = vpop.f32.mrf.mxu3 }
 0x26d   :  { %v1098_v14 = vadd.f32 %v1097_v13, %v1084_v10  ;;  %v1949_v13 = vld [vmem:[%s3052_s5 + $0x58] sm:$0xff] }
 0x270   :  { %1240 = vmatpush.bf16.msra.mxu0 %v2650_v20  ;;  %1253 = vmatpush.bf16.msra.mxu1 %v2656_v23  ;;  %v1086_v11 = vpop.f32.mrf.mxu2 }
 0x271   :  { %v1941_v11 = vld [vmem:[%s3052_s5 + $0x18] sm:$0xff] }
 0x274   :  { %1241 = vmatpush.bf16.msra.mxu0 %v2662_v26  ;;  %1254 = vmatpush.bf16.msra.mxu1 %v2755_v50  ;;  %v1099_v23 = vpop.f32.mrf.mxu3  ;;  %v1937_v50 = vld [vmem:[%s3050_s3 + $0xf4] sm:$0xf0] }
 0x275   :  { %v1948_v23 = vld [vmem:[%s3052_s5 + $0x50] sm:$0xff] }
 0x278   :  { %1242 = vmatpush.bf16.msra.mxu0 %v2716_v27  ;;  %1255 = vmatpush.bf16.msra.mxu1 %v2762_v55  ;;  %v1146_v20 = vpop.f32.mrf.mxu2  ;;  %v1936_v55 = vld [vmem:[%s3050_s3 + $0xf4] sm:$0xf] }
 0x27c   :  { %1243 = vmatpush.bf16.msra.mxu0 %v2728_v39  ;;  %1256 = vmatpush.bf16.msra.mxu1 %v2769_v60  ;;  %v1159_v15 = vpop.f32.mrf.mxu3 }
 0x280   :  { %1244 = vmatpush.bf16.msra.mxu0 %v2740_v42  ;;  %1257 = vmatpush.bf16.msra.mxu1 %v2776_v61  ;;  %v1148_v26 = vpop.f32.mrf.mxu2  ;;  %v1810_v42 = vld [vmem:[%s3050_s3 + $0xf0] sm:$0xf]  ;;  %v1812_v61 = vld [vmem:[%s3050_s3 + $0xf8] sm:$0xf0] }
 0x281   :  { %v1811_v60 = vor.u32 %v1937_v50, %v1810_v42 }
 0x283   :  { %1245 = vmatmul.bf16.vlgmr.msra.gmra.mxu0 %v1219_v6  ;;  %1258 = vmatmul.bf16.vlgmr.msra.gmra.mxu1 %v1220_v7  ;;  %v1942_v6 = vld [vmem:[%s3052_s5 + $0x20] sm:$0xff] }
 0x284   :  { %v1161_v28 = vpop.f32.mrf.mxu3  ;;  %1323 = vmatpush.bf16.msra.mxu2 %v1811_v60  ;;  %1491 = vmatpush.bf16.msrb.mxu0 %v1945_v57  ;;  %v1950_v7 = vld [vmem:[%s3052_s5 + $0x60] sm:$0xff]  ;;  %v1939_v60 = vld [vmem:[%s3052_s5 + $0x8] sm:$0xff] }
 0x285   :  { %1504 = vmatpush.bf16.msrb.mxu1 %v1953_v58 }
 0x288   :  { %1324 = vmatpush.bf16.msra.mxu2 %v1803_v32  ;;  %1492 = vmatpush.bf16.msrb.mxu0 %v1944_v0 }
 0x289   :  { %1505 = vmatpush.bf16.msrb.mxu1 %v1952_v43 }
 0x28c   :  { %1325 = vmatpush.bf16.msra.mxu2 %v1795_v12  ;;  %1493 = vmatpush.bf16.msrb.mxu0 %v1943_v59 }
 0x28d   :  { %1506 = vmatpush.bf16.msrb.mxu1 %v1951_v36 }
 0x290   :  { %1326 = vmatpush.bf16.msra.mxu2 %v1787_v44  ;;  %1494 = vmatpush.bf16.msrb.mxu0 %v1942_v6 }
 0x291   :  { %1507 = vmatpush.bf16.msrb.mxu1 %v1950_v7 }
 0x294   :  { %1495 = vmatpush.bf16.msrb.mxu0 %v1941_v11 }
 0x295   :  { %1508 = vmatpush.bf16.msrb.mxu1 %v1949_v13 }
 0x296   :  { %v2928_v27 = vpop.f32.mrf.mxu2 }
 0x299   :  { %1509 = vmatpush.bf16.msrb.mxu1 %v1948_v23 }
 0x2c0   :  { %v1046_v21 = vpop.f32.mrf.mxu0  ;;  %v1059_v22 = vpop.f32.mrf.mxu1 }
 0x2c1   :  { %v2923_v24 = vadd.f32 %v1046_v21, %v2779_v17  ;;  %v2926_v25 = vadd.f32 %v1059_v22, %v2781_v18  ;;  %v1815_v17 = vor.u32 %v1936_v55, %v1812_v61  ;;  %v1211_v18 = vpop.f32.mrf.mxu2  ;;  %v1947_v61 = vld [vmem:[%s3052_s5 + $0x48] sm:$0xff] }
 0x2c2   :  { %1510 = vmatpush.bf16.msrb.mxu1 %v1947_v61  ;;  %v1347_v18 = vld [vmem:[%s3051_s4] sm:$0x3] }
 0x2c3   :  { %1336 = vmatpush.bf16.msra.mxu3 %v1815_v17  ;;  %v1946_v17 = vld [vmem:[%s3052_s5 + $0x40] sm:$0xff] }
 0x2c6   :  { %1511 = vmatpush.bf16.msrb.mxu1 %v1946_v17 }
 0x2c7   :  { %1337 = vmatpush.bf16.msra.mxu3 %v1807_v34 }
 0x2c8   :  { %v1048_v39 = vpop.f32.mrf.mxu0  ;;  %v1061_v40 = vpop.f32.mrf.mxu1 }
 0x2c9   :  { %v1233_v37 = vpop.f32.mrf.mxu3 }
 0x2cb   :  { %1338 = vmatpush.bf16.msra.mxu3 %v1799_v4 }
 0x2cf   :  { %1339 = vmatpush.bf16.msra.mxu3 %v1791_v47 }
 0x2d0   :  { %v1110_v62 = vpop.f32.mrf.mxu0  ;;  %v1133_v16 = vpop.f32.mrf.mxu1 }
 0x2d1   :  { %v2942_v19 = vadd.f32 %v1110_v62, %v1098_v14  ;;  %v1147_v52 = vadd.f32 %v1146_v20, %v1133_v16  ;;  %v1235_v31 = vpop.f32.mrf.mxu3  ;;  %v1940_v20 = vld [vmem:[%s3052_s5 + $0x10] sm:$0xff]  ;;  %v1349_v62 = vperm.slane %v1347_v18, 0  ;;  %v1350_v16 = vperm.slane %v1347_v18, 1 }
 0x2d2   :  { %1496 = vmatpush.bf16.msrb.mxu0 %v1940_v20 }
 0x2d3   :  { %v1160_v54 = vadd.f32 %v1159_v15, %v1147_v52 }
 0x2d5   :  { %v1163_v53 = vmax.f32 %v2942_v19, %v1160_v54 }
 0x2d6   :  { %1497 = vmatpush.bf16.msrb.mxu0 %v1939_v60 }
 0x2d8   :  { %v1112_v38 = vpop.f32.mrf.mxu0  ;;  %v1135_v63 = vpop.f32.mrf.mxu1 }
 0x2e0   :  { %v1183_v41 = vpop.f32.mrf.mxu0  ;;  %v1196_v2 = vpop.f32.mrf.mxu1 }
 0x2e1   :  { %v1197_v10 = vadd.f32 %v1196_v2, %v1183_v41 }
 0x2e3   :  { %v1210_v14 = vadd.f32 %v2928_v27, %v1197_v10 }
 0x2e5   :  { %v1213_v22 = vmax.f32 %v1163_v53, %v1210_v14 }
 0x2e8   :  { %v1185_v49 = vpop.f32.mrf.mxu0  ;;  %v1198_v56 = vpop.f32.mrf.mxu1 }
 0x300   :  { %v1246_v26 = vpop.f32.mrf.mxu0  ;;  %v1259_v15 = vpop.f32.mrf.mxu1 }
 0x301   :  { %v1247_v21 = vadd.f32 %v1246_v26, %v1233_v37 }
 0x303   :  { %v1260_v28 = vadd.f32 %v1259_v15, %v1247_v21 }
 0x305   :  { %v1263_v39 = vmax.f32 %v1213_v22, %v1260_v28 }
 0x307   :  { %v1264_v27 = vadd.f32 %v2540_v51, %v1263_v39  ;;  %v1938_v51 = vld [vmem:[%s3052_s5] sm:$0xff] }
 0x308   :  { %v1248_v40 = vpop.f32.mrf.mxu0  ;;  %v1261_v42 = vpop.f32.mrf.mxu1  ;;  %1498 = vmatpush.bf16.msrb.mxu0 %v1938_v51 }
 0x309   :  { %v1265_v50 = vmax.f32 %v1264_v27, 0.0 }
 0x30b   :  { %v1266_v55 = vpack.c.bf16 %v1265_v50, %v1265_v50 }
 0x30d   :  { %1816 = vmatmul.msk.bf16.vlgmr.msra.gmra.mxu2 %vm684_vm0, %v1266_v55  ;;  %1817 = vmatmul.msk.bf16.vlgmr.msra.gmra.mxu3 %vm684_vm0, %v1266_v55 }
 0x390   :  { %v1328_v19 = vpop.f32.mrf.mxu2  ;;  %v1341_v52 = vpop.f32.mrf.mxu3 }
 0x391   :  { %v1345_v54 = vadd.f32 %v1328_v19, %v2923_v24  ;;  %v1346_v53 = vadd.f32 %v1341_v52, %v2926_v25 }
 0x393   :  { %v1353_v37 = vadd.f32 %v1349_v62, %v1345_v54  ;;  %v1354_v38 = vadd.f32 %v1350_v16, %v1346_v53 }
 0x395   :  { %v1355_v63 = vmax.f32 %v1353_v37, 0.0  ;;  %v1356_v9 = vmax.f32 %v1354_v38, 0.0 }
 0x397   :  { %v1357_v29 = vpack.c.bf16 %v1355_v63, %v1355_v63  ;;  %v1358_v30 = vpack.c.bf16 %v1356_v9, %v1356_v9 }
 0x398   :  { %v1330_v31 = vpop.f32.mrf.mxu2  ;;  %v1343_v32 = vpop.f32.mrf.mxu3 }
 0x399   :  { %1499 = vmatmul.bf16.vlgmr.msrb.gmra.mxu0 %v1357_v29  ;;  %1512 = vmatmul.bf16.vlgmr.msrb.gmra.mxu1 %v1358_v30 }
 0x416   :  { %v1500_v34 = vpop.f32.mrf.mxu0  ;;  %v1513_v41 = vpop.f32.mrf.mxu1 }
 0x417   :  { %v1501_v2 = vadd.f32 %v1956_v33, %v1500_v34 }
 0x419   :  { %v1514_v24 = vadd.f32 %v1513_v41, %v1501_v2 }
 0x41b   :  { %v1518_v25 = vsel %vm1517_vm1, %v1514_v24, -inf }
 0x41c   :  { %1519 = vmax.xlane.f32.xlu0 %v1518_v25 }
 0x41e   :  { %v1502_v5 = vpop.f32.mrf.mxu0  ;;  %v1515_v46 = vpop.f32.mrf.mxu1 }
 0x48f   :  { %v1520_v8 = vpop.xlane.xlu0 %1519 }
 0x490   :  { %v1521_v12 = vsub.f32 %v1514_v24, %v1520_v8 }
 0x492   :  { %v1522_v1 = vmul.f32 1.442695, %v1521_v12 }
 0x494   :  { %1957 = vpow2.f32 %v1522_v1 }
 0x49a   :  { %v1958_v4 = vpop.eup %1957 }
 0x49b   :  { %v1524_v48 = vsel %vm1517_vm1, %v1958_v4, 0.0 }
 0x49c   :  { %1525 = vadd.xlane.f32.xlu0 %v1524_v48 }
 0x50f   :  { %v1526_v35 = vpop.xlane.xlu0 %1525 }
 0x510   :  { %1959 = vlog2.f32 %v1526_v35 }
 0x516   :  { %v1960_v3 = vpop.eup %1959 }
 0x517   :  { %v1528_v44 = vmul.f32 0.6931472, %v1960_v3 }
 0x519   :  { %v1529_v45 = vsub.f32 %v1521_v12, %v1528_v44 }
 0x51b   :  { %1530 = vst.msk [vmem:[#allocation2] sm:$0x3] %vm1517_vm1, %v1529_v45 }
 0x51c   :  { %1541 = dma.vmem_to_hbm [thread:$0]  %s1537_s24, 32, %s1539_s26, [#allocation3]  }
 0x51d   :  { %2009 = dma.done.wait [#allocation3], 32  }
 0x51e   :  { %2010 = vsyncadd [#allocation3], 4294967264 }
 0x51f   :  { %1546 = vsyncpa [#allocation3], 1 }

</bundles_post_ra>
